<compile_context>
chip_gen: v5e
topology: v5e:2x2
jax: 0.10.0
libtpu: 0.0.40
codegen_flags: <defaults>
</compile_context>

<pallas_src>
import functools

import jax
import jax.numpy as jnp
from jax import lax
from jax.experimental import pallas as pl
from jax.experimental.pallas import tpu as pltpu


def _conv_acc(x, w, Hin, Win, Cin):
    """Polyphase transposed-conv GEMM on a VMEM-resident padded image.

    x: (Hin+2, Win+2, Cin) bf16, zero-padded by 1 on each spatial side.
    w: (9*Cin, 4*Cout) bf16; row = (dy*3+dx)*Cin + ci, col = (ry*2+rx)*Cout + co.
    returns f32 (Hin*Win, 4*Cout); row = q*Win + p, col = (ry*2+rx)*Cout + co,
    which equals ConvTranspose2d output y[2q+ry, 2p+rx, co] (bias omitted).
    """
    acc = None
    t = 0
    for dy in range(3):
        for dx in range(3):
            xt = x[dy:dy + Hin, dx:dx + Win, :].reshape(Hin * Win, Cin)
            wt_ = w[t * Cin:(t + 1) * Cin, :]
            d = jnp.dot(xt, wt_, preferred_element_type=jnp.float32)
            acc = d if acc is None else acc + d
            t += 1
    return acc


def _stats_kernel(xpad_ref, w_ref, sum_ref, sumsq_ref, *, Hin, Win, Cin):
    """Pass 1: conv GEMM for one image + global per-(phase,channel) sum / sumsq."""
    n = pl.program_id(0)

    @pl.when(n == 0)
    def _():
        sum_ref[...] = jnp.zeros_like(sum_ref)
        sumsq_ref[...] = jnp.zeros_like(sumsq_ref)

    acc = _conv_acc(xpad_ref[0], w_ref[...], Hin, Win, Cin)
    sum_ref[...] += jnp.sum(acc, axis=0, keepdims=True)
    sumsq_ref[...] += jnp.sum(acc * acc, axis=0, keepdims=True)


def _norm_kernel(xpad_ref, w_ref, scale_ref, shift_ref, o_ref, *, Hin, Win, Cin):
    """Pass 2: recompute conv GEMM, apply fused BatchNorm normalize+affine."""
    acc = _conv_acc(xpad_ref[0], w_ref[...], Hin, Win, Cin)
    # Conv bias cancels against the BN mean subtraction; LeakyReLU(slope=1) == id.
    o_ref[0] = (acc * scale_ref[...] + shift_ref[...]).astype(o_ref.dtype)


def decoder_block(x_nchw, wt, bias, gamma, beta, *, kernel_size=4, padding=1,
                  stride=2, output_padding=0, eps=1e-5):
    """Forward of DecoderBlock. x_nchw: (N, Cin, H, W); wt: (Cin, Cout, K, K)."""
    del bias  # exactly cancelled by training-mode BatchNorm mean subtraction
    K = kernel_size
    assert (K, stride, padding, output_padding) == (4, 2, 1, 0), (
        "polyphase kernel is specialised to the DecoderBlock defaults")
    N, Cin, Hin, Win = x_nchw.shape
    Cout = wt.shape[1]
    Ho, Wo = 2 * Hin, 2 * Win

    # --- glue: NCHW -> NHWC, pad by 1, cast bf16 (single small transpose+pad) ---
    x = jnp.transpose(x_nchw, (0, 2, 3, 1))
    xpad = jnp.pad(x, ((0, 0), (1, 1), (1, 1), (0, 0))).astype(jnp.bfloat16)

    # --- polyphase GEMM weight (3,3,Cin,2,2,Cout) -> (9*Cin, 4*Cout), bf16 ---
    # For output phase (ry,rx) and in-window tap (dy,dx) in {0,1}^2:
    #   tap position (dy3,dx3) = (ry+dy, rx+dx), torch kernel index
    #   (ky,kx) = (3-ry-2*dy, 3-rx-2*dx).
    w9 = jnp.zeros((3, 3, Cin, 2, 2, Cout), jnp.float32)
    for ry in range(2):
        for rx in range(2):
            for dy in range(2):
                for dx in range(2):
                    dy3, dx3 = ry + dy, rx + dx
                    ky, kx = 3 - ry - 2 * dy, 3 - rx - 2 * dx
                    w9 = w9.at[dy3, dx3, :, ry, rx, :].set(wt[:, :, ky, kx])
    w_col = w9.reshape(9 * Cin, 4 * Cout).astype(jnp.bfloat16)

    xpad_spec = pl.BlockSpec((1, Hin + 2, Win + 2, Cin), lambda n: (n, 0, 0, 0))
    w_spec = pl.BlockSpec((9 * Cin, 4 * Cout), lambda n: (0, 0))
    vec_spec = pl.BlockSpec((1, 4 * Cout), lambda n: (0, 0))

    # --- pass 1: conv GEMM + global sum / sum-of-squares (accumulator outputs) ---
    s4, q4 = pl.pallas_call(
        functools.partial(_stats_kernel, Hin=Hin, Win=Win, Cin=Cin),
        grid=(N,),
        in_specs=[xpad_spec, w_spec],
        out_specs=[vec_spec, vec_spec],
        out_shape=[jax.ShapeDtypeStruct((1, 4 * Cout), jnp.float32),
                   jax.ShapeDtypeStruct((1, 4 * Cout), jnp.float32)],
        compiler_params=pltpu.CompilerParams(dimension_semantics=("arbitrary",)),
    )(xpad, w_col)

    # --- tiny O(Cout) BN scalar math (biased variance, torch train mode) ---
    cnt = float(N * Ho * Wo)
    s = s4.reshape(4, Cout).sum(axis=0)
    q = q4.reshape(4, Cout).sum(axis=0)
    mean = s / cnt
    var = q / cnt - mean * mean
    scale_c = gamma.astype(jnp.float32) * lax.rsqrt(var + eps)
    shift_c = beta.astype(jnp.float32) - mean * scale_c
    scale4 = jnp.tile(scale_c, 4).reshape(1, 4 * Cout)
    shift4 = jnp.tile(shift_c, 4).reshape(1, 4 * Cout)

    # --- pass 2: recompute conv GEMM + fused normalize/affine, per-image blocks ---
    y_flat = pl.pallas_call(
        functools.partial(_norm_kernel, Hin=Hin, Win=Win, Cin=Cin),
        grid=(N,),
        in_specs=[xpad_spec, w_spec, vec_spec, vec_spec],
        out_specs=pl.BlockSpec((1, Hin * Win, 4 * Cout), lambda n: (n, 0, 0)),
        out_shape=jax.ShapeDtypeStruct((N, Hin * Win, 4 * Cout), jnp.float32),
        compiler_params=pltpu.CompilerParams(dimension_semantics=("parallel",)),
    )(xpad, w_col, scale4, shift4)

    # --- glue: (n, q, p, ry, rx, co) -> NCHW with a single transpose ---
    y = y_flat.reshape(N, Hin, Win, 2, 2, Cout)
    y = jnp.transpose(y, (0, 5, 1, 3, 2, 4)).reshape(N, Cout, Ho, Wo)
    return y


def decoder_block_reference(x_nchw, wt, bias, gamma, beta, *, kernel_size=4,
                            padding=1, stride=2, output_padding=0, eps=1e-5):
    """Pure-JAX reference (XLA dilated conv, f32, includes conv bias)."""
    K = kernel_size
    Cout = wt.shape[1]
    x = jnp.transpose(x_nchw, (0, 2, 3, 1)).astype(jnp.float32)
    w_hwio = jnp.transpose(wt[:, :, ::-1, ::-1], (2, 3, 0, 1)).astype(jnp.float32)
    pb = K - 1 - padding
    pe = K - 1 - padding + output_padding
    y = lax.conv_general_dilated(
        x, w_hwio, window_strides=(1, 1), padding=((pb, pe), (pb, pe)),
        lhs_dilation=(stride, stride),
        dimension_numbers=("NHWC", "HWIO", "NHWC"))
    y = y + bias.reshape(1, 1, 1, Cout)
    m = jnp.mean(y, axis=(0, 1, 2), keepdims=True)
    v = jnp.mean((y - m) ** 2, axis=(0, 1, 2), keepdims=True)
    y = (y - m) * lax.rsqrt(v + eps)
    y = y * gamma.reshape(1, 1, 1, Cout) + beta.reshape(1, 1, 1, Cout)
    # LeakyReLU(negative_slope=1) is the identity.
    return jnp.transpose(y, (0, 3, 1, 2))


if __name__ == "__main__":
    # Small shapes consistent with the module: batch=2, channel_in=4, channel_out=8,
    # spatial 16x16 -> transposed conv upsamples to 32x32.
    N, Cin, Cout, Hin, Win, K = 2, 4, 8, 16, 16, 4

    key = jax.random.PRNGKey(0)
    kx_, kw, kb, kg, kbe = jax.random.split(key, 5)
    x = jax.random.normal(kx_, (N, Cin, Hin, Win), jnp.float32)
    # ConvTranspose2d weight shape in PyTorch: (Cin, Cout, kH, kW).
    wt = jax.random.normal(kw, (Cin, Cout, K, K), jnp.float32) * 0.1
    bias = jax.random.normal(kb, (Cout,), jnp.float32) * 0.1
    gamma = 1.0 + 0.1 * jax.random.normal(kg, (Cout,), jnp.float32)
    beta = 0.1 * jax.random.normal(kbe, (Cout,), jnp.float32)
    # TODO(synk): BatchNorm running_mean/running_var updates (momentum=0.9) are
    # training-time state mutation and are not produced as kernel outputs.

    fwd = jax.jit(decoder_block)
    out = jax.block_until_ready(fwd(x, wt, bias, gamma, beta))
    assert out.shape == (N, Cout, 2 * Hin, 2 * Win), out.shape

    ref = decoder_block_reference(x, wt, bias, gamma, beta)
    if not bool(jnp.allclose(out, ref, atol=2e-2, rtol=2e-2)):
        err = float(jnp.max(jnp.abs(out - ref)))
        raise AssertionError(
            f"Pallas kernel output mismatch vs JAX reference (max abs err {err})")
    print("KERNEL_OK")
</pallas_src>

<mosaic_0001>
module attributes {stable_mosaic.version = 11 : i64} {
  func.func @_stats_kernel(%arg0: i32, %arg1: memref<1x18x18x4xbf16, #tpu.memory_space<vmem>>, %arg2: memref<36x32xbf16, #tpu.memory_space<vmem>>, %arg3: memref<1x32xf32, #tpu.memory_space<vmem>>, %arg4: memref<1x32xf32, #tpu.memory_space<vmem>>) attributes {dimension_semantics = [#tpu.dimension_semantics<arbitrary>], iteration_bounds = array<i64: 2>, scalar_prefetch = 0 : i64, scratch_operands = 0 : i64, tpu.core_type = #tpu.core_type<tc>, window_params = [{transform_indices = @transform_0, window_bounds = array<i64: 1, 18, 18, 4>}, {pipeline_mode = #tpu.pipeline_mode<synchronous>, transform_indices = @transform_1, window_bounds = array<i64: 36, 32>}, {pipeline_mode = #tpu.pipeline_mode<synchronous>, transform_indices = @transform_2, window_bounds = array<i64: 1, 32>}, {pipeline_mode = #tpu.pipeline_mode<synchronous>, transform_indices = @transform_3, window_bounds = array<i64: 1, 32>}]} {
    %c0_i32 = arith.constant 0 : i32
    %0 = arith.cmpi eq, %arg0, %c0_i32 : i32
    %1 = arith.extui %0 : i1 to i32
    %c0_i32_0 = arith.constant 0 : i32
    %2 = arith.cmpi ne, %1, %c0_i32_0 : i32
    scf.if %2 {
      %cst_24 = arith.constant 0.000000e+00 : f32
      %61 = vector.broadcast %cst_24 : f32 to vector<1x32xf32>
      %c0_25 = arith.constant 0 : index
      %c0_26 = arith.constant 0 : index
      %62 = vector.load %arg3[%c0_25, %c0_26] : memref<1x32xf32, #tpu.memory_space<vmem>>, vector<1x32xf32>
      tpu.vector_store %arg3[%c0_25, %c0_26], %61 {strides = array<i32>} : memref<1x32xf32, #tpu.memory_space<vmem>>, vector<1x32xf32>,
      %cst_27 = arith.constant 0.000000e+00 : f32
      %63 = vector.broadcast %cst_27 : f32 to vector<1x32xf32>
      %c0_28 = arith.constant 0 : index
      %c0_29 = arith.constant 0 : index
      %64 = vector.load %arg4[%c0_28, %c0_29] : memref<1x32xf32, #tpu.memory_space<vmem>>, vector<1x32xf32>
      tpu.vector_store %arg4[%c0_28, %c0_29], %63 {strides = array<i32>} : memref<1x32xf32, #tpu.memory_space<vmem>>, vector<1x32xf32>,
    } else {
    }
    %c0 = arith.constant 0 : index
    %c0_1 = arith.constant 0 : index
    %c0_2 = arith.constant 0 : index
    %c0_3 = arith.constant 0 : index
    %3 = vector.load %arg1[%c0, %c0_1, %c0_2, %c0_3] : memref<1x18x18x4xbf16, #tpu.memory_space<vmem>>, vector<1x18x18x4xbf16>
    %4 = vector.shape_cast %3 : vector<1x18x18x4xbf16> to vector<18x18x4xbf16>
    %c0_4 = arith.constant 0 : index
    %c0_5 = arith.constant 0 : index
    %5 = vector.load %arg2[%c0_4, %c0_5] : memref<36x32xbf16, #tpu.memory_space<vmem>>, vector<36x32xbf16>
    %6 = vector.extract_strided_slice %4 {offsets = [0, 0, 0], sizes = [16, 16, 4], strides = [1, 1, 1]} : vector<18x18x4xbf16> to vector<16x16x4xbf16>
    %7 = vector.shape_cast %6 : vector<16x16x4xbf16> to vector<256x4xbf16>
    %8 = vector.extract_strided_slice %5 {offsets = [0, 0], sizes = [4, 32], strides = [1, 1]} : vector<36x32xbf16> to vector<4x32xbf16>
    %cst = arith.constant dense<0.000000e+00> : vector<256x32xf32>
    %9 = tpu.matmul %7, %8, %cst {dimension_numbers = #tpu.dot_dimension_numbers<[1], [0], [0], [1], [0, 0, 1, 1], [], []>} : vector<256x4xbf16>, vector<4x32xbf16>, vector<256x32xf32> -> vector<256x32xf32>
    %10 = vector.extract_strided_slice %4 {offsets = [0, 1, 0], sizes = [16, 16, 4], strides = [1, 1, 1]} : vector<18x18x4xbf16> to vector<16x16x4xbf16>
    %11 = vector.shape_cast %10 : vector<16x16x4xbf16> to vector<256x4xbf16>
    %12 = vector.extract_strided_slice %5 {offsets = [4, 0], sizes = [4, 32], strides = [1, 1]} : vector<36x32xbf16> to vector<4x32xbf16>
    %cst_6 = arith.constant dense<0.000000e+00> : vector<256x32xf32>
    %13 = tpu.matmul %11, %12, %cst_6 {dimension_numbers = #tpu.dot_dimension_numbers<[1], [0], [0], [1], [0, 0, 1, 1], [], []>} : vector<256x4xbf16>, vector<4x32xbf16>, vector<256x32xf32> -> vector<256x32xf32>
    %14 = arith.addf %9, %13 : vector<256x32xf32>
    %15 = vector.extract_strided_slice %4 {offsets = [0, 2, 0], sizes = [16, 16, 4], strides = [1, 1, 1]} : vector<18x18x4xbf16> to vector<16x16x4xbf16>
    %16 = vector.shape_cast %15 : vector<16x16x4xbf16> to vector<256x4xbf16>
    %17 = vector.extract_strided_slice %5 {offsets = [8, 0], sizes = [4, 32], strides = [1, 1]} : vector<36x32xbf16> to vector<4x32xbf16>
    %cst_7 = arith.constant dense<0.000000e+00> : vector<256x32xf32>
    %18 = tpu.matmul %16, %17, %cst_7 {dimension_numbers = #tpu.dot_dimension_numbers<[1], [0], [0], [1], [0, 0, 1, 1], [], []>} : vector<256x4xbf16>, vector<4x32xbf16>, vector<256x32xf32> -> vector<256x32xf32>
    %19 = arith.addf %14, %18 : vector<256x32xf32>
    %20 = vector.extract_strided_slice %4 {offsets = [1, 0, 0], sizes = [16, 16, 4], strides = [1, 1, 1]} : vector<18x18x4xbf16> to vector<16x16x4xbf16>
    %21 = vector.shape_cast %20 : vector<16x16x4xbf16> to vector<256x4xbf16>
    %22 = vector.extract_strided_slice %5 {offsets = [12, 0], sizes = [4, 32], strides = [1, 1]} : vector<36x32xbf16> to vector<4x32xbf16>
    %cst_8 = arith.constant dense<0.000000e+00> : vector<256x32xf32>
    %23 = tpu.matmul %21, %22, %cst_8 {dimension_numbers = #tpu.dot_dimension_numbers<[1], [0], [0], [1], [0, 0, 1, 1], [], []>} : vector<256x4xbf16>, vector<4x32xbf16>, vector<256x32xf32> -> vector<256x32xf32>
    %24 = arith.addf %19, %23 : vector<256x32xf32>
    %25 = vector.extract_strided_slice %4 {offsets = [1, 1, 0], sizes = [16, 16, 4], strides = [1, 1, 1]} : vector<18x18x4xbf16> to vector<16x16x4xbf16>
    %26 = vector.shape_cast %25 : vector<16x16x4xbf16> to vector<256x4xbf16>
    %27 = vector.extract_strided_slice %5 {offsets = [16, 0], sizes = [4, 32], strides = [1, 1]} : vector<36x32xbf16> to vector<4x32xbf16>
    %cst_9 = arith.constant dense<0.000000e+00> : vector<256x32xf32>
    %28 = tpu.matmul %26, %27, %cst_9 {dimension_numbers = #tpu.dot_dimension_numbers<[1], [0], [0], [1], [0, 0, 1, 1], [], []>} : vector<256x4xbf16>, vector<4x32xbf16>, vector<256x32xf32> -> vector<256x32xf32>
    %29 = arith.addf %24, %28 : vector<256x32xf32>
    %30 = vector.extract_strided_slice %4 {offsets = [1, 2, 0], sizes = [16, 16, 4], strides = [1, 1, 1]} : vector<18x18x4xbf16> to vector<16x16x4xbf16>
    %31 = vector.shape_cast %30 : vector<16x16x4xbf16> to vector<256x4xbf16>
    %32 = vector.extract_strided_slice %5 {offsets = [20, 0], sizes = [4, 32], strides = [1, 1]} : vector<36x32xbf16> to vector<4x32xbf16>
    %cst_10 = arith.constant dense<0.000000e+00> : vector<256x32xf32>
    %33 = tpu.matmul %31, %32, %cst_10 {dimension_numbers = #tpu.dot_dimension_numbers<[1], [0], [0], [1], [0, 0, 1, 1], [], []>} : vector<256x4xbf16>, vector<4x32xbf16>, vector<256x32xf32> -> vector<256x32xf32>
    %34 = arith.addf %29, %33 : vector<256x32xf32>
    %35 = vector.extract_strided_slice %4 {offsets = [2, 0, 0], sizes = [16, 16, 4], strides = [1, 1, 1]} : vector<18x18x4xbf16> to vector<16x16x4xbf16>
    %36 = vector.shape_cast %35 : vector<16x16x4xbf16> to vector<256x4xbf16>
    %37 = vector.extract_strided_slice %5 {offsets = [24, 0], sizes = [4, 32], strides = [1, 1]} : vector<36x32xbf16> to vector<4x32xbf16>
    %cst_11 = arith.constant dense<0.000000e+00> : vector<256x32xf32>
    %38 = tpu.matmul %36, %37, %cst_11 {dimension_numbers = #tpu.dot_dimension_numbers<[1], [0], [0], [1], [0, 0, 1, 1], [], []>} : vector<256x4xbf16>, vector<4x32xbf16>, vector<256x32xf32> -> vector<256x32xf32>
    %39 = arith.addf %34, %38 : vector<256x32xf32>
    %40 = vector.extract_strided_slice %4 {offsets = [2, 1, 0], sizes = [16, 16, 4], strides = [1, 1, 1]} : vector<18x18x4xbf16> to vector<16x16x4xbf16>
    %41 = vector.shape_cast %40 : vector<16x16x4xbf16> to vector<256x4xbf16>
    %42 = vector.extract_strided_slice %5 {offsets = [28, 0], sizes = [4, 32], strides = [1, 1]} : vector<36x32xbf16> to vector<4x32xbf16>
    %cst_12 = arith.constant dense<0.000000e+00> : vector<256x32xf32>
    %43 = tpu.matmul %41, %42, %cst_12 {dimension_numbers = #tpu.dot_dimension_numbers<[1], [0], [0], [1], [0, 0, 1, 1], [], []>} : vector<256x4xbf16>, vector<4x32xbf16>, vector<256x32xf32> -> vector<256x32xf32>
    %44 = arith.addf %39, %43 : vector<256x32xf32>
    %45 = vector.extract_strided_slice %4 {offsets = [2, 2, 0], sizes = [16, 16, 4], strides = [1, 1, 1]} : vector<18x18x4xbf16> to vector<16x16x4xbf16>
    %46 = vector.shape_cast %45 : vector<16x16x4xbf16> to vector<256x4xbf16>
    %47 = vector.extract_strided_slice %5 {offsets = [32, 0], sizes = [4, 32], strides = [1, 1]} : vector<36x32xbf16> to vector<4x32xbf16>
    %cst_13 = arith.constant dense<0.000000e+00> : vector<256x32xf32>
    %48 = tpu.matmul %46, %47, %cst_13 {dimension_numbers = #tpu.dot_dimension_numbers<[1], [0], [0], [1], [0, 0, 1, 1], [], []>} : vector<256x4xbf16>, vector<4x32xbf16>, vector<256x32xf32> -> vector<256x32xf32>
    %49 = arith.addf %44, %48 : vector<256x32xf32>
    %c0_14 = arith.constant 0 : index
    %c0_15 = arith.constant 0 : index
    %50 = vector.load %arg3[%c0_14, %c0_15] : memref<1x32xf32, #tpu.memory_space<vmem>>, vector<1x32xf32>
    %cst_16 = arith.constant dense<0.000000e+00> : vector<32xf32>
    %51 = vector.multi_reduction <add>, %49, %cst_16 [0] : vector<256x32xf32> to vector<32xf32>
    %52 = vector.shape_cast %51 : vector<32xf32> to vector<1x32xf32>
    %53 = arith.addf %50, %52 : vector<1x32xf32>
    %c0_17 = arith.constant 0 : index
    %c0_18 = arith.constant 0 : index
    %54 = vector.load %arg3[%c0_17, %c0_18] : memref<1x32xf32, #tpu.memory_space<vmem>>, vector<1x32xf32>
    tpu.vector_store %arg3[%c0_17, %c0_18], %53 {strides = array<i32>} : memref<1x32xf32, #tpu.memory_space<vmem>>, vector<1x32xf32>,
    %c0_19 = arith.constant 0 : index
    %c0_20 = arith.constant 0 : index
    %55 = vector.load %arg4[%c0_19, %c0_20] : memref<1x32xf32, #tpu.memory_space<vmem>>, vector<1x32xf32>
    %56 = arith.mulf %49, %49 : vector<256x32xf32>
    %cst_21 = arith.constant dense<0.000000e+00> : vector<32xf32>
    %57 = vector.multi_reduction <add>, %56, %cst_21 [0] : vector<256x32xf32> to vector<32xf32>
    %58 = vector.shape_cast %57 : vector<32xf32> to vector<1x32xf32>
    %59 = arith.addf %55, %58 : vector<1x32xf32>
    %c0_22 = arith.constant 0 : index
    %c0_23 = arith.constant 0 : index
    %60 = vector.load %arg4[%c0_22, %c0_23] : memref<1x32xf32, #tpu.memory_space<vmem>>, vector<1x32xf32>
    tpu.vector_store %arg4[%c0_22, %c0_23], %59 {strides = array<i32>} : memref<1x32xf32, #tpu.memory_space<vmem>>, vector<1x32xf32>,
    return
  }
  func.func @transform_0(%arg0: i32) -> (i32, i32, i32, i32) {
    %c0_i32 = arith.constant 0 : i32
    %c0_i32_0 = arith.constant 0 : i32
    %c0_i32_1 = arith.constant 0 : i32
    %c0_i32_2 = arith.constant 0 : i32
    return %arg0, %c0_i32, %c0_i32_0, %c0_i32_1 : i32, i32, i32, i32
  }
  func.func @transform_1(%arg0: i32) -> (i32, i32) {
    %c0_i32 = arith.constant 0 : i32
    %c0_i32_0 = arith.constant 0 : i32
    %c0_i32_1 = arith.constant 0 : i32
    return %c0_i32, %c0_i32_0 : i32, i32
  }
  func.func @transform_2(%arg0: i32) -> (i32, i32) {
    %c0_i32 = arith.constant 0 : i32
    %c0_i32_0 = arith.constant 0 : i32
    %c0_i32_1 = arith.constant 0 : i32
    return %c0_i32, %c0_i32_0 : i32, i32
  }
  func.func @transform_3(%arg0: i32) -> (i32, i32) {
    %c0_i32 = arith.constant 0 : i32
    %c0_i32_0 = arith.constant 0 : i32
    %c0_i32_1 = arith.constant 0 : i32
    return %c0_i32, %c0_i32_0 : i32, i32
  }
}

module attributes {stable_mosaic.version = 11 : i64} {
  func.func @_norm_kernel(%arg0: i32, %arg1: memref<1x18x18x4xbf16, #tpu.memory_space<vmem>>, %arg2: memref<36x32xbf16, #tpu.memory_space<vmem>>, %arg3: memref<1x32xf32, #tpu.memory_space<vmem>>, %arg4: memref<1x32xf32, #tpu.memory_space<vmem>>, %arg5: memref<1x256x32xf32, #tpu.memory_space<vmem>>) attributes {dimension_semantics = [#tpu.dimension_semantics<parallel>], iteration_bounds = array<i64: 2>, scalar_prefetch = 0 : i64, scratch_operands = 0 : i64, tpu.core_type = #tpu.core_type<tc>, window_params = [{transform_indices = @transform_0, window_bounds = array<i64: 1, 18, 18, 4>}, {pipeline_mode = #tpu.pipeline_mode<synchronous>, transform_indices = @transform_1, window_bounds = array<i64: 36, 32>}, {pipeline_mode = #tpu.pipeline_mode<synchronous>, transform_indices = @transform_2, window_bounds = array<i64: 1, 32>}, {pipeline_mode = #tpu.pipeline_mode<synchronous>, transform_indices = @transform_3, window_bounds = array<i64: 1, 32>}, {transform_indices = @transform_4, window_bounds = array<i64: 1, 256, 32>}]} {
    %c0 = arith.constant 0 : index
    %c0_0 = arith.constant 0 : index
    %c0_1 = arith.constant 0 : index
    %c0_2 = arith.constant 0 : index
    %0 = vector.load %arg1[%c0, %c0_0, %c0_1, %c0_2] : memref<1x18x18x4xbf16, #tpu.memory_space<vmem>>, vector<1x18x18x4xbf16>
    %1 = vector.shape_cast %0 : vector<1x18x18x4xbf16> to vector<18x18x4xbf16>
    %c0_3 = arith.constant 0 : index
    %c0_4 = arith.constant 0 : index
    %2 = vector.load %arg2[%c0_3, %c0_4] : memref<36x32xbf16, #tpu.memory_space<vmem>>, vector<36x32xbf16>
    %3 = vector.extract_strided_slice %1 {offsets = [0, 0, 0], sizes = [16, 16, 4], strides = [1, 1, 1]} : vector<18x18x4xbf16> to vector<16x16x4xbf16>
    %4 = vector.shape_cast %3 : vector<16x16x4xbf16> to vector<256x4xbf16>
    %5 = vector.extract_strided_slice %2 {offsets = [0, 0], sizes = [4, 32], strides = [1, 1]} : vector<36x32xbf16> to vector<4x32xbf16>
    %cst = arith.constant dense<0.000000e+00> : vector<256x32xf32>
    %6 = tpu.matmul %4, %5, %cst {dimension_numbers = #tpu.dot_dimension_numbers<[1], [0], [0], [1], [0, 0, 1, 1], [], []>} : vector<256x4xbf16>, vector<4x32xbf16>, vector<256x32xf32> -> vector<256x32xf32>
    %7 = vector.extract_strided_slice %1 {offsets = [0, 1, 0], sizes = [16, 16, 4], strides = [1, 1, 1]} : vector<18x18x4xbf16> to vector<16x16x4xbf16>
    %8 = vector.shape_cast %7 : vector<16x16x4xbf16> to vector<256x4xbf16>
    %9 = vector.extract_strided_slice %2 {offsets = [4, 0], sizes = [4, 32], strides = [1, 1]} : vector<36x32xbf16> to vector<4x32xbf16>
    %cst_5 = arith.constant dense<0.000000e+00> : vector<256x32xf32>
    %10 = tpu.matmul %8, %9, %cst_5 {dimension_numbers = #tpu.dot_dimension_numbers<[1], [0], [0], [1], [0, 0, 1, 1], [], []>} : vector<256x4xbf16>, vector<4x32xbf16>, vector<256x32xf32> -> vector<256x32xf32>
    %11 = arith.addf %6, %10 : vector<256x32xf32>
    %12 = vector.extract_strided_slice %1 {offsets = [0, 2, 0], sizes = [16, 16, 4], strides = [1, 1, 1]} : vector<18x18x4xbf16> to vector<16x16x4xbf16>
    %13 = vector.shape_cast %12 : vector<16x16x4xbf16> to vector<256x4xbf16>
    %14 = vector.extract_strided_slice %2 {offsets = [8, 0], sizes = [4, 32], strides = [1, 1]} : vector<36x32xbf16> to vector<4x32xbf16>
    %cst_6 = arith.constant dense<0.000000e+00> : vector<256x32xf32>
    %15 = tpu.matmul %13, %14, %cst_6 {dimension_numbers = #tpu.dot_dimension_numbers<[1], [0], [0], [1], [0, 0, 1, 1], [], []>} : vector<256x4xbf16>, vector<4x32xbf16>, vector<256x32xf32> -> vector<256x32xf32>
    %16 = arith.addf %11, %15 : vector<256x32xf32>
    %17 = vector.extract_strided_slice %1 {offsets = [1, 0, 0], sizes = [16, 16, 4], strides = [1, 1, 1]} : vector<18x18x4xbf16> to vector<16x16x4xbf16>
    %18 = vector.shape_cast %17 : vector<16x16x4xbf16> to vector<256x4xbf16>
    %19 = vector.extract_strided_slice %2 {offsets = [12, 0], sizes = [4, 32], strides = [1, 1]} : vector<36x32xbf16> to vector<4x32xbf16>
    %cst_7 = arith.constant dense<0.000000e+00> : vector<256x32xf32>
    %20 = tpu.matmul %18, %19, %cst_7 {dimension_numbers = #tpu.dot_dimension_numbers<[1], [0], [0], [1], [0, 0, 1, 1], [], []>} : vector<256x4xbf16>, vector<4x32xbf16>, vector<256x32xf32> -> vector<256x32xf32>
    %21 = arith.addf %16, %20 : vector<256x32xf32>
    %22 = vector.extract_strided_slice %1 {offsets = [1, 1, 0], sizes = [16, 16, 4], strides = [1, 1, 1]} : vector<18x18x4xbf16> to vector<16x16x4xbf16>
    %23 = vector.shape_cast %22 : vector<16x16x4xbf16> to vector<256x4xbf16>
    %24 = vector.extract_strided_slice %2 {offsets = [16, 0], sizes = [4, 32], strides = [1, 1]} : vector<36x32xbf16> to vector<4x32xbf16>
    %cst_8 = arith.constant dense<0.000000e+00> : vector<256x32xf32>
    %25 = tpu.matmul %23, %24, %cst_8 {dimension_numbers = #tpu.dot_dimension_numbers<[1], [0], [0], [1], [0, 0, 1, 1], [], []>} : vector<256x4xbf16>, vector<4x32xbf16>, vector<256x32xf32> -> vector<256x32xf32>
    %26 = arith.addf %21, %25 : vector<256x32xf32>
    %27 = vector.extract_strided_slice %1 {offsets = [1, 2, 0], sizes = [16, 16, 4], strides = [1, 1, 1]} : vector<18x18x4xbf16> to vector<16x16x4xbf16>
    %28 = vector.shape_cast %27 : vector<16x16x4xbf16> to vector<256x4xbf16>
    %29 = vector.extract_strided_slice %2 {offsets = [20, 0], sizes = [4, 32], strides = [1, 1]} : vector<36x32xbf16> to vector<4x32xbf16>
    %cst_9 = arith.constant dense<0.000000e+00> : vector<256x32xf32>
    %30 = tpu.matmul %28, %29, %cst_9 {dimension_numbers = #tpu.dot_dimension_numbers<[1], [0], [0], [1], [0, 0, 1, 1], [], []>} : vector<256x4xbf16>, vector<4x32xbf16>, vector<256x32xf32> -> vector<256x32xf32>
    %31 = arith.addf %26, %30 : vector<256x32xf32>
    %32 = vector.extract_strided_slice %1 {offsets = [2, 0, 0], sizes = [16, 16, 4], strides = [1, 1, 1]} : vector<18x18x4xbf16> to vector<16x16x4xbf16>
    %33 = vector.shape_cast %32 : vector<16x16x4xbf16> to vector<256x4xbf16>
    %34 = vector.extract_strided_slice %2 {offsets = [24, 0], sizes = [4, 32], strides = [1, 1]} : vector<36x32xbf16> to vector<4x32xbf16>
    %cst_10 = arith.constant dense<0.000000e+00> : vector<256x32xf32>
    %35 = tpu.matmul %33, %34, %cst_10 {dimension_numbers = #tpu.dot_dimension_numbers<[1], [0], [0], [1], [0, 0, 1, 1], [], []>} : vector<256x4xbf16>, vector<4x32xbf16>, vector<256x32xf32> -> vector<256x32xf32>
    %36 = arith.addf %31, %35 : vector<256x32xf32>
    %37 = vector.extract_strided_slice %1 {offsets = [2, 1, 0], sizes = [16, 16, 4], strides = [1, 1, 1]} : vector<18x18x4xbf16> to vector<16x16x4xbf16>
    %38 = vector.shape_cast %37 : vector<16x16x4xbf16> to vector<256x4xbf16>
    %39 = vector.extract_strided_slice %2 {offsets = [28, 0], sizes = [4, 32], strides = [1, 1]} : vector<36x32xbf16> to vector<4x32xbf16>
    %cst_11 = arith.constant dense<0.000000e+00> : vector<256x32xf32>
    %40 = tpu.matmul %38, %39, %cst_11 {dimension_numbers = #tpu.dot_dimension_numbers<[1], [0], [0], [1], [0, 0, 1, 1], [], []>} : vector<256x4xbf16>, vector<4x32xbf16>, vector<256x32xf32> -> vector<256x32xf32>
    %41 = arith.addf %36, %40 : vector<256x32xf32>
    %42 = vector.extract_strided_slice %1 {offsets = [2, 2, 0], sizes = [16, 16, 4], strides = [1, 1, 1]} : vector<18x18x4xbf16> to vector<16x16x4xbf16>
    %43 = vector.shape_cast %42 : vector<16x16x4xbf16> to vector<256x4xbf16>
    %44 = vector.extract_strided_slice %2 {offsets = [32, 0], sizes = [4, 32], strides = [1, 1]} : vector<36x32xbf16> to vector<4x32xbf16>
    %cst_12 = arith.constant dense<0.000000e+00> : vector<256x32xf32>
    %45 = tpu.matmul %43, %44, %cst_12 {dimension_numbers = #tpu.dot_dimension_numbers<[1], [0], [0], [1], [0, 0, 1, 1], [], []>} : vector<256x4xbf16>, vector<4x32xbf16>, vector<256x32xf32> -> vector<256x32xf32>
    %46 = arith.addf %41, %45 : vector<256x32xf32>
    %c0_13 = arith.constant 0 : index
    %c0_14 = arith.constant 0 : index
    %47 = vector.load %arg3[%c0_13, %c0_14] : memref<1x32xf32, #tpu.memory_space<vmem>>, vector<1x32xf32>
    %48 = vector.broadcast %47 : vector<1x32xf32> to vector<256x32xf32>
    %49 = arith.mulf %46, %48 : vector<256x32xf32>
    %c0_15 = arith.constant 0 : index
    %c0_16 = arith.constant 0 : index
    %50 = vector.load %arg4[%c0_15, %c0_16] : memref<1x32xf32, #tpu.memory_space<vmem>>, vector<1x32xf32>
    %51 = vector.broadcast %50 : vector<1x32xf32> to vector<256x32xf32>
    %52 = arith.addf %49, %51 : vector<256x32xf32>
    %c0_17 = arith.constant 0 : index
    %c0_18 = arith.constant 0 : index
    %c0_19 = arith.constant 0 : index
    %53 = vector.load %arg5[%c0_17, %c0_18, %c0_19] : memref<1x256x32xf32, #tpu.memory_space<vmem>>, vector<1x256x32xf32>
    %54 = vector.shape_cast %53 : vector<1x256x32xf32> to vector<256x32xf32>
    %55 = vector.shape_cast %52 : vector<256x32xf32> to vector<1x256x32xf32>
    tpu.vector_store %arg5[%c0_17, %c0_18, %c0_19], %55 {strides = array<i32>} : memref<1x256x32xf32, #tpu.memory_space<vmem>>, vector<1x256x32xf32>,
    return
  }
  func.func @transform_0(%arg0: i32) -> (i32, i32, i32, i32) {
    %c0_i32 = arith.constant 0 : i32
    %c0_i32_0 = arith.constant 0 : i32
    %c0_i32_1 = arith.constant 0 : i32
    %c0_i32_2 = arith.constant 0 : i32
    return %arg0, %c0_i32, %c0_i32_0, %c0_i32_1 : i32, i32, i32, i32
  }
  func.func @transform_1(%arg0: i32) -> (i32, i32) {
    %c0_i32 = arith.constant 0 : i32
    %c0_i32_0 = arith.constant 0 : i32
    %c0_i32_1 = arith.constant 0 : i32
    return %c0_i32, %c0_i32_0 : i32, i32
  }
  func.func @transform_2(%arg0: i32) -> (i32, i32) {
    %c0_i32 = arith.constant 0 : i32
    %c0_i32_0 = arith.constant 0 : i32
    %c0_i32_1 = arith.constant 0 : i32
    return %c0_i32, %c0_i32_0 : i32, i32
  }
  func.func @transform_3(%arg0: i32) -> (i32, i32) {
    %c0_i32 = arith.constant 0 : i32
    %c0_i32_0 = arith.constant 0 : i32
    %c0_i32_1 = arith.constant 0 : i32
    return %c0_i32, %c0_i32_0 : i32, i32
  }
  func.func @transform_4(%arg0: i32) -> (i32, i32, i32) {
    %c0_i32 = arith.constant 0 : i32
    %c0_i32_0 = arith.constant 0 : i32
    %c0_i32_1 = arith.constant 0 : i32
    return %arg0, %c0_i32, %c0_i32_0 : i32, i32, i32
  }
}

</mosaic_0001>

<bundles_post_ra>
// kernel: tile.18
= control target key start
LH: loop header
LB: loop body
LE: loop exit
PB: predicated region body
PF: predicated region fallthrough
CT: control target
= control target key end

     0   :  { %s22_s0 = inlined_call_operand.vmem [shape: f32[8], index: 0, kind: input, shape index: {}]   ;;  %s23_s1 = inlined_call_operand.vmem [shape: f32[4,8], index: 1, kind: output, shape index: {}]  }
   0x1   :  { %v4_v0 = vld [vmem:[%s22_s0] ss:$0 sm:$0xff] }
   0x2   :  { %5 = vst [vmem:[%s23_s1] sm:$0xf] %v4_v0 }

// kernel: tile.19
= control target key start
LH: loop header
LB: loop body
LE: loop exit
PB: predicated region body
PF: predicated region fallthrough
CT: control target
= control target key end

     0   :  { %s37_s8 = smov 8   ;;  %s38_s9 = smov 16   ;;  %vm7_vm0 = vcmask 64512   ;;  %vm13_vm1 = vcmask 261312   ;;  %vm19_vm2 = vcmask 195712   ;;  %vm25_vm3 = vcmask 130112   ;;  %s55_s0 = inlined_call_operand.vmem [shape: f32[4,8], index: 0, kind: input, shape index: {}]   ;;  %s56_s1 = inlined_call_operand.vmem [shape: f32[1,32], index: 1, kind: output, shape index: {}]  }
   0x1   :  { %v4_v0 = vld [vmem:[%s55_s0] sm:$0xf]  ;;  %s36_s0 = smov 24  }
   0x2   :  { %5 = vst [vmem:[#allocation1] sm:$0xf] %v4_v0 }
   0x9   :  { %v10_v1 = vld [vmem:[#allocation1 + $0x3] sm:$0x1]   ;;  %v22_v2 = vld [vmem:[#allocation1 + $0x1] sm:$0x1]   ;;  %v16_v3 = vld [vmem:[#allocation1 + $0x2] sm:$0x1]  }
   0xa   :  { %11 = vrot.lane.b32.xlu0 %v10_v1, %s36_s0  ;;  %23 = vrot.lane.b32.xlu1 %v22_v2, %s37_s8  ;;  %v6_v4 = vld [vmem:[#allocation1] sm:$0x1]  }
   0xb   :  { %8 = vst.msk [vmem:[#allocation0] sm:$0x1] %vm7_vm0, %v6_v4  }
  0x12   :  { %17 = vrot.lane.b32.xlu0 %v16_v3, %s38_s9 }
  0x7c   :  { %v12_v5 = vpop.permute.xlu0 %11   ;;  %v24_v6 = vpop.permute.xlu1 %23  }
  0x7d   :  { %14 = vst.msk [vmem:[#allocation0] sm:$0x1] %vm13_vm1, %v12_v5  }
  0x84   :  { %v18_v7 = vpop.permute.xlu0 %17  }
  0x85   :  { %20 = vst.msk [vmem:[#allocation0] sm:$0x1] %vm19_vm2, %v18_v7  }
  0x86   :  { %26 = vst.msk [vmem:[#allocation0] sm:$0x1] %vm25_vm3, %v24_v6  }
  0x8d   :  { %v29_v8 = vld [vmem:[#allocation0] sm:$0x1] }
  0x8e   :  { %32 = vst [vmem:[%s56_s1] sm:$0x1] %v29_v8 }

// kernel: decoder_block.3
= control target key start
LH: loop header
LB: loop body
LE: loop exit
PB: predicated region body
PF: predicated region fallthrough
CT: control target
= control target key end

     0   :  { %s2749_s15 = smov 0   ;;  %s3948_s0 = inlined_call_operand.vmem [shape: bf16[2,18,18,4], index: 0, kind: input, shape index: {}]   ;;  %s3949_s1 = inlined_call_operand.vmem [shape: bf16[36,32], index: 1, kind: input, shape index: {}]   ;;  %s3950_s2 = inlined_call_operand.vmem [shape: f32[1,32], index: 2, kind: input, shape index: {}]   ;;  %s3951_s3 = inlined_call_operand.vmem [shape: f32[1,32], index: 3, kind: input, shape index: {}]   ;;  %s3952_s4 = inlined_call_operand.vmem [shape: f32[2,256,32], index: 4, kind: output, shape index: {}]  }
   0x1 LB: > { %s2430_s16 = sadd.s32 4294967295, %s2722_s15   ;;  %p2434_p0 = scmp.ge.s32.totalorder %s2722_s15, 1  ;;  %s2722_s15 = sphi %s2749_s15, %s14_s15  }
   0x2   : > { %p162_p1 = scmp.lt.s32.totalorder %s2722_s15, 3 }
   0x4   : > { %p163_p2 = pnand %p2434_p0, %p162_p1 }
   0x6   : > { %166 = sbr.rel (%p163_p2) target bundleno = 758 (0x2f6), region = 36 }
   0xb   : > { %v253_v0 = vld [vmem:[%s3949_s1] sm:$0xf]  ;;  %p188_p3 = scmp.lt.s32.totalorder %s2430_s16, 1  ;;  %v254_v2 = vld [vmem:[%s3949_s1 + $0x4] sm:$0xf]  ;;  %vm746_vm0 = vcmask 1041408  }
   0xc   : > { %v694_v1 = vunpack.c.l.b16 %v253_v0  ;;  %v1416_v3 = vunpack.c.l.b16 %v254_v2  ;;  %v2769_v6 = vld [vmem:[%s3949_s1 + $0x8] sm:$0xf]  ;;  %vm258_vm1 = vsmask.f32 3328  ;;  %vm259_vm2 = vsmask.f32 7440 }
   0xd   : > { %s4096_s16 = smov (!%p188_p3, %s2430_s16), 1  ;;  %v1287_v8 = vsel %vm746_vm0, %v254_v2, 0  ;;  %v968_v10 = vsel %vm746_vm0, %v253_v0, 0  ;;  %v1577_v14 = vsel %vm746_vm0, %v2769_v6, 0  ;;  %vm2803_vm3 = vmor %vm258_vm1, %vm259_vm2  ;;  %vm697_vm4 = vcmask 31744  }
   0xe   : > { %v695_v4 = vpack.c.b16 %v694_v1, %v694_v1  ;;  %s2696_s21 = smul.u32 216, %s4096_s16  ;;  %v1417_v5 = vpack.c.b16 %v1416_v3, %v1416_v3  ;;  %vm1075_vm5 = vcmask 1042432   ;;  %vm1076_vm6 = vcmask 1046532   ;;  %s2674_s7 = sshll.u32 %s4096_s16, 8 }
   0xf   : > { %vm3103_vm7 = vmor %vm1075_vm5, %vm1076_vm6  ;;  %s3708_s12 = scalar_lea.vmem %s3952_s4, %s2674_s7  ;;  %vm2342_vm8 = vcmask 261120  }
  0x10   : > { %v696_v7 = vrot.slane %v695_v4, 2  ;;  %s2774_s26 = scalar_lea.vmem %s3948_s0, %s2696_s21  ;;  %v1418_v9 = vrot.slane %v1417_v5, 2 }
  0x11   : > { %v2780_v12 = vld [vmem:[%s2774_s26 + $0x30] sm:$0xf]  ;;  %v2783_v13 = vld [vmem:[%s2774_s26 + $0x34] sm:$0xf]  ;;  %v2788_v15 = vld [vmem:[%s2774_s26 + $0x38] sm:$0x1] }
  0x12   : > { %v748_v11 = vsel %vm746_vm0, %v696_v7, 0  ;;  %v358_v16 = vshrl.u32 %v2780_v12, 16  ;;  %v361_v17 = vshll.u32 %v2780_v12, 16  ;;  %v367_v18 = vshll.u32 %v2783_v13, 16  ;;  %v223_v21 = vld [vmem:[%s2774_s26 + $0x60] sm:$0xf] }
  0x13   : > { %2693 = vmatpush.bf16.msra.mxu1 %v748_v11  ;;  %2694 = vmatpush.bf16.msra.mxu2 %v748_v11  ;;  %v371_v19 = vshrl.u32 %v2783_v13, 16  ;;  %v377_v20 = vshll.u32 %v2788_v15, 16  ;;  %v224_v22 = vld [vmem:[%s2774_s26 + $0x64] sm:$0xf]  ;;  %v1423_v23 = vsel %vm746_vm0, %v1418_v9, 0  ;;  %v454_v30 = vshrl.u32 %v223_v21, 16 }
  0x14   : > { %2695 = vmatpush.bf16.msra.mxu3 %v748_v11  ;;  %757 = vmatpush.bf16.msra.mxu0 %v748_v11  ;;  %v360_v24 = vrot.slane %v358_v16, 4  ;;  %v363_v25 = vrot.slane %v361_v17, 5  ;;  %v369_v26 = vrot.slane %v367_v18, 5  ;;  %v225_v28 = vld [vmem:[%s2774_s26 + $0x68] sm:$0x1]  ;;  %v457_v31 = vshll.u32 %v223_v21, 16 }
  0x15   : > { %v373_v27 = vrot.slane %v371_v19, 4  ;;  %v379_v29 = vrot.slane %v377_v20, 5  ;;  %v463_v32 = vshll.u32 %v224_v22, 16  ;;  %v467_v35 = vshrl.u32 %v224_v22, 16  ;;  %v235_v37 = vld [vmem:[%s2774_s26 + $0x90] sm:$0xf] }
  0x16   : > { %v364_v33 = vor.u32 %v363_v25, %v360_v24  ;;  %v473_v36 = vshll.u32 %v225_v28, 16  ;;  %v236_v38 = vld [vmem:[%s2774_s26 + $0x94] sm:$0xf]  ;;  %v456_v40 = vrot.slane %v454_v30, 4  ;;  %v459_v41 = vrot.slane %v457_v31, 5 }
  0x17   : > { %1296 = vmatpush.bf16.msrb.mxu2 %v1287_v8  ;;  %977 = vmatpush.bf16.msrb.mxu1 %v968_v10  ;;  %v374_v34 = vor.u32 %v373_v27, %v369_v26  ;;  %v465_v42 = vrot.slane %v463_v32, 5  ;;  %v469_v45 = vrot.slane %v467_v35, 4  ;;  %v550_v48 = vshrl.u32 %v235_v37, 16  ;;  %v237_v54 = vld [vmem:[%s2774_s26 + $0x98] sm:$0x1] }
  0x18   : > { %1432 = vmatpush.bf16.msrb.mxu3 %v1423_v23  ;;  %1586 = vmatpush.bf16.msrb.mxu0 %v1577_v14  ;;  %v365_v43 = vrot.slane %v364_v33, 4  ;;  %v475_v46 = vrot.slane %v473_v36, 5  ;;  %v460_v47 = vor.u32 %v459_v41, %v456_v40  ;;  %v553_v49 = vshll.u32 %v235_v37, 16  ;;  %v2813_v0 = vld [vmem:[%s2774_s26] sm:$0xf] }
  0x19   : > { %v375_v44 = vrot.slane %v374_v34, 4  ;;  %v559_v50 = vshll.u32 %v236_v38, 16  ;;  %v470_v53 = vor.u32 %v469_v45, %v465_v42  ;;  %v563_v55 = vshrl.u32 %v236_v38, 16  ;;  %v2820_v4 = vld [vmem:[%s2774_s26 + $0x4] sm:$0xf] }
  0x1a   : > { %v370_v51 = vsel %vm2803_vm3, %v365_v43, %v369_v26  ;;  %v461_v58 = vrot.slane %v460_v47, 4  ;;  %v552_v59 = vrot.slane %v550_v48, 4  ;;  %v555_v61 = vrot.slane %v553_v49, 5  ;;  %v2825_v10 = vld [vmem:[%s2774_s26 + $0x8] sm:$0x1] }
  0x1b   : > { %v380_v52 = vsel %vm2803_vm3, %v375_v44, %v379_v29  ;;  %v653_v56 = vunpack.c.l.b16 %v370_v51  ;;  %v471_v60 = vrot.slane %v470_v53, 4  ;;  %v561_v62 = vrot.slane %v559_v50, 5  ;;  %v2837_v26 = vld [vmem:[%s2774_s26 + $0x3c] sm:$0xf]  ;;  %v2844_v31 = vld [vmem:[%s2774_s26 + $0x40] sm:$0xf] }
  0x1c   : > { %v654_v57 = vunpack.c.l.b16 %v380_v52  ;;  %v565_v63 = vrot.slane %v563_v55, 4  ;;  %v466_v2 = vsel %vm2803_vm3, %v461_v58, %v465_v42  ;;  %v569_v3 = vshll.u32 %v237_v54, 16  ;;  %v2849_v35 = vld [vmem:[%s2774_s26 + $0x44] sm:$0x1]  ;;  %v2853_v40 = vld [vmem:[%s2774_s26 + $0x6c] sm:$0xf] }
  0x1d   : > { %v476_v5 = vsel %vm2803_vm3, %v471_v60, %v475_v46  ;;  %v661_v7 = vunpack.c.l.b16 %v466_v2  ;;  %v556_v8 = vor.u32 %v555_v61, %v552_v59  ;;  %v262_v16 = vshrl.u32 %v2813_v0, 16  ;;  %v2862_v49 = vld [vmem:[%s2774_s26 + $0x70] sm:$0xf]  ;;  %v2869_v53 = vld [vmem:[%s2774_s26 + $0x74] sm:$0x1] }
  0x1e   : > { %v2815_v1 = vpack.c.b16 %v654_v57, %v653_v56  ;;  %v566_v9 = vor.u32 %v565_v63, %v561_v62  ;;  %v662_v11 = vunpack.c.l.b16 %v476_v5  ;;  %v571_v14 = vrot.slane %v569_v3, 5 }
  0x1f   : > { %v265_v17 = vshll.u32 %v2813_v0, 16  ;;  %v557_v18 = vrot.slane %v556_v8, 4  ;;  %v271_v20 = vshll.u32 %v2820_v4, 16  ;;  %v275_v21 = vshrl.u32 %v2820_v4, 16 }
  0x20   : > { %2442 = vmatmul.msk.bf16.vlgmr.msra.gmra.mxu1 %vm697_vm4, %v2815_v1  ;;  %v567_v19 = vrot.slane %v566_v9, 4  ;;  %v2833_v22 = vpack.c.b16 %v662_v11, %v661_v7  ;;  %v264_v23 = vrot.slane %v262_v16, 4  ;;  %v281_v25 = vshll.u32 %v2825_v10, 16  ;;  %v238_v7 = vld [vmem:[%s2774_s26 + $0x9c] sm:$0xf] }
  0x21   : > { %v267_v24 = vrot.slane %v265_v17, 5  ;;  %v562_v27 = vsel %vm2803_vm3, %v557_v18, %v561_v62  ;;  %v273_v29 = vrot.slane %v271_v20, 5  ;;  %v277_v30 = vrot.slane %v275_v21, 4 }
  0x22   : > { %3995 = vst [vmem:[#allocation2_spill] sm:$0xff] %v2833_v22  ;;  %v572_v28 = vsel %vm2803_vm3, %v567_v19, %v571_v14  ;;  %2446 = vmatmul.msk.bf16.vlgmr.msra.gmra.mxu2 %vm697_vm4, %v2833_v22  ;;  %v669_v32 = vunpack.c.l.b16 %v562_v27  ;;  %v283_v37 = vrot.slane %v281_v25, 5  ;;  %v382_v38 = vshrl.u32 %v2837_v26, 16  ;;  %v239_v14 = vld [vmem:[%s2774_s26 + $0xa0] sm:$0xf] }
  0x23   : > { %v670_v33 = vunpack.c.l.b16 %v572_v28  ;;  %v268_v34 = vor.u32 %v267_v24, %v264_v23  ;;  %v278_v36 = vor.u32 %v277_v30, %v273_v29  ;;  %v385_v43 = vshll.u32 %v2837_v26, 16  ;;  %v240_v23 = vld [vmem:[%s2774_s26 + $0xa4] sm:$0x1] }
  0x24   : > { %v391_v44 = vshll.u32 %v2844_v31, 16  ;;  %v384_v46 = vrot.slane %v382_v38, 4  ;;  %v395_v47 = vshrl.u32 %v2844_v31, 16  ;;  %v401_v48 = vshll.u32 %v2849_v35, 16 }
  0x25   : > { %v2855_v41 = vpack.c.b16 %v670_v33, %v669_v32  ;;  %v269_v42 = vrot.slane %v268_v34, 4  ;;  %v279_v45 = vrot.slane %v278_v36, 4  ;;  %v387_v51 = vrot.slane %v385_v43, 5 }
  0x26   : > { %v393_v52 = vrot.slane %v391_v44, 5  ;;  %v478_v54 = vshrl.u32 %v2853_v40, 16  ;;  %v397_v57 = vrot.slane %v395_v47, 4  ;;  %v403_v58 = vrot.slane %v401_v48, 5  ;;  %v2887_v44 = vld [vmem:[%s2774_s26 + $0xc] sm:$0xf] }
  0x27   : > { %3996 = vst [vmem:[#allocation3_spill] sm:$0xff] %v2855_v41  ;;  %2450 = vmatmul.msk.bf16.vlgmr.msra.gmra.mxu3 %vm697_vm4, %v2855_v41  ;;  %v274_v50 = vsel %vm2803_vm3, %v269_v42, %v273_v29  ;;  %v284_v55 = vsel %vm2803_vm3, %v279_v45, %v283_v37  ;;  %v388_v60 = vor.u32 %v387_v51, %v384_v46  ;;  %v481_v62 = vshll.u32 %v2853_v40, 16  ;;  %v2894_v48 = vld [vmem:[%s2774_s26 + $0x10] sm:$0xf] }
  0x28   : > { %v645_v56 = vunpack.c.l.b16 %v274_v50  ;;  %v646_v59 = vunpack.c.l.b16 %v284_v55  ;;  %v480_v61 = vrot.slane %v478_v54, 4  ;;  %v398_v63 = vor.u32 %v397_v57, %v393_v52  ;;  %v2897_v50 = vld [vmem:[%s2774_s26 + $0x14] sm:$0x1] }
  0x29   : > { %v487_v2 = vshll.u32 %v2862_v49, 16  ;;  %v491_v3 = vshrl.u32 %v2862_v49, 16  ;;  %v497_v5 = vshll.u32 %v2869_v53, 16  ;;  %v389_v9 = vrot.slane %v388_v60, 4 }
  0x2a   : > { %v677_v8 = vpack.c.b16 %v646_v59, %v645_v56  ;;  %v483_v11 = vrot.slane %v481_v62, 5  ;;  %v399_v16 = vrot.slane %v398_v63, 4  ;;  %v574_v24 = vshrl.u32 %v238_v7, 16 }
  0x2b   : > { %v489_v17 = vrot.slane %v487_v2, 5  ;;  %v493_v18 = vrot.slane %v491_v3, 4  ;;  %v499_v19 = vrot.slane %v497_v5, 5  ;;  %v394_v20 = vsel %vm2803_vm3, %v389_v9, %v393_v52  ;;  %v2909_v2 = vld [vmem:[%s2774_s26 + $0x48] sm:$0xf] }
  0x2c   : > { %2438 = vmatmul.msk.bf16.vlgmr.msra.gmra.mxu0 %vm697_vm4, %v677_v8  ;;  %v484_v21 = vor.u32 %v483_v11, %v480_v61  ;;  %v577_v25 = vshll.u32 %v238_v7, 16  ;;  %v404_v27 = vsel %vm2803_vm3, %v399_v16, %v403_v58  ;;  %v655_v28 = vunpack.c.l.b16 %v394_v20  ;;  %v2916_v9 = vld [vmem:[%s2774_s26 + $0x4c] sm:$0xf]  ;;  %v2921_v20 = vld [vmem:[%s2774_s26 + $0x50] sm:$0x1] }
  0x2d   : > { %v494_v29 = vor.u32 %v493_v18, %v489_v17  ;;  %v583_v30 = vshll.u32 %v239_v14, 16  ;;  %v656_v32 = vunpack.c.l.b16 %v404_v27  ;;  %v576_v34 = vrot.slane %v574_v24, 4 }
  0x2e   : > { %v485_v33 = vrot.slane %v484_v21, 4  ;;  %v579_v36 = vrot.slane %v577_v25, 5  ;;  %v587_v42 = vshrl.u32 %v239_v14, 16  ;;  %v593_v43 = vshll.u32 %v240_v23, 16 }
  0x2f   : > { %v495_v37 = vrot.slane %v494_v29, 4  ;;  %v585_v38 = vrot.slane %v583_v30, 5  ;;  %v2889_v45 = vpack.c.b16 %v656_v32, %v655_v28  ;;  %v286_v58 = vshrl.u32 %v2887_v44, 16  ;;  %v2930_v29 = vld [vmem:[%s2774_s26 + $0x78] sm:$0xf] }
  0x30   : > { %v490_v46 = vsel %vm2803_vm3, %v485_v33, %v489_v17  ;;  %v580_v47 = vor.u32 %v579_v36, %v576_v34  ;;  %v589_v54 = vrot.slane %v587_v42, 4  ;;  %v595_v55 = vrot.slane %v593_v43, 5 }
  0x31   : > { %v500_v51 = vsel %vm2803_vm3, %v495_v37, %v499_v19  ;;  %v663_v52 = vunpack.c.l.b16 %v490_v46  ;;  %2443 = vmatmul.msk.bf16.gmra.mxu1 %vm697_vm4, %v2889_v45  ;;  %v289_v59 = vshll.u32 %v2887_v44, 16  ;;  %v295_v61 = vshll.u32 %v2894_v48, 16 }
  0x32   : > { %v664_v56 = vunpack.c.l.b16 %v500_v51  ;;  %v581_v57 = vrot.slane %v580_v47, 4  ;;  %v590_v60 = vor.u32 %v589_v54, %v585_v38  ;;  %v299_v62 = vshrl.u32 %v2894_v48, 16  ;;  %v2938_v51 = vld [vmem:[%s2774_s26 + $0x7c] sm:$0xf] }
  0x33   : > { %v305_v63 = vshll.u32 %v2897_v50, 16  ;;  %v288_v7 = vrot.slane %v286_v58, 4  ;;  %v291_v8 = vrot.slane %v289_v59, 5  ;;  %v297_v16 = vrot.slane %v295_v61, 5 }
  0x34   : > { %v2911_v3 = vpack.c.b16 %v664_v56, %v663_v52  ;;  %v586_v5 = vsel %vm2803_vm3, %v581_v57, %v585_v38  ;;  %v591_v11 = vrot.slane %v590_v60, 4  ;;  %v301_v17 = vrot.slane %v299_v62, 4  ;;  %v2941_v52 = vld [vmem:[%s2774_s26 + $0x80] sm:$0x1] }
  0x35   : > { %v671_v14 = vunpack.c.l.b16 %v586_v5  ;;  %v292_v18 = vor.u32 %v291_v8, %v288_v7  ;;  %v307_v19 = vrot.slane %v305_v63, 5  ;;  %v406_v21 = vshrl.u32 %v2909_v2, 16 }
  0x36   : > { %2447 = vmatmul.msk.bf16.gmra.mxu2 %vm697_vm4, %v2911_v3  ;;  %v409_v23 = vshll.u32 %v2909_v2, 16  ;;  %v596_v24 = vsel %vm2803_vm3, %v591_v11, %v595_v55  ;;  %v302_v25 = vor.u32 %v301_v17, %v297_v16  ;;  %v415_v27 = vshll.u32 %v2916_v9, 16  ;;  %v2953_v11 = vld [vmem:[%s2774_s26 + $0xa8] sm:$0xf] }
  0x37   : > { %v419_v28 = vshrl.u32 %v2916_v9, 16  ;;  %v672_v30 = vunpack.c.l.b16 %v596_v24  ;;  %v293_v32 = vrot.slane %v292_v18, 4  ;;  %v408_v33 = vrot.slane %v406_v21, 4  ;;  %3998 = vst [vmem:[#allocation5_spill] sm:$0xff] %v2953_v11 }
  0x38   : > { %v411_v34 = vrot.slane %v409_v23, 5  ;;  %v303_v36 = vrot.slane %v302_v25, 4  ;;  %v417_v37 = vrot.slane %v415_v27, 5  ;;  %v425_v42 = vshll.u32 %v2921_v20, 16  ;;  %v2966_v27 = vld [vmem:[%s2774_s26 + $0xb0] sm:$0x1] }
  0x39   : > { %v421_v38 = vrot.slane %v419_v28, 4  ;;  %v2933_v43 = vpack.c.b16 %v672_v30, %v671_v14  ;;  %v298_v46 = vsel %vm2803_vm3, %v293_v32, %v297_v16  ;;  %v502_v54 = vshrl.u32 %v2930_v29, 16  ;;  %4000 = vst [vmem:[#allocation7_spill] sm:$0xff] %v2966_v27 }
  0x3a   : > { %v412_v47 = vor.u32 %v411_v34, %v408_v33  ;;  %v308_v55 = vsel %vm2803_vm3, %v303_v36, %v307_v19  ;;  %v647_v56 = vunpack.c.l.b16 %v298_v46  ;;  %v427_v58 = vrot.slane %v425_v42, 5  ;;  %v2961_v19 = vld [vmem:[%s2774_s26 + $0xac] sm:$0xf] }
  0x3b   : > { %3997 = vst [vmem:[#allocation4_spill] sm:$0xff] %v2933_v43  ;;  %v422_v57 = vor.u32 %v421_v38, %v417_v37  ;;  %2451 = vmatmul.msk.bf16.gmra.mxu3 %vm697_vm4, %v2933_v43  ;;  %v648_v59 = vunpack.c.l.b16 %v308_v55  ;;  %v504_v61 = vrot.slane %v502_v54, 4  ;;  %v505_v62 = vshll.u32 %v2930_v29, 16  ;;  %v2975_v38 = vld [vmem:[%s2774_s26 + $0x18] sm:$0xf] }
  0x3c   : > { %v413_v60 = vrot.slane %v412_v47, 4  ;;  %v511_v5 = vshll.u32 %v2938_v51, 16  ;;  %v515_v7 = vshrl.u32 %v2938_v51, 16  ;;  %v521_v8 = vshll.u32 %v2941_v52, 16  ;;  %3999 = vst [vmem:[#allocation6_spill] sm:$0xff] %v2961_v19 }
  0x3d   : > { %v423_v63 = vrot.slane %v422_v57, 4  ;;  %v1712_v14 = vunpack.c.l.b16 %v2769_v6  ;;  %v2956_v16 = vpack.c.b16 %v648_v59, %v647_v56  ;;  %v507_v18 = vrot.slane %v505_v62, 5  ;;  %v2981_v59 = vld [vmem:[%s2774_s26 + $0x1c] sm:$0xf]  ;;  %v3077_v43 = vld [vmem:[%s2774_s26 + $0x2c] sm:$0x1] }
  0x3e   : > { %v418_v17 = vsel %vm2803_vm3, %v413_v60, %v417_v37  ;;  %v513_v24 = vrot.slane %v511_v5, 5  ;;  %v517_v25 = vrot.slane %v515_v7, 4  ;;  %v523_v30 = vrot.slane %v521_v8, 5 }
  0x3f   : > { %v428_v21 = vsel %vm2803_vm3, %v423_v63, %v427_v58  ;;  %v657_v23 = vunpack.c.l.b16 %v418_v17  ;;  %2439 = vmatmul.msk.bf16.gmra.mxu0 %vm697_vm4, %v2956_v16  ;;  %v508_v28 = vor.u32 %v507_v18, %v504_v61  ;;  %v598_v32 = vshrl.u32 %v2953_v11, 16  ;;  %v2990_v63 = vld [vmem:[%s2774_s26 + $0x20] sm:$0x1] }
  0x40   : > { %v658_v6 = vunpack.c.l.b16 %v428_v21  ;;  %v518_v33 = vor.u32 %v517_v25, %v513_v24  ;;  %v601_v34 = vshll.u32 %v2953_v11, 16  ;;  %v607_v36 = vshll.u32 %v2961_v19, 16 }
  0x41   : > { %v611_v37 = vshrl.u32 %v2961_v19, 16  ;;  %v509_v46 = vrot.slane %v508_v28, 4  ;;  %v600_v47 = vrot.slane %v598_v32, 4  ;;  %v617_v54 = vshll.u32 %v2966_v27, 16 }
  0x42   : > { %v2977_v42 = vpack.c.b16 %v658_v6, %v657_v23  ;;  %v519_v55 = vrot.slane %v518_v33, 4  ;;  %v603_v56 = vrot.slane %v601_v34, 5  ;;  %v609_v57 = vrot.slane %v607_v36, 5 }
  0x43   : > { %v613_v58 = vrot.slane %v611_v37, 4  ;;  %v2983_v60 = vpack.c.b16 %v1712_v14, %v1712_v14  ;;  %v514_v61 = vsel %vm2803_vm3, %v509_v46, %v513_v24  ;;  %v619_v62 = vrot.slane %v617_v54, 5  ;;  %v2996_v14 = vld [vmem:[%s2774_s26 + $0x54] sm:$0xf]  ;;  %v3005_v37 = vld [vmem:[%s2774_s26 + $0x58] sm:$0xf] }
  0x44   : > { %4001 = vst [vmem:[#allocation8_spill] sm:$0xff] %v2977_v42  ;;  %2444 = vmatmul.msk.bf16.gmra.mxu1 %vm697_vm4, %v2977_v42  ;;  %v310_v5 = vshrl.u32 %v2975_v38, 16  ;;  %v524_v7 = vsel %vm2803_vm3, %v519_v55, %v523_v30  ;;  %v665_v8 = vunpack.c.l.b16 %v514_v61  ;;  %v604_v17 = vor.u32 %v603_v56, %v600_v47  ;;  %v3016_v61 = vld [vmem:[%s2774_s26 + $0x84] sm:$0xf] }
  0x45   : > { %v614_v18 = vor.u32 %v613_v58, %v609_v57  ;;  %v666_v21 = vunpack.c.l.b16 %v524_v7  ;;  %v313_v25 = vshll.u32 %v2975_v38, 16  ;;  %v319_v24 = vshll.u32 %v2981_v59, 16  ;;  %v3013_v58 = vld [vmem:[%s2774_s26 + $0x5c] sm:$0x1]  ;;  %4002 = vst [vmem:[#allocation9_spill] sm:$0xff] %v3016_v61 }
  0x46   : > { %v312_v23 = vrot.slane %v310_v5, 4  ;;  %v605_v6 = vrot.slane %v604_v17, 4  ;;  %v323_v32 = vshrl.u32 %v2981_v59, 16  ;;  %v329_v30 = vshll.u32 %v2990_v63, 16 }
  0x47   : > { %v615_v28 = vrot.slane %v614_v18, 4  ;;  %v3002_v33 = vpack.c.b16 %v666_v21, %v665_v8  ;;  %v315_v34 = vrot.slane %v313_v25, 5  ;;  %v321_v36 = vrot.slane %v319_v24, 5 }
  0x48   : > { %v430_v46 = vshrl.u32 %v2996_v14, 16  ;;  %v610_v47 = vsel %vm2803_vm3, %v605_v6, %v609_v57  ;;  %v325_v55 = vrot.slane %v323_v32, 4  ;;  %v331_v56 = vrot.slane %v329_v30, 5 }
  0x49   : > { %v620_v54 = vsel %vm2803_vm3, %v615_v28, %v619_v62  ;;  %2448 = vmatmul.msk.bf16.gmra.mxu2 %vm697_vm4, %v3002_v33  ;;  %v673_v5 = vunpack.c.l.b16 %v610_v47  ;;  %v316_v8 = vor.u32 %v315_v34, %v312_v23  ;;  %v433_v57 = vshll.u32 %v2996_v14, 16  ;;  %v3028_v34 = vld [vmem:[%s2774_s26 + $0x88] sm:$0xf] }
  0x4a   : > { %v674_v7 = vunpack.c.l.b16 %v620_v54  ;;  %v432_v17 = vrot.slane %v430_v46, 4  ;;  %v326_v18 = vor.u32 %v325_v55, %v321_v36  ;;  %v439_v62 = vshll.u32 %v3005_v37, 16  ;;  %4004 = vst [vmem:[#allocation11_spill] sm:$0xff] %v3028_v34  ;;  %v3035_v55 = vld [vmem:[%s2774_s26 + $0x8c] sm:$0x1] }
  0x4b   : > { %v443_v21 = vshrl.u32 %v3005_v37, 16  ;;  %v317_v24 = vrot.slane %v316_v8, 4  ;;  %v449_v6 = vshll.u32 %v3013_v58, 16  ;;  %v526_v28 = vshrl.u32 %v3016_v61, 16  ;;  %4005 = vst [vmem:[#allocation12_spill] sm:$0xff] %v3035_v55 }
  0x4c   : > { %v3023_v25 = vpack.c.b16 %v674_v7, %v673_v5  ;;  %v327_v32 = vrot.slane %v326_v18, 4  ;;  %v435_v30 = vrot.slane %v433_v57, 5  ;;  %v441_v47 = vrot.slane %v439_v62, 5 }
  0x4d   : > { %v445_v23 = vrot.slane %v443_v21, 4  ;;  %v322_v46 = vsel %vm2803_vm3, %v317_v24, %v321_v36  ;;  %v451_v54 = vrot.slane %v449_v6, 5  ;;  %v528_v5 = vrot.slane %v526_v28, 4  ;;  %v3043_v24 = vld [vmem:[%s2774_s26 + $0xb4] sm:$0xf] }
  0x4e   : > { %4003 = vst [vmem:[#allocation10_spill] sm:$0xff] %v3023_v25  ;;  %2452 = vmatmul.msk.bf16.gmra.mxu3 %vm697_vm4, %v3023_v25  ;;  %v529_v7 = vshll.u32 %v3016_v61, 16  ;;  %v332_v8 = vsel %vm2803_vm3, %v327_v32, %v331_v56  ;;  %v649_v18 = vunpack.c.l.b16 %v322_v46  ;;  %v436_v57 = vor.u32 %v435_v30, %v432_v17  ;;  %v3057_v6 = vld [vmem:[%s2774_s26 + $0xbc] sm:$0x1] }
  0x4f   : > { %v446_v62 = vor.u32 %v445_v23, %v441_v47  ;;  %v650_v21 = vunpack.c.l.b16 %v332_v8  ;;  %v535_v25 = vshll.u32 %v3028_v34, 16  ;;  %v539_v36 = vshrl.u32 %v3028_v34, 16  ;;  %4006 = vst [vmem:[#allocation13_spill] sm:$0xff] %v3043_v24  ;;  %v3050_v23 = vld [vmem:[%s2774_s26 + $0xb8] sm:$0xf] }
  0x50   : > { %v531_v11 = vrot.slane %v529_v7, 5  ;;  %v437_v28 = vrot.slane %v436_v57, 4  ;;  %v545_v19 = vshll.u32 %v3035_v55, 16  ;;  %4007 = vst [vmem:[#allocation14_spill] sm:$0xff] %v3050_v23  ;;  %v622_v57 = vshrl.u32 %v3043_v24, 16 }
  0x51   : > { %v447_v27 = vrot.slane %v446_v62, 4  ;;  %v3047_v56 = vpack.c.b16 %v650_v21, %v649_v18  ;;  %v537_v17 = vrot.slane %v535_v25, 5  ;;  %v541_v30 = vrot.slane %v539_v36, 4  ;;  %4008 = vst [vmem:[#allocation15_spill] sm:$0xff] %v3057_v6 }
  0x52   : > { %v532_v32 = vor.u32 %v531_v11, %v528_v5  ;;  %v442_v46 = vsel %vm2803_vm3, %v437_v28, %v441_v47  ;;  %v547_v8 = vrot.slane %v545_v19, 5  ;;  %v624_v62 = vrot.slane %v622_v57, 4 }
  0x53   : > { %v452_v7 = vsel %vm2803_vm3, %v447_v27, %v451_v54  ;;  %2440 = vmatmul.msk.bf16.gmra.mxu0 %vm697_vm4, %v3047_v56  ;;  %v659_v11 = vunpack.c.l.b16 %v442_v46  ;;  %v542_v18 = vor.u32 %v541_v30, %v537_v17  ;;  %v625_v47 = vshll.u32 %v3043_v24, 16  ;;  %v3066_v27 = vld [vmem:[%s2774_s26 + $0x24] sm:$0xf] }
  0x54   : > { %v660_v25 = vunpack.c.l.b16 %v452_v7  ;;  %v533_v5 = vrot.slane %v532_v32, 4  ;;  %v631_v21 = vshll.u32 %v3050_v23, 16  ;;  %v635_v19 = vshrl.u32 %v3050_v23, 16  ;;  %v3074_v32 = vld [vmem:[%s2774_s26 + $0x28] sm:$0xf] }
  0x55   : > { %v543_v28 = vrot.slane %v542_v18, 4  ;;  %v641_v46 = vshll.u32 %v3057_v6, 16  ;;  %v627_v7 = vrot.slane %v625_v47, 5  ;;  %v1714_v23 = vrot.slane %v2983_v60, 2 }
  0x56   : > { %v3068_v54 = vpack.c.b16 %v660_v25, %v659_v11  ;;  %v538_v36 = vsel %vm2803_vm3, %v533_v5, %v537_v17  ;;  %v633_v57 = vrot.slane %v631_v21, 5  ;;  %v637_v24 = vrot.slane %v635_v19, 4 }
  0x57   : > { %v667_v30 = vunpack.c.l.b16 %v538_v36  ;;  %v548_v11 = vsel %vm2803_vm3, %v543_v28, %v547_v8  ;;  %v643_v17 = vrot.slane %v641_v46, 5  ;;  %v334_v25 = vshrl.u32 %v3066_v27, 16 }
  0x58   : > { %4009 = vst [vmem:[#allocation16_spill] sm:$0xff] %v3068_v54  ;;  %2445 = vmatmul.msk.bf16.gmra.mxu1 %vm697_vm4, %v3068_v54  ;;  %v668_v5 = vunpack.c.l.b16 %v548_v11  ;;  %v628_v18 = vor.u32 %v627_v7, %v624_v62  ;;  %v638_v6 = vor.u32 %v637_v24, %v633_v57  ;;  %v337_v47 = vshll.u32 %v3066_v27, 16  ;;  %v256_v24 = vld [vmem:[%s3949_s1 + $0xc] sm:$0xf] }
  0x59   : > { %v336_v21 = vrot.slane %v334_v25, 4  ;;  %v343_v19 = vshll.u32 %v3074_v32, 16  ;;  %v347_v36 = vshrl.u32 %v3074_v32, 16  ;;  %v353_v60 = vshll.u32 %v3077_v43, 16 }
  0x5a   : > { %v3089_v41 = vpack.c.b16 %v668_v5, %v667_v30  ;;  %v629_v61 = vrot.slane %v628_v18, 4  ;;  %v639_v55 = vrot.slane %v638_v6, 4  ;;  %v339_v8 = vrot.slane %v337_v47, 5  ;;  %v257_v6 = vld [vmem:[%s3949_s1 + $0x10] sm:$0x3] }
  0x5b   : > { %v345_v28 = vrot.slane %v343_v19, 5  ;;  %v349_v46 = vrot.slane %v347_v36, 4  ;;  %v355_v34 = vrot.slane %v353_v60, 5  ;;  %v2534_v47 = vrot.slane %v2813_v0, 9 }
  0x5c   : > { %4010 = vst [vmem:[#allocation17_spill] sm:$0xff] %v3089_v41  ;;  %2449 = vmatmul.msk.bf16.gmra.mxu2 %vm697_vm4, %v3089_v41  ;;  %v634_v62 = vsel %vm2803_vm3, %v629_v61, %v633_v57  ;;  %v644_v30 = vsel %vm2803_vm3, %v639_v55, %v643_v17  ;;  %v340_v7 = vor.u32 %v339_v8, %v336_v21  ;;  %v1080_v61 = vrot.slane %v2820_v4, 5 }
  0x5d   : > { %v675_v11 = vunpack.c.l.b16 %v634_v62  ;;  %v676_v25 = vunpack.c.l.b16 %v644_v30  ;;  %v350_v5 = vor.u32 %v349_v46, %v345_v28  ;;  %v1851_v55 = vsel %vm746_vm0, %v256_v24, 0 }
  0x5e   : > { %v341_v19 = vrot.slane %v340_v7, 4  ;;  %v2002_v57 = vunpack.c.l.b16 %v256_v24  ;;  %1860 = vmatpush.bf16.msra.mxu2 %v1851_v55  ;;  %v1719_v36 = vsel %vm746_vm0, %v1714_v23, 0  ;;  %v2147_v60 = vsel %vm746_vm0, %v257_v6, 0 }
  0x5f   : > { %v3110_v17 = vpack.c.b16 %v676_v25, %v675_v11  ;;  %v351_v21 = vrot.slane %v350_v5, 4  ;;  %v1081_v0 = vsel %vm3103_vm7, %v2534_v47, %v1080_v61  ;;  %v1082_v46 = vrot.slane %v1080_v61, 4  ;;  %1728 = vmatpush.bf16.msra.mxu1 %v1719_v36  ;;  %2156 = vmatpush.bf16.msra.mxu0 %v2147_v60  ;;  %v2675_v5 = vld [vmem:[%s2774_s26] sm:$0xff]  ;;  %v2676_v36 = vld [vmem:[%s2774_s26 + $0xc] sm:$0xff] }
  0x60   : > { %v346_v8 = vsel %vm2803_vm3, %v341_v19, %v345_v28  ;;  %v2003_v4 = vpack.c.b16 %v2002_v57, %v2002_v57  ;;  %v1190_v62 = vunpack.c.l.b16 %v1081_v0  ;;  %v2535_v30 = vrot.slane %v2887_v44, 9 }
  0x61   : > { %2453 = vmatmul.msk.bf16.gmra.mxu3 %vm697_vm4, %v3110_v17  ;;  %v356_v24 = vsel %vm2803_vm3, %v351_v21, %v355_v34  ;;  %v651_v23 = vunpack.c.l.b16 %v346_v8  ;;  %v4013_v28 = vrot.slane %v2825_v10, 5  ;;  %v1087_v25 = vrot.slane %v2894_v48, 5  ;;  %v3152_v8 = vld [vmem:[%s2774_s26 + $0x18] sm:$0xff] }
  0x62   : > { %v652_v7 = vunpack.c.l.b16 %v356_v24  ;;  %v2004_v11 = vrot.slane %v2003_v4, 2  ;;  %v1090_v19 = vrot.slane %v2897_v50, 5  ;;  %v1094_v60 = vrot.slane %v2981_v59, 5 }
  0x63   : > { %v1084_v6 = vsel %vm3103_vm7, %v1082_v46, %v4013_v28  ;;  %v1088_v44 = vsel %vm3103_vm7, %v2535_v30, %v1087_v25  ;;  %v1089_v55 = vrot.slane %v1087_v25, 4  ;;  %v2536_v0 = vrot.slane %v2975_v38, 9 }
  0x64   : > { %v1191_v47 = vunpack.c.l.b16 %v1084_v6  ;;  %v3130_v61 = vpack.c.b16 %v652_v7, %v651_v23  ;;  %v2009_v34 = vsel %vm746_vm0, %v2004_v11, 0  ;;  %v1192_v57 = vunpack.c.l.b16 %v1088_v44 }
  0x65   : > { %2018 = vmatpush.bf16.msra.mxu3 %v2009_v34  ;;  %v1091_v48 = vsel %vm3103_vm7, %v1089_v55, %v1090_v19  ;;  %v1096_v46 = vrot.slane %v1094_v60, 4  ;;  %v1097_v4 = vrot.slane %v2990_v63, 5  ;;  %v1101_v63 = vrot.slane %v3074_v32, 5 }
  0x66   : > { %v1222_v10 = vpack.c.b16 %v1191_v47, %v1190_v62  ;;  %2441 = vmatmul.msk.bf16.gmra.mxu0 %vm697_vm4, %v3130_v61  ;;  %v1193_v50 = vunpack.c.l.b16 %v1091_v48  ;;  %v3172_v62 = vld [vmem:[%s2774_s26 + $0x24] sm:$0xff]  ;;  %v2537_v30 = vrot.slane %v3066_v27, 9  ;;  %v1104_v28 = vrot.slane %v3077_v43, 5  ;;  %v3194_v47 = vld [vmem:[%s2774_s26 + $0x30] sm:$0xff] }
  0x67   : > { %v1098_v59 = vsel %vm3103_vm7, %v1096_v46, %v1097_v4  ;;  %v1103_v7 = vrot.slane %v1101_v63, 4  ;;  %v1108_v43 = vrot.slane %v2783_v13, 5  ;;  %v2538_v19 = vrot.slane %v2780_v12, 9 }
  0x68   : > { %2518 = vmatmul.msk.bf16.vlgmr.msrb.gmra.mxu1 %vm697_vm4, %v2675_v5  ;;  %v3140_v21 = vpack.c.b16 %v1193_v50, %v1192_v57  ;;  %v1195_v23 = vunpack.c.l.b16 %v1098_v59  ;;  %v1102_v6 = vsel %vm3103_vm7, %v2537_v30, %v1101_v63  ;;  %v1111_v44 = vrot.slane %v2788_v15, 5 }
  0x69   : > { %v1105_v32 = vsel %vm3103_vm7, %v1103_v7, %v1104_v28  ;;  %v1196_v11 = vunpack.c.l.b16 %v1102_v6  ;;  %v1110_v34 = vrot.slane %v1108_v43, 4  ;;  %v1109_v55 = vsel %vm3103_vm7, %v2538_v19, %v1108_v43 }
  0x6a   : > { %v1197_v25 = vunpack.c.l.b16 %v1105_v32  ;;  %v2539_v46 = vrot.slane %v2837_v26, 9  ;;  %v1122_v32 = vrot.slane %v2916_v9, 5  ;;  %v2540_v43 = vrot.slane %v2909_v2, 9 }
  0x6b   : > { %v1112_v13 = vsel %vm3103_vm7, %v1110_v34, %v1111_v44  ;;  %v1125_v34 = vrot.slane %v2921_v20, 5 }
  0x6c   : > { %2550 = vmatmul.msk.bf16.vlgmr.msrb.gmra.mxu2 %vm697_vm4, %v1222_v10  ;;  %v3186_v27 = vpack.c.b16 %v1197_v25, %v1196_v11  ;;  %v1198_v10 = vunpack.c.l.b16 %v1109_v55  ;;  %v1199_v57 = vunpack.c.l.b16 %v1112_v13  ;;  %v3256_v25 = vld [vmem:[%s2774_s26 + $0x48] sm:$0xff]  ;;  %v1124_v19 = vrot.slane %v1122_v32, 4 }
  0x6d   : > { %v1123_v9 = vsel %vm3103_vm7, %v2540_v43, %v1122_v32  ;;  %v1132_v32 = vrot.slane %v3013_v58, 5 }
  0x6e   : > { %v3214_v15 = vpack.c.b16 %v1199_v57, %v1198_v10  ;;  %v1126_v13 = vsel %vm3103_vm7, %v1124_v19, %v1125_v34  ;;  %v1202_v2 = vunpack.c.l.b16 %v1123_v9 }
  0x6f   : > { %v1203_v57 = vunpack.c.l.b16 %v1126_v13 }
  0x71   : > { %2570 = vmatmul.msk.bf16.vlgmr.msrb.gmra.mxu3 %vm697_vm4, %v2676_v36 }
  0x76   : > { %2586 = vmatmul.msk.bf16.vlgmr.msrb.gmra.mxu0 %vm697_vm4, %v2956_v16  ;;  %v1095_v16 = vsel %vm3103_vm7, %v2536_v0, %v1094_v60  ;;  %v3222_v0 = vld [vmem:[%s2774_s26 + $0x3c] sm:$0xff] }
  0x77   : > { %v1194_v24 = vunpack.c.l.b16 %v1095_v16  ;;  %v1118_v16 = vrot.slane %v2849_v35, 5 }
  0x78   : > { %2519 = vmatmul.msk.bf16.gmra.mxu1 %vm697_vm4, %v2676_v36  ;;  %v1115_v36 = vrot.slane %v2844_v31, 5 }
  0x79   : > { %v3166_v38 = vpack.c.b16 %v1195_v23, %v1194_v24 }
  0x7a   : > { %v1117_v4 = vrot.slane %v1115_v36, 4  ;;  %v1116_v31 = vsel %vm3103_vm7, %v2539_v46, %v1115_v36  ;;  %v3280_v46 = vpack.c.b16 %v1203_v57, %v1202_v2 }
  0x7b   : > { %v1200_v30 = vunpack.c.l.b16 %v1116_v31 }
  0x7c   : > { %2551 = vmatmul.msk.bf16.gmra.mxu2 %vm697_vm4, %v3140_v21  ;;  %v1119_v23 = vsel %vm3103_vm7, %v1117_v4, %v1118_v16  ;;  %4018 = vst [vmem:[#allocation22_spill] sm:$0xff] %v3280_v46  ;;  %v1129_v4 = vrot.slane %v3005_v37, 5 }
  0x7d   : > { %v1201_v35 = vunpack.c.l.b16 %v1119_v23  ;;  %v3290_v23 = vld [vmem:[%s2774_s26 + $0x54] sm:$0xff] }
  0x7e   : > { %4019 = vst [vmem:[#allocation23_spill] sm:$0xff] %v3290_v23 }
  0x7f   : > { %v3246_v28 = vpack.c.b16 %v1201_v35, %v1200_v30  ;;  %v2541_v30 = vrot.slane %v2996_v14, 9  ;;  %v1131_v35 = vrot.slane %v1129_v4, 4 }
  0x81   : > { %2571 = vmatmul.msk.bf16.gmra.mxu3 %vm697_vm4, %v3152_v8  ;;  %v1130_v37 = vsel %vm3103_vm7, %v2541_v30, %v1129_v4  ;;  %v1133_v34 = vsel %vm3103_vm7, %v1131_v35, %v1132_v32  ;;  %v2707_v4 = vld [vmem:[%s2774_s26 + $0x64] sm:$0xf] }
  0x82   : > { %v1204_v9 = vunpack.c.l.b16 %v1130_v37  ;;  %v1205_v58 = vunpack.c.l.b16 %v1133_v34  ;;  %v1136_v30 = vrot.slane %v2707_v4, 5  ;;  %v2708_v37 = vld [vmem:[%s2774_s26 + $0x68] sm:$0x1] }
  0x83   : > { %v1139_v34 = vrot.slane %v2708_v37, 5 }
  0x84   : > { %v3312_v2 = vpack.c.b16 %v1205_v58, %v1204_v9 }
  0x86   : > { %2587 = vmatmul.msk.bf16.gmra.mxu0 %vm697_vm4, %v3047_v56  ;;  %4021 = vst [vmem:[#allocation25_spill] sm:$0xff] %v3312_v2 }
  0x88   : > { %2520 = vmatmul.msk.bf16.gmra.mxu1 %vm697_vm4, %v3152_v8 }
  0x8c   : > { %2552 = vmatmul.msk.bf16.gmra.mxu2 %vm697_vm4, %v3166_v38 }
  0x91   : > { %2572 = vmatmul.msk.bf16.gmra.mxu3 %vm697_vm4, %v3172_v62 }
  0x96   : > { %2588 = vmatmul.msk.bf16.gmra.mxu0 %vm697_vm4, %v3130_v61 }
  0x98   : > { %2521 = vmatmul.msk.bf16.gmra.mxu1 %vm697_vm4, %v3172_v62 }
  0x9c   : > { %2553 = vmatmul.msk.bf16.gmra.mxu2 %vm697_vm4, %v3186_v27 }
  0x9d   : > { %v3189_v5 = vpop.f32.mrf.mxu1 }
  0xa1   : > { %2573 = vmatmul.msk.bf16.gmra.mxu3 %vm697_vm4, %v3194_v47 }
  0xa5   : > { %v3204_v48 = vpop.f32.mrf.mxu2  ;;  %v3206_v50 = vpop.f32.mrf.mxu1 }
  0xa6   : > { %2589 = vmatmul.msk.bf16.gmra.mxu0 %vm697_vm4, %v2815_v1 }
  0xa8   : > { %2522 = vmatmul.msk.bf16.gmra.mxu1 %vm697_vm4, %v3194_v47 }
  0xa9   : > { %v3212_v12 = vpop.f32.mrf.mxu0 }
  0xaa   : > { %v3217_v60 = vpop.f32.mrf.mxu3 }
  0xab   : > { %4014 = vst [vmem:[#allocation18_spill] sm:$0xff] %v3217_v60 }
  0xac   : > { %2554 = vmatmul.msk.bf16.gmra.mxu2 %vm697_vm4, %v3214_v15 }
  0xad   : > { %v3226_v59 = vpop.f32.mrf.mxu2 }
  0xae   : > { %v3228_v24 = vpop.f32.mrf.mxu1 }
  0xb1   : > { %2574 = vmatmul.msk.bf16.gmra.mxu3 %vm697_vm4, %v3222_v0  ;;  %v3236_v63 = vpop.f32.mrf.mxu0 }
  0xb2   : > { %v3238_v26 = vpop.f32.mrf.mxu3 }
  0xb3   : > { %4015 = vst [vmem:[#allocation19_spill] sm:$0xff] %v3238_v26 }
  0xb6   : > { %2590 = vmatmul.msk.bf16.gmra.mxu0 %vm697_vm4, %v2889_v45  ;;  %v3242_v7 = vpop.f32.mrf.mxu1 }
  0xb8   : > { %2523 = vmatmul.msk.bf16.gmra.mxu1 %vm697_vm4, %v3222_v0 }
  0xb9   : > { %v3248_v6 = vpop.f32.mrf.mxu2 }
  0xbc   : > { %v3251_v11 = vpop.f32.mrf.mxu0  ;;  %2555 = vmatmul.msk.bf16.gmra.mxu2 %vm697_vm4, %v3246_v28 }
  0xbe   : > { %v3260_v44 = vpop.f32.mrf.mxu3 }
  0xbf   : > { %4016 = vst [vmem:[#allocation20_spill] sm:$0xff] %v3260_v44  ;;  %v1138_v44 = vrot.slane %v1136_v30, 4 }
  0xc1   : > { %v3262_v55 = vpop.f32.mrf.mxu1  ;;  %2575 = vmatmul.msk.bf16.gmra.mxu3 %vm697_vm4, %v3256_v25  ;;  %v3270_v10 = vpop.f32.mrf.mxu2  ;;  %v1140_v4 = vsel %vm3103_vm7, %v1138_v44, %v1139_v34  ;;  %v1143_v44 = vrot.slane %v2862_v49, 5 }
  0xc4   : > { %v3274_v20 = vpop.f32.mrf.mxu0 }
  0xc6   : > { %2591 = vmatmul.msk.bf16.gmra.mxu0 %vm697_vm4, %v2977_v42  ;;  %v3276_v36 = vpop.f32.mrf.mxu3 }
  0xc7   : > { %4017 = vst [vmem:[#allocation21_spill] sm:$0xff] %v3276_v36  ;;  %v2709_v36 = vld [vmem:[%s2774_s26 + $0x60] sm:$0xf] }
  0xc8   : > { %2524 = vmatmul.msk.bf16.gmra.mxu1 %vm697_vm4, %v3256_v25 }
  0xc9   : > { %v3283_v16 = vpop.f32.mrf.mxu1 }
  0xcc   : > { %2556 = vmatmul.msk.bf16.gmra.mxu2 %vm697_vm4, %v3280_v46  ;;  %v3287_v31 = vpop.f32.mrf.mxu2 }
  0xd0   : > { %v3294_v43 = vpop.f32.mrf.mxu0 }
  0xd1   : > { %v3296_v19 = vpop.f32.mrf.mxu3  ;;  %2576 = vmatmul.msk.bf16.gmra.mxu3 %vm697_vm4, %v3290_v23 }
  0xd2   : > { %4020 = vst [vmem:[#allocation24_spill] sm:$0xff] %v3296_v19  ;;  %v3325_v19 = vld [vmem:[%s2774_s26 + $0x60] sm:$0xff] }
  0xd3   : > { %4023 = vst [vmem:[#allocation27_spill] sm:$0xff] %v3325_v19 }
  0xd4   : > { %v3306_v13 = vpop.f32.mrf.mxu2 }
  0xd5   : > { %v3304_v14 = vpop.f32.mrf.mxu1 }
  0xd6   : > { %2592 = vmatmul.msk.bf16.gmra.mxu0 %vm697_vm4, %v3068_v54  ;;  %v2542_v54 = vrot.slane %v2709_v36, 9  ;;  %v1207_v36 = vunpack.c.l.b16 %v1140_v4 }
  0xd8   : > { %2525 = vmatmul.msk.bf16.gmra.mxu1 %vm697_vm4, %v3290_v23  ;;  %v3314_v57 = vpop.f32.mrf.mxu0  ;;  %v1137_v58 = vsel %vm3103_vm7, %v2542_v54, %v1136_v30 }
  0xd9   : > { %v3317_v35 = vpop.f32.mrf.mxu3  ;;  %v1206_v23 = vunpack.c.l.b16 %v1137_v58  ;;  %v3358_v58 = vld [vmem:[%s2774_s26 + $0x6c] sm:$0xff] }
  0xda   : > { %4022 = vst [vmem:[#allocation26_spill] sm:$0xff] %v3317_v35 }
  0xdb   : > { %v3347_v54 = vpack.c.b16 %v1207_v36, %v1206_v23  ;;  %v1145_v23 = vrot.slane %v1143_v44, 4 }
  0xdc   : > { %2557 = vmatmul.msk.bf16.gmra.mxu2 %vm697_vm4, %v3312_v2 }
  0xdd   : > { %v3321_v32 = vpop.f32.mrf.mxu1  ;;  %4025 = vst [vmem:[#allocation29_spill] sm:$0xff] %v3347_v54 }
  0xdf   : > { %v3328_v9 = vpop.f32.mrf.mxu2 }
  0xe1   : > { %2577 = vmatmul.msk.bf16.gmra.mxu3 %vm697_vm4, %v3325_v19 }
  0xe3   : > { %v3336_v35 = vpop.f32.mrf.mxu0 }
  0xe4   : > { %v3338_v37 = vpop.f32.mrf.mxu3 }
  0xe5   : > { %4024 = vst [vmem:[#allocation28_spill] sm:$0xff] %v3338_v37  ;;  %v979_v2 = vpop.f32.mrf.mxu1  ;;  %v2543_v37 = vrot.slane %v2853_v40, 9 }
  0xe6   : > { %v980_v26 = vadd.f32 %v979_v2, %v3212_v12  ;;  %2593 = vmatmul.msk.bf16.gmra.mxu0 %vm697_vm4, %v2833_v22  ;;  %v1146_v2 = vrot.slane %v2869_v53, 5 }
  0xe7   : > { %v3343_v46 = vpop.f32.mrf.mxu2  ;;  %v1144_v49 = vsel %vm3103_vm7, %v2543_v37, %v1143_v44 }
  0xe8   : > { %2526 = vmatmul.msk.bf16.gmra.mxu1 %vm697_vm4, %v3325_v19  ;;  %v1208_v42 = vunpack.c.l.b16 %v1144_v49 }
  0xeb   : > { %v3350_v30 = vpop.f32.mrf.mxu0 }
  0xec   : > { %v3352_v34 = vpop.f32.mrf.mxu3  ;;  %2558 = vmatmul.msk.bf16.gmra.mxu2 %vm697_vm4, %v3347_v54 }
  0xed   : > { %4026 = vst [vmem:[#allocation30_spill] sm:$0xff] %v3352_v34  ;;  %v981_v12 = vpop.f32.mrf.mxu1  ;;  %v1147_v34 = vsel %vm3103_vm7, %v1145_v23, %v1146_v2  ;;  %v1150_v2 = vrot.slane %v2938_v51, 5 }
  0xee   : > { %v982_v4 = vadd.f32 %v981_v12, %v3236_v63  ;;  %v1209_v60 = vunpack.c.l.b16 %v1147_v34  ;;  %v1153_v34 = vrot.slane %v2941_v52, 5 }
  0xef   : > { %v1298_v36 = vpop.f32.mrf.mxu2 }
  0xf0   : > { %v1378_v22 = vadd.f32 %v1298_v36, %v980_v26  ;;  %v3375_v12 = vpack.c.b16 %v1209_v60, %v1208_v42  ;;  %v3382_v36 = vld [vmem:[%s2774_s26 + $0x78] sm:$0xff] }
  0xf1   : > { %2578 = vmatmul.msk.bf16.gmra.mxu3 %vm697_vm4, %v3358_v58 }
  0xf3   : > { %v1588_v54 = vpop.f32.mrf.mxu0 }
  0xf4   : > { %v1434_v53 = vpop.f32.mrf.mxu3 }
  0xf5   : > { %v984_v19 = vpop.f32.mrf.mxu1  ;;  %v1514_v63 = vadd.f32 %v1434_v53, %v1378_v22 }
  0xf6   : > { %v985_v40 = vadd.f32 %v984_v19, %v3251_v11  ;;  %2594 = vmatmul.msk.bf16.gmra.mxu0 %vm697_vm4, %v2911_v3 }
  0xf7   : > { %v1300_v26 = vpop.f32.mrf.mxu2  ;;  %v3373_v37 = vadd.f32 %v1588_v54, %v1514_v63  ;;  %v2544_v54 = vrot.slane %v2930_v29, 9 }
  0xf8   : > { %2527 = vmatmul.msk.bf16.gmra.mxu1 %vm697_vm4, %v3358_v58  ;;  %v1379_v44 = vadd.f32 %v1300_v26, %v982_v4  ;;  %v1152_v4 = vrot.slane %v1150_v2, 4 }
  0xf9   : > { %v1151_v52 = vsel %vm3103_vm7, %v2544_v54, %v1150_v2 }
  0xfa   : > { %v1154_v53 = vsel %vm3103_vm7, %v1152_v4, %v1153_v34 }
  0xfb   : > { %v1590_v23 = vpop.f32.mrf.mxu0 }
  0xfc   : > { %v1436_v22 = vpop.f32.mrf.mxu3  ;;  %2559 = vmatmul.msk.bf16.gmra.mxu2 %vm697_vm4, %v3375_v12 }
  0xfd   : > { %v986_v11 = vpop.f32.mrf.mxu1  ;;  %v1515_v19 = vadd.f32 %v1436_v22, %v1379_v44  ;;  %v1211_v22 = vunpack.c.l.b16 %v1154_v53 }
  0xfe   : > { %v987_v49 = vadd.f32 %v986_v11, %v3274_v20  ;;  %v1210_v20 = vunpack.c.l.b16 %v1151_v52 }
  0xff   : > { %v1303_v42 = vpop.f32.mrf.mxu2  ;;  %v3386_v60 = vadd.f32 %v1590_v23, %v1515_v19  ;;  %v4028_v19 = vld [vmem:[#allocation11_spill] sm:$0xff] }
 0x100   : > { %v1380_v51 = vadd.f32 %v1303_v42, %v985_v40  ;;  %v3401_v34 = vpack.c.b16 %v1211_v22, %v1210_v20  ;;  %v1157_v54 = vrot.slane %v4028_v19, 5  ;;  %v4029_v42 = vld [vmem:[#allocation12_spill] sm:$0xff] }
 0x101   : > { %2579 = vmatmul.msk.bf16.gmra.mxu3 %vm697_vm4, %v3382_v36  ;;  %v1160_v52 = vrot.slane %v4029_v42, 5 }
 0x103   : > { %v1593_v63 = vpop.f32.mrf.mxu0 }
 0x104   : > { %v1439_v26 = vpop.f32.mrf.mxu3 }
 0x105   : > { %v989_v44 = vpop.f32.mrf.mxu1  ;;  %v1516_v29 = vadd.f32 %v1439_v26, %v1380_v51  ;;  %v3408_v26 = vld [vmem:[%s2774_s26 + $0x84] sm:$0xff] }
 0x106   : > { %v990_v23 = vadd.f32 %v989_v44, %v3294_v43  ;;  %2595 = vmatmul.msk.bf16.gmra.mxu0 %vm697_vm4, %v3002_v33 }
 0x107   : > { %v1305_v40 = vpop.f32.mrf.mxu2  ;;  %v3399_v2 = vadd.f32 %v1593_v63, %v1516_v29  ;;  %v4030_v63 = vld [vmem:[#allocation9_spill] sm:$0xff] }
 0x108   : > { %2528 = vmatmul.msk.bf16.gmra.mxu1 %vm697_vm4, %v3382_v36  ;;  %v1381_v11 = vadd.f32 %v1305_v40, %v987_v49  ;;  %v2545_v29 = vrot.slane %v4030_v63, 9  ;;  %v1159_v49 = vrot.slane %v1157_v54, 4 }
 0x109   : > { %4027 = vst [vmem:[#allocation31_spill] sm:$0xff] %v3399_v2 }
 0x10a   : > { %v1158_v19 = vsel %vm3103_vm7, %v2545_v29, %v1157_v54  ;;  %v2710_v29 = vld [vmem:[%s2774_s26 + $0x94] sm:$0xf] }
 0x10b   : > { %v1595_v4 = vpop.f32.mrf.mxu0 }
 0x10c   : > { %v1441_v51 = vpop.f32.mrf.mxu3  ;;  %2560 = vmatmul.msk.bf16.gmra.mxu2 %vm697_vm4, %v3401_v34 }
 0x10d   : > { %v991_v43 = vpop.f32.mrf.mxu1  ;;  %v1517_v53 = vadd.f32 %v1441_v51, %v1381_v11  ;;  %v1161_v11 = vsel %vm3103_vm7, %v1159_v49, %v1160_v52  ;;  %v1164_v49 = vrot.slane %v2710_v29, 5 }
 0x10e   : > { %v992_v44 = vadd.f32 %v991_v43, %v3314_v57  ;;  %v1212_v43 = vunpack.c.l.b16 %v1158_v19  ;;  %v1213_v63 = vunpack.c.l.b16 %v1161_v11 }
 0x10f   : > { %v1308_v20 = vpop.f32.mrf.mxu2  ;;  %v3412_v22 = vadd.f32 %v1595_v4, %v1517_v53 }
 0x110   : > { %v1382_v40 = vadd.f32 %v1308_v20, %v990_v23  ;;  %v3427_v53 = vpack.c.b16 %v1213_v63, %v1212_v43 }
 0x111   : > { %4031 = vst [vmem:[#allocation11_spill] sm:$0xff] %v3412_v22  ;;  %2580 = vmatmul.msk.bf16.gmra.mxu3 %vm697_vm4, %v3408_v26 }
 0x112   : > { %4033 = vst [vmem:[#allocation9_spill] sm:$0xff] %v3427_v53 }
 0x113   : > { %v1598_v42 = vpop.f32.mrf.mxu0 }
 0x114   : > { %v1444_v57 = vpop.f32.mrf.mxu3 }
 0x115   : > { %v994_v51 = vpop.f32.mrf.mxu1  ;;  %v1518_v2 = vadd.f32 %v1444_v57, %v1382_v40  ;;  %v2711_v40 = vld [vmem:[%s2774_s26 + $0x98] sm:$0x1] }
 0x116   : > { %v995_v4 = vadd.f32 %v994_v51, %v3336_v35  ;;  %2596 = vmatmul.msk.bf16.gmra.mxu0 %vm697_vm4, %v3089_v41  ;;  %v1167_v19 = vrot.slane %v2711_v40, 5  ;;  %v3434_v51 = vld [vmem:[%s2774_s26 + $0x90] sm:$0xff] }
 0x117   : > { %v1310_v23 = vpop.f32.mrf.mxu2  ;;  %v3425_v54 = vadd.f32 %v1598_v42, %v1518_v2  ;;  %4034 = vst [vmem:[#allocation32_spill] sm:$0xff] %v3434_v51  ;;  %v2712_v2 = vld [vmem:[%s2774_s26 + $0x90] sm:$0xf] }
 0x118   : > { %2529 = vmatmul.msk.bf16.gmra.mxu1 %vm697_vm4, %v3408_v26  ;;  %v1383_v52 = vadd.f32 %v1310_v23, %v992_v44  ;;  %v2546_v42 = vrot.slane %v2712_v2, 9  ;;  %v1166_v44 = vrot.slane %v1164_v49, 4 }
 0x119   : > { %4032 = vst [vmem:[#allocation12_spill] sm:$0xff] %v3425_v54 }
 0x11a   : > { %v1165_v29 = vsel %vm3103_vm7, %v2546_v42, %v1164_v49  ;;  %v2713_v42 = vld [vmem:[%s2774_s26 + $0xa0] sm:$0xf] }
 0x11b   : > { %v1600_v20 = vpop.f32.mrf.mxu0 }
 0x11c   : > { %v1446_v35 = vpop.f32.mrf.mxu3  ;;  %2561 = vmatmul.msk.bf16.gmra.mxu2 %vm697_vm4, %v3427_v53  ;;  %v2715_v53 = vld [vmem:[%s2774_s26 + $0x9c] sm:$0xf] }
 0x11d   : > { %v996_v11 = vpop.f32.mrf.mxu1  ;;  %v1519_v57 = vadd.f32 %v1446_v35, %v1383_v52  ;;  %v1168_v52 = vsel %vm3103_vm7, %v1166_v44, %v1167_v19  ;;  %v1171_v44 = vrot.slane %v2713_v42, 5 }
 0x11e   : > { %v997_v22 = vadd.f32 %v996_v11, %v3350_v30  ;;  %v1214_v11 = vunpack.c.l.b16 %v1165_v29  ;;  %v1215_v2 = vunpack.c.l.b16 %v1168_v52  ;;  %v2714_v52 = vld [vmem:[%s2774_s26 + $0xa4] sm:$0x1] }
 0x11f   : > { %v1313_v43 = vpop.f32.mrf.mxu2  ;;  %v3438_v63 = vadd.f32 %v1600_v20, %v1519_v57  ;;  %v4036_v20 = vld [vmem:[#allocation3_spill] sm:$0xff] }
 0x120   : > { %v1384_v23 = vadd.f32 %v1313_v43, %v995_v4  ;;  %v3452_v19 = vpack.c.b16 %v1215_v2, %v1214_v11 }
 0x121   : > { %4035 = vst [vmem:[#allocation33_spill] sm:$0xff] %v3438_v63  ;;  %2581 = vmatmul.msk.bf16.gmra.mxu3 %vm697_vm4, %v3434_v51 }
 0x122   : > { %4038 = vst [vmem:[#allocation35_spill] sm:$0xff] %v3452_v19 }
 0x123   : > { %v1603_v40 = vpop.f32.mrf.mxu0 }
 0x124   : > { %v1449_v35 = vpop.f32.mrf.mxu3 }
 0x125   : > { %v999_v30 = vpop.f32.mrf.mxu1  ;;  %v1520_v54 = vadd.f32 %v1449_v35, %v1384_v23  ;;  %v1174_v35 = vrot.slane %v2714_v52, 5 }
 0x126   : > { %2597 = vmatmul.msk.bf16.gmra.mxu0 %vm697_vm4, %v4036_v20  ;;  %v3459_v20 = vld [vmem:[%s2774_s26 + $0x9c] sm:$0xff] }
 0x127   : > { %v1315_v4 = vpop.f32.mrf.mxu2  ;;  %v3450_v49 = vadd.f32 %v1603_v40, %v1520_v54  ;;  %4039 = vst [vmem:[#allocation36_spill] sm:$0xff] %v3459_v20  ;;  %v1173_v54 = vrot.slane %v1171_v44, 4 }
 0x128   : > { %2530 = vmatmul.msk.bf16.gmra.mxu1 %vm697_vm4, %v3434_v51  ;;  %v1385_v57 = vadd.f32 %v1315_v4, %v997_v22  ;;  %v2547_v51 = vrot.slane %v2715_v53, 9  ;;  %v1000_v22 = vadd.f32 %v999_v30, %v3189_v5  ;;  %v4041_v30 = vld [vmem:[#allocation4_spill] sm:$0xff] }
 0x129   : > { %4037 = vst [vmem:[#allocation34_spill] sm:$0xff] %v3450_v49 }
 0x12a   : > { %v1172_v4 = vsel %vm3103_vm7, %v2547_v51, %v1171_v44 }
 0x12b   : > { %v1605_v43 = vpop.f32.mrf.mxu0  ;;  %v1216_v53 = vunpack.c.l.b16 %v1172_v4 }
 0x12c   : > { %v1451_v29 = vpop.f32.mrf.mxu3  ;;  %2562 = vmatmul.msk.bf16.gmra.mxu2 %vm697_vm4, %v3452_v19 }
 0x12d   : > { %v1001_v23 = vpop.f32.mrf.mxu1  ;;  %v1521_v63 = vadd.f32 %v1451_v29, %v1385_v57  ;;  %v1175_v57 = vsel %vm3103_vm7, %v1173_v54, %v1174_v35  ;;  %v4044_v54 = vld [vmem:[#allocation6_spill] sm:$0xff] }
 0x12e   : > { %v1217_v49 = vunpack.c.l.b16 %v1175_v57  ;;  %v4045_v57 = vld [vmem:[#allocation7_spill] sm:$0xff] }
 0x12f   : > { %v1318_v40 = vpop.f32.mrf.mxu2  ;;  %v3463_v11 = vadd.f32 %v1605_v43, %v1521_v63  ;;  %v1002_v63 = vadd.f32 %v1001_v23, %v3206_v50  ;;  %v3485_v23 = vld [vmem:[%s2774_s26 + $0xa8] sm:$0xff] }
 0x130   : > { %v1386_v2 = vadd.f32 %v1318_v40, %v1000_v22  ;;  %v3478_v35 = vpack.c.b16 %v1217_v49, %v1216_v53  ;;  %v1178_v22 = vrot.slane %v4044_v54, 5  ;;  %4046 = vst [vmem:[#allocation6_spill] sm:$0xff] %v3485_v23 }
 0x131   : > { %4040 = vst [vmem:[#allocation37_spill] sm:$0xff] %v3463_v11  ;;  %2582 = vmatmul.msk.bf16.gmra.mxu3 %vm697_vm4, %v3459_v20  ;;  %v4047_v11 = vld [vmem:[#allocation5_spill] sm:$0xff] }
 0x132   : > { %4043 = vst [vmem:[#allocation39_spill] sm:$0xff] %v3478_v35 }
 0x133   : > { %v1608_v42 = vpop.f32.mrf.mxu0 }
 0x134   : > { %v1454_v29 = vpop.f32.mrf.mxu3 }
 0x135   : > { %v1004_v52 = vpop.f32.mrf.mxu1  ;;  %v1522_v5 = vadd.f32 %v1454_v29, %v1386_v2  ;;  %v1181_v29 = vrot.slane %v4045_v57, 5 }
 0x136   : > { %2598 = vmatmul.msk.bf16.gmra.mxu0 %vm697_vm4, %v4041_v30  ;;  %v2548_v30 = vrot.slane %v4047_v11, 9 }
 0x137   : > { %v1320_v43 = vpop.f32.mrf.mxu2  ;;  %v3476_v51 = vadd.f32 %v1608_v42, %v1522_v5  ;;  %v1180_v42 = vrot.slane %v1178_v22, 4  ;;  %v1005_v5 = vadd.f32 %v1004_v52, %v3228_v24 }
 0x138   : > { %2531 = vmatmul.msk.bf16.gmra.mxu1 %vm697_vm4, %v3459_v20  ;;  %v1387_v44 = vadd.f32 %v1320_v43, %v1002_v63  ;;  %v1179_v43 = vsel %vm3103_vm7, %v2548_v30, %v1178_v22  ;;  %v3503_v30 = vld [vmem:[%s2774_s26 + $0xc0] sm:$0xf] }
 0x139   : > { %4042 = vst [vmem:[#allocation38_spill] sm:$0xff] %v3476_v51  ;;  %v1218_v57 = vunpack.c.l.b16 %v1179_v43  ;;  %v4049_v51 = vld [vmem:[#allocation10_spill] sm:$0xff]  ;;  %v1547_v43 = vshrl.u32 %v3503_v30, 16 }
 0x13a   : > { %4050 = vst [vmem:[#allocation5_spill] sm:$0xff] %v3503_v30 }
 0x13b   : > { %v1610_v40 = vpop.f32.mrf.mxu0 }
 0x13c   : > { %v1456_v4 = vpop.f32.mrf.mxu3  ;;  %2563 = vmatmul.msk.bf16.gmra.mxu2 %vm697_vm4, %v3478_v35 }
 0x13d   : > { %v1006_v2 = vpop.f32.mrf.mxu1  ;;  %v1523_v50 = vadd.f32 %v1456_v4, %v1387_v44  ;;  %v1182_v44 = vsel %vm3103_vm7, %v1180_v42, %v1181_v29 }
 0x13e   : > { %v1219_v24 = vunpack.c.l.b16 %v1182_v44 }
 0x13f   : > { %v1323_v49 = vpop.f32.mrf.mxu2  ;;  %v3489_v53 = vadd.f32 %v1610_v40, %v1523_v50  ;;  %v1007_v40 = vadd.f32 %v1006_v2, %v3242_v7  ;;  %v1550_v7 = vshll.u32 %v3503_v30, 16 }
 0x140   : > { %v1388_v63 = vadd.f32 %v1323_v49, %v1005_v5  ;;  %v3507_v42 = vpack.c.b16 %v1219_v24, %v1218_v57  ;;  %v3510_v5 = vld [vmem:[%s2774_s26 + $0xc4] sm:$0xf]  ;;  %v4055_v57 = vld [vmem:[#allocation15_spill] sm:$0xff] }
 0x141   : > { %4048 = vst [vmem:[#allocation7_spill] sm:$0xff] %v3489_v53  ;;  %2583 = vmatmul.msk.bf16.gmra.mxu3 %vm697_vm4, %v3485_v23  ;;  %v4054_v49 = vld [vmem:[#allocation14_spill] sm:$0xff]  ;;  %v1556_v2 = vshll.u32 %v3510_v5, 16  ;;  %v1188_v24 = vrot.slane %v4055_v57, 5  ;;  %v1552_v35 = vrot.slane %v1550_v7, 5 }
 0x142   : > { %4052 = vst [vmem:[#allocation41_spill] sm:$0xff] %v3507_v42 }
 0x143   : > { %v1613_v54 = vpop.f32.mrf.mxu0  ;;  %4053 = vst [vmem:[#allocation42_spill] sm:$0xff] %v3510_v5 }
 0x144   : > { %v1459_v11 = vpop.f32.mrf.mxu3 }
 0x145   : > { %v1009_v4 = vpop.f32.mrf.mxu1  ;;  %v1524_v52 = vadd.f32 %v1459_v11, %v1388_v63  ;;  %v1185_v63 = vrot.slane %v4054_v49, 5  ;;  %v1560_v11 = vshrl.u32 %v3510_v5, 16  ;;  %v1558_v5 = vrot.slane %v1556_v2, 5 }
 0x146   : > { %2599 = vmatmul.msk.bf16.gmra.mxu0 %vm697_vm4, %v4049_v51  ;;  %v1010_v30 = vadd.f32 %v1009_v4, %v3262_v55  ;;  %v1549_v51 = vrot.slane %v1547_v43, 4 }
 0x147   : > { %v1325_v50 = vpop.f32.mrf.mxu2  ;;  %v3505_v22 = vadd.f32 %v1613_v54, %v1524_v52  ;;  %v1562_v20 = vrot.slane %v1560_v11, 4 }
 0x148   : > { %2532 = vmatmul.msk.bf16.gmra.mxu1 %vm697_vm4, %v3485_v23  ;;  %v1389_v29 = vadd.f32 %v1325_v50, %v1007_v40  ;;  %v3521_v40 = vld [vmem:[%s2774_s26 + $0xb4] sm:$0xff]  ;;  %v1553_v4 = vor.u32 %v1552_v35, %v1549_v51 }
 0x149   : > { %4051 = vst [vmem:[#allocation40_spill] sm:$0xff] %v3505_v22  ;;  %v4056_v50 = vld [vmem:[#allocation13_spill] sm:$0xff]  ;;  %v1187_v22 = vrot.slane %v1185_v63, 4  ;;  %v1563_v43 = vor.u32 %v1562_v20, %v1558_v5 }
 0x14a   : > { %v2549_v49 = vrot.slane %v4056_v50, 9 }
 0x14b   : > { %v1615_v44 = vpop.f32.mrf.mxu0  ;;  %v1564_v51 = vrot.slane %v1563_v43, 4 }
 0x14c   : > { %v1461_v53 = vpop.f32.mrf.mxu3  ;;  %2564 = vmatmul.msk.bf16.gmra.mxu2 %vm697_vm4, %v3507_v42  ;;  %v3528_v42 = vld [vmem:[%s2774_s26 + $0xc8] sm:$0x1] }
 0x14d   : > { %v1011_v54 = vpop.f32.mrf.mxu1  ;;  %v1525_v52 = vadd.f32 %v1461_v53, %v1389_v29  ;;  %v1186_v53 = vsel %vm3103_vm7, %v2549_v49, %v1185_v63  ;;  %v1189_v29 = vsel %vm3103_vm7, %v1187_v22, %v1188_v24  ;;  %v1566_v7 = vshll.u32 %v3528_v42, 16 }
 0x14e   : > { %v1220_v11 = vunpack.c.l.b16 %v1186_v53  ;;  %v1012_v57 = vadd.f32 %v1011_v54, %v3283_v16  ;;  %v1554_v22 = vrot.slane %v1553_v4, 4 }
 0x14f   : > { %v1328_v23 = vpop.f32.mrf.mxu2  ;;  %v3525_v19 = vadd.f32 %v1615_v44, %v1525_v52  ;;  %v1568_v20 = vrot.slane %v1566_v7, 5 }
 0x150   : > { %v1390_v41 = vadd.f32 %v1328_v23, %v1010_v30  ;;  %v1221_v23 = vunpack.c.l.b16 %v1189_v29  ;;  %v3553_v29 = vld [vmem:[%s2774_s26 + $0xc0] sm:$0xff] }
 0x151   : > { %2584 = vmatmul.msk.bf16.gmra.mxu3 %vm697_vm4, %v3521_v40  ;;  %v1569_v16 = vsel %vm2803_vm3, %v1564_v51, %v1568_v20 }
 0x152   : > { %v3544_v52 = vpack.c.b16 %v1221_v23, %v1220_v11  ;;  %v1571_v43 = vunpack.c.l.b16 %v1569_v16 }
 0x153   : > { %v1618_v55 = vpop.f32.mrf.mxu0 }
 0x154   : > { %v1464_v2 = vpop.f32.mrf.mxu3 }
 0x155   : > { %v1014_v44 = vpop.f32.mrf.mxu1  ;;  %v1526_v30 = vadd.f32 %v1464_v2, %v1390_v41  ;;  %v1559_v41 = vsel %vm2803_vm3, %v1554_v22, %v1558_v5 }
 0x156   : > { %2600 = vmatmul.msk.bf16.gmra.mxu0 %vm697_vm4, %v3110_v17  ;;  %v1570_v4 = vunpack.c.l.b16 %v1559_v41 }
 0x157   : > { %v1330_v63 = vpop.f32.mrf.mxu2  ;;  %v3542_v35 = vadd.f32 %v1618_v55, %v1526_v30  ;;  %v1015_v55 = vadd.f32 %v1014_v44, %v3304_v14 }
 0x158   : > { %2533 = vmatmul.msk.bf16.gmra.mxu1 %vm697_vm4, %v3521_v40  ;;  %v1391_v24 = vadd.f32 %v1330_v63, %v1012_v57  ;;  %v3560_v5 = vpack.c.b16 %v1571_v43, %v1570_v4 }
 0x15b   : > { %v1620_v50 = vpop.f32.mrf.mxu0 }
 0x15c   : > { %v1466_v54 = vpop.f32.mrf.mxu3  ;;  %2565 = vmatmul.msk.bf16.gmra.mxu2 %vm697_vm4, %v3544_v52 }
 0x15d   : > { %v1016_v49 = vpop.f32.mrf.mxu1  ;;  %v1527_v53 = vadd.f32 %v1466_v54, %v1391_v24 }
 0x15e   : > { %v1017_v14 = vadd.f32 %v1016_v49, %v3321_v32 }
 0x15f   : > { %v1333_v7 = vpop.f32.mrf.mxu2  ;;  %v3556_v2 = vadd.f32 %v1620_v50, %v1527_v53 }
 0x160   : > { %v1392_v11 = vadd.f32 %v1333_v7, %v1015_v55 }
 0x161   : > { %2585 = vmatmul.msk.bf16.gmra.mxu3 %vm697_vm4, %v3553_v29 }
 0x163   : > { %v1623_v23 = vpop.f32.mrf.mxu0 }
 0x164   : > { %v1469_v30 = vpop.f32.mrf.mxu3 }
 0x165   : > { %v1019_v57 = vpop.f32.mrf.mxu1  ;;  %v1528_v63 = vadd.f32 %v1469_v30, %v1392_v11 }
 0x166   : > { %2601 = vmatmul.msk.bf16.gmra.mxu0 %vm697_vm4, %v3560_v5  ;;  %v1020_v16 = vadd.f32 %v1019_v57, %v3204_v48 }
 0x167   : > { %v1335_v44 = vpop.f32.mrf.mxu2  ;;  %v3567_v22 = vadd.f32 %v1623_v23, %v1528_v63 }
 0x168   : > { %2603 = vmatmul.msk.bf16.vlgmr.msra.gmra.mxu1 %vm697_vm4, %v3140_v21  ;;  %v1393_v51 = vadd.f32 %v1335_v44, %v1017_v14 }
 0x16b   : > { %v1625_v20 = vpop.f32.mrf.mxu0 }
 0x16c   : > { %v1471_v24 = vpop.f32.mrf.mxu3  ;;  %2623 = vmatmul.msk.bf16.vlgmr.msra.gmra.mxu2 %vm697_vm4, %v3152_v8 }
 0x16d   : > { %v1021_v50 = vpop.f32.mrf.mxu1  ;;  %v1529_v41 = vadd.f32 %v1471_v24, %v1393_v51 }
 0x16e   : > { %v1022_v8 = vadd.f32 %v1021_v50, %v3226_v59 }
 0x16f   : > { %v1338_v54 = vpop.f32.mrf.mxu2  ;;  %v3572_v53 = vadd.f32 %v1625_v20, %v1529_v41 }
 0x170   : > { %v1394_v32 = vadd.f32 %v1338_v54, %v1020_v16 }
 0x171   : > { %2639 = vmatmul.msk.bf16.vlgmr.msra.gmra.mxu3 %vm697_vm4, %v3047_v56 }
 0x173   : > { %v1628_v21 = vpop.f32.mrf.mxu0 }
 0x174   : > { %v1474_v49 = vpop.f32.mrf.mxu3 }
 0x175   : > { %v1024_v55 = vpop.f32.mrf.mxu1  ;;  %v1530_v4 = vadd.f32 %v1474_v49, %v1394_v32 }
 0x176   : > { %2656 = vmatmul.msk.bf16.vlgmr.msra.gmra.mxu0 %vm697_vm4, %v3166_v38  ;;  %v1025_v57 = vadd.f32 %v1024_v55, %v3248_v6 }
 0x177   : > { %v1340_v43 = vpop.f32.mrf.mxu2  ;;  %v3581_v48 = vadd.f32 %v1628_v21, %v1530_v4 }
 0x178   : > { %2604 = vmatmul.msk.bf16.gmra.mxu1 %vm697_vm4, %v3166_v38  ;;  %v1395_v7 = vadd.f32 %v1340_v43, %v1022_v8 }
 0x17b   : > { %v1630_v11 = vpop.f32.mrf.mxu0 }
 0x17c   : > { %v1476_v23 = vpop.f32.mrf.mxu3  ;;  %2624 = vmatmul.msk.bf16.gmra.mxu2 %vm697_vm4, %v3172_v62 }
 0x17d   : > { %v1026_v56 = vpop.f32.mrf.mxu1  ;;  %v1531_v30 = vadd.f32 %v1476_v23, %v1395_v7 }
 0x17e   : > { %v1027_v62 = vadd.f32 %v1026_v56, %v3270_v10 }
 0x17f   : > { %v1343_v63 = vpop.f32.mrf.mxu2  ;;  %v3586_v14 = vadd.f32 %v1630_v11, %v1531_v30 }
 0x180   : > { %v1396_v59 = vadd.f32 %v1343_v63, %v1025_v57 }
 0x181   : > { %2640 = vmatmul.msk.bf16.gmra.mxu3 %vm697_vm4, %v3130_v61 }
 0x183   : > { %v1633_v38 = vpop.f32.mrf.mxu0 }
 0x184   : > { %v1479_v44 = vpop.f32.mrf.mxu3 }
 0x185   : > { %v1029_v51 = vpop.f32.mrf.mxu1  ;;  %v1532_v20 = vadd.f32 %v1479_v44, %v1396_v59 }
 0x186   : > { %2657 = vmatmul.msk.bf16.gmra.mxu0 %vm697_vm4, %v3186_v27  ;;  %v1030_v32 = vadd.f32 %v1029_v51, %v3287_v31 }
 0x187   : > { %v1345_v24 = vpop.f32.mrf.mxu2  ;;  %v3595_v6 = vadd.f32 %v1633_v38, %v1532_v20 }
 0x188   : > { %2605 = vmatmul.msk.bf16.gmra.mxu1 %vm697_vm4, %v3186_v27  ;;  %v1397_v50 = vadd.f32 %v1345_v24, %v1027_v62 }
 0x18b   : > { %v1635_v41 = vpop.f32.mrf.mxu0 }
 0x18c   : > { %v1481_v16 = vpop.f32.mrf.mxu3  ;;  %2625 = vmatmul.msk.bf16.gmra.mxu2 %vm697_vm4, %v3194_v47 }
 0x18d   : > { %v1031_v61 = vpop.f32.mrf.mxu1  ;;  %v1533_v54 = vadd.f32 %v1481_v16, %v1397_v50 }
 0x18e   : > { %v1032_v47 = vadd.f32 %v1031_v61, %v3306_v13 }
 0x18f   : > { %v1348_v21 = vpop.f32.mrf.mxu2  ;;  %v3600_v49 = vadd.f32 %v1635_v41, %v1533_v54  ;;  %v4057_v41 = vld [vmem:[#allocation18_spill] sm:$0xff] }
 0x190   : > { %v1398_v10 = vadd.f32 %v1348_v21, %v1030_v32  ;;  %v4058_v32 = vld [vmem:[#allocation8_spill] sm:$0xff] }
 0x191   : > { %2641 = vmatmul.msk.bf16.gmra.mxu3 %vm697_vm4, %v2815_v1 }
 0x193   : > { %v1638_v27 = vpop.f32.mrf.mxu0 }
 0x194   : > { %v1484_v55 = vpop.f32.mrf.mxu3 }
 0x195   : > { %v1034_v4 = vpop.f32.mrf.mxu1  ;;  %v1534_v8 = vadd.f32 %v1484_v55, %v1398_v10  ;;  %v4059_v55 = vld [vmem:[#allocation22_spill] sm:$0xff] }
 0x196   : > { %2658 = vmatmul.msk.bf16.gmra.mxu0 %vm697_vm4, %v3214_v15  ;;  %v1035_v30 = vadd.f32 %v1034_v4, %v3328_v9  ;;  %v4060_v4 = vld [vmem:[#allocation19_spill] sm:$0xff] }
 0x197   : > { %v1350_v43 = vpop.f32.mrf.mxu2  ;;  %v3609_v31 = vadd.f32 %v1638_v27, %v1534_v8 }
 0x198   : > { %2606 = vmatmul.msk.bf16.gmra.mxu1 %vm697_vm4, %v3214_v15  ;;  %v1399_v7 = vadd.f32 %v1350_v43, %v1032_v47 }
 0x19b   : > { %v1640_v11 = vpop.f32.mrf.mxu0 }
 0x19c   : > { %v1486_v23 = vpop.f32.mrf.mxu3  ;;  %2626 = vmatmul.msk.bf16.gmra.mxu2 %vm697_vm4, %v3222_v0 }
 0x19d   : > { %v1036_v1 = vpop.f32.mrf.mxu1  ;;  %v1535_v56 = vadd.f32 %v1486_v23, %v1399_v7  ;;  %v4061_v23 = vld [vmem:[#allocation23_spill] sm:$0xff] }
 0x19e   : > { %v1037_v0 = vadd.f32 %v1036_v1, %v3343_v46 }
 0x19f   : > { %v1353_v57 = vpop.f32.mrf.mxu2  ;;  %v3614_v63 = vadd.f32 %v1640_v11, %v1535_v56 }
 0x1a0   : > { %v1400_v13 = vadd.f32 %v1353_v57, %v1035_v30  ;;  %v4062_v30 = vld [vmem:[#allocation20_spill] sm:$0xff] }
 0x1a1   : > { %2642 = vmatmul.msk.bf16.gmra.mxu3 %vm697_vm4, %v2889_v45 }
 0x1a3   : > { %v1643_v15 = vpop.f32.mrf.mxu0 }
 0x1a4   : > { %v1489_v59 = vpop.f32.mrf.mxu3 }
 0x1a5   : > { %v1039_v38 = vpop.f32.mrf.mxu1  ;;  %v1536_v44 = vadd.f32 %v1489_v59, %v1400_v13 }
 0x1a6   : > { %2659 = vmatmul.msk.bf16.gmra.mxu0 %vm697_vm4, %v3246_v28  ;;  %v1040_v16 = vadd.f32 %v1039_v38, %v4057_v41  ;;  %v4063_v38 = vld [vmem:[#allocation16_spill] sm:$0xff] }
 0x1a7   : > { %v1355_v51 = vpop.f32.mrf.mxu2  ;;  %v3623_v9 = vadd.f32 %v1643_v15, %v1536_v44 }
 0x1a8   : > { %2607 = vmatmul.msk.bf16.gmra.mxu1 %vm697_vm4, %v3246_v28  ;;  %v1401_v20 = vadd.f32 %v1355_v51, %v1037_v0 }
 0x1ab   : > { %v1645_v62 = vpop.f32.mrf.mxu0 }
 0x1ac   : > { %v1491_v24 = vpop.f32.mrf.mxu3  ;;  %2627 = vmatmul.msk.bf16.gmra.mxu2 %vm697_vm4, %v3256_v25 }
 0x1ad   : > { %v1041_v45 = vpop.f32.mrf.mxu1  ;;  %v1537_v50 = vadd.f32 %v1491_v24, %v1401_v20  ;;  %v4065_v24 = vld [vmem:[#allocation21_spill] sm:$0xff] }
 0x1ae   : > { %v1042_v25 = vadd.f32 %v1041_v45, %v4060_v4 }
 0x1af   : > { %v1358_v61 = vpop.f32.mrf.mxu2  ;;  %v3628_v54 = vadd.f32 %v1645_v62, %v1537_v50  ;;  %v4064_v62 = vld [vmem:[#allocation25_spill] sm:$0xff] }
 0x1b0   : > { %v1402_v46 = vadd.f32 %v1358_v61, %v1040_v16 }
 0x1b1   : > { %2643 = vmatmul.msk.bf16.gmra.mxu3 %vm697_vm4, %v4058_v32  ;;  %v4066_v32 = vld [vmem:[#allocation27_spill] sm:$0xff] }
 0x1b3   : > { %v1648_v28 = vpop.f32.mrf.mxu0 }
 0x1b4   : > { %v1494_v21 = vpop.f32.mrf.mxu3 }
 0x1b5   : > { %v1044_v10 = vpop.f32.mrf.mxu1  ;;  %v1538_v27 = vadd.f32 %v1494_v21, %v1402_v46 }
 0x1b6   : > { %2660 = vmatmul.msk.bf16.gmra.mxu0 %vm697_vm4, %v4059_v55  ;;  %v1045_v57 = vadd.f32 %v1044_v10, %v4062_v30  ;;  %v4067_v10 = vld [vmem:[#allocation24_spill] sm:$0xff] }
 0x1b7   : > { %v1360_v8 = vpop.f32.mrf.mxu2  ;;  %v3637_v47 = vadd.f32 %v1648_v28, %v1538_v27 }
 0x1b8   : > { %2608 = vmatmul.msk.bf16.gmra.mxu1 %vm697_vm4, %v4059_v55  ;;  %v1403_v43 = vadd.f32 %v1360_v8, %v1042_v25  ;;  %v4068_v8 = vld [vmem:[#allocation2_spill] sm:$0xff] }
 0x1bb   : > { %v1650_v7 = vpop.f32.mrf.mxu0 }
 0x1bc   : > { %v1496_v11 = vpop.f32.mrf.mxu3  ;;  %2628 = vmatmul.msk.bf16.gmra.mxu2 %vm697_vm4, %v4061_v23 }
 0x1bd   : > { %v1046_v1 = vpop.f32.mrf.mxu1  ;;  %v1539_v56 = vadd.f32 %v1496_v11, %v1403_v43 }
 0x1be   : > { %v1047_v45 = vadd.f32 %v1046_v1, %v4065_v24  ;;  %v4069_v1 = vld [vmem:[#allocation29_spill] sm:$0xff] }
 0x1bf   : > { %v1363_v13 = vpop.f32.mrf.mxu2  ;;  %v3642_v15 = vadd.f32 %v1650_v7, %v1539_v56  ;;  %v4070_v56 = vld [vmem:[#allocation26_spill] sm:$0xff] }
 0x1c0   : > { %v1404_v59 = vadd.f32 %v1363_v13, %v1045_v57 }
 0x1c1   : > { %2644 = vmatmul.msk.bf16.gmra.mxu3 %vm697_vm4, %v4063_v38 }
 0x1c3   : > { %v1653_v44 = vpop.f32.mrf.mxu0 }
 0x1c4   : > { %v1499_v0 = vpop.f32.mrf.mxu3 }
 0x1c5   : > { %v1049_v51 = vpop.f32.mrf.mxu1  ;;  %v1540_v20 = vadd.f32 %v1499_v0, %v1404_v59 }
 0x1c6   : > { %2661 = vmatmul.msk.bf16.gmra.mxu0 %vm697_vm4, %v4064_v62  ;;  %v1050_v27 = vadd.f32 %v1049_v51, %v4067_v10 }
 0x1c7   : > { %v1365_v50 = vpop.f32.mrf.mxu2  ;;  %v3651_v41 = vadd.f32 %v1653_v44, %v1540_v20  ;;  %v4071_v20 = vld [vmem:[#allocation28_spill] sm:$0xff] }
 0x1c8   : > { %2609 = vmatmul.msk.bf16.gmra.mxu1 %vm697_vm4, %v4064_v62  ;;  %v1405_v16 = vadd.f32 %v1365_v50, %v1047_v45 }
 0x1cb   : > { %v1655_v61 = vpop.f32.mrf.mxu0 }
 0x1cc   : > { %v1501_v46 = vpop.f32.mrf.mxu3  ;;  %2629 = vmatmul.msk.bf16.gmra.mxu2 %vm697_vm4, %v4066_v32 }
 0x1cd   : > { %v1051_v28 = vpop.f32.mrf.mxu1  ;;  %v1541_v21 = vadd.f32 %v1501_v46, %v1405_v16 }
 0x1ce   : > { %v1052_v30 = vadd.f32 %v1051_v28, %v4070_v56  ;;  %v4072_v28 = vld [vmem:[#allocation30_spill] sm:$0xff] }
 0x1cf   : > { %v1368_v55 = vpop.f32.mrf.mxu2  ;;  %v3656_v4 = vadd.f32 %v1655_v61, %v1541_v21 }
 0x1d0   : > { %v1406_v25 = vadd.f32 %v1368_v55, %v1050_v27 }
 0x1d1   : > { %2645 = vmatmul.msk.bf16.gmra.mxu3 %vm697_vm4, %v4068_v8 }
 0x1d3   : > { %v1658_v43 = vpop.f32.mrf.mxu0 }
 0x1d4   : > { %v1504_v7 = vpop.f32.mrf.mxu3 }
 0x1d5   : > { %v1054_v11 = vpop.f32.mrf.mxu1  ;;  %v1542_v23 = vadd.f32 %v1504_v7, %v1406_v25 }
 0x1d6   : > { %2662 = vmatmul.msk.bf16.gmra.mxu0 %vm697_vm4, %v4069_v1  ;;  %v1055_v62 = vadd.f32 %v1054_v11, %v4071_v20 }
 0x1d7   : > { %v1370_v57 = vpop.f32.mrf.mxu2  ;;  %v3665_v13 = vadd.f32 %v1658_v43, %v1542_v23 }
 0x1d8   : > { %2610 = vmatmul.msk.bf16.gmra.mxu1 %vm697_vm4, %v4069_v1  ;;  %v1407_v59 = vadd.f32 %v1370_v57, %v1052_v30  ;;  %v3691_v57 = vld [vmem:[%s3950_s2] ss:$0 sm:$0xff] }
 0x1db   : > { %v1660_v38 = vpop.f32.mrf.mxu0 }
 0x1dc   : > { %v1506_v44 = vpop.f32.mrf.mxu3  ;;  %2630 = vmatmul.msk.bf16.gmra.mxu2 %vm697_vm4, %v3358_v58 }
 0x1dd   : > { %v1056_v0 = vpop.f32.mrf.mxu1  ;;  %v1543_v51 = vadd.f32 %v1506_v44, %v1407_v59 }
 0x1de   : > { %v1057_v58 = vadd.f32 %v1056_v0, %v4072_v28 }
 0x1df   : > { %v1373_v24 = vpop.f32.mrf.mxu2  ;;  %v3670_v45 = vadd.f32 %v1660_v38, %v1543_v51 }
 0x1e0   : > { %v1408_v50 = vadd.f32 %v1373_v24, %v1055_v62  ;;  %v4073_v24 = vld [vmem:[#allocation31_spill] sm:$0xff] }
 0x1e1   : > { %2646 = vmatmul.msk.bf16.gmra.mxu3 %vm697_vm4, %v2911_v3 }
 0x1e3   : > { %v1663_v16 = vpop.f32.mrf.mxu0 }
 0x1e4   : > { %v1509_v61 = vpop.f32.mrf.mxu3 }
 0x1e5   : > { %v1730_v46 = vpop.f32.mrf.mxu1  ;;  %v1544_v32 = vadd.f32 %v1509_v61, %v1408_v50 }
 0x1e6   : > { %2663 = vmatmul.msk.bf16.gmra.mxu0 %vm697_vm4, %v3375_v12  ;;  %v1810_v43 = vadd.f32 %v1730_v46, %v3373_v37  ;;  %v4074_v46 = vld [vmem:[#allocation17_spill] sm:$0xff] }
 0x1e7   : > { %v1375_v21 = vpop.f32.mrf.mxu2  ;;  %v3679_v10 = vadd.f32 %v1663_v16, %v1544_v32 }
 0x1e8   : > { %2611 = vmatmul.msk.bf16.gmra.mxu1 %vm697_vm4, %v3375_v12  ;;  %v1409_v27 = vadd.f32 %v1375_v21, %v1057_v58 }
 0x1eb   : > { %v1665_v55 = vpop.f32.mrf.mxu0 }
 0x1ec   : > { %v1511_v25 = vpop.f32.mrf.mxu3  ;;  %2631 = vmatmul.msk.bf16.gmra.mxu2 %vm697_vm4, %v3382_v36  ;;  %v3699_v36 = vld [vmem:[%s3951_s3] ss:$0 sm:$0xff] }
 0x1ed   : > { %v1732_v3 = vpop.f32.mrf.mxu1  ;;  %v1545_v8 = vadd.f32 %v1511_v25, %v1409_v27 }
 0x1ef   : > { %v1862_v7 = vpop.f32.mrf.mxu2  ;;  %v3684_v11 = vadd.f32 %v1665_v55, %v1545_v8  ;;  %v4075_v55 = vld [vmem:[#allocation9_spill] sm:$0xff] }
 0x1f0   : > { %v1942_v12 = vadd.f32 %v1862_v7, %v1810_v43 }
 0x1f1   : > { %2647 = vmatmul.msk.bf16.gmra.mxu3 %vm697_vm4, %v3002_v33  ;;  %v1811_v33 = vadd.f32 %v1732_v3, %v3386_v60  ;;  %v4076_v3 = vld [vmem:[#allocation11_spill] sm:$0xff] }
 0x1f3   : > { %v2158_v23 = vpop.f32.mrf.mxu0 }
 0x1f4   : > { %v2020_v1 = vpop.f32.mrf.mxu3 }
 0x1f5   : > { %v1735_v56 = vpop.f32.mrf.mxu1  ;;  %v2100_v30 = vadd.f32 %v2020_v1, %v1942_v12 }
 0x1f6   : > { %2664 = vmatmul.msk.bf16.gmra.mxu0 %vm697_vm4, %v3401_v34  ;;  %v1812_v50 = vadd.f32 %v1735_v56, %v4073_v24 }
 0x1f7   : > { %v2238_v37 = vadd.f32 %v2158_v23, %v2100_v30  ;;  %v1864_v59 = vpop.f32.mrf.mxu2  ;;  %v4077_v30 = vld [vmem:[#allocation32_spill] sm:$0xff] }
 0x1f8   : > { %2612 = vmatmul.msk.bf16.gmra.mxu1 %vm697_vm4, %v3401_v34  ;;  %v1943_v44 = vadd.f32 %v1864_v59, %v1811_v33 }
 0x1f9   : > { %v2274_v38 = vmul.f32 %v3691_v57, %v2238_v37 }
 0x1fb   : > { %v2310_v0 = vadd.f32 %v3699_v36, %v2274_v38  ;;  %v2160_v51 = vpop.f32.mrf.mxu0  ;;  %v4078_v38 = vld [vmem:[#allocation12_spill] sm:$0xff] }
 0x1fc   : > { %v2022_v20 = vpop.f32.mrf.mxu3  ;;  %2632 = vmatmul.msk.bf16.gmra.mxu2 %vm697_vm4, %v3408_v26 }
 0x1fd   : > { %v1737_v60 = vpop.f32.mrf.mxu1  ;;  %2343 = vst.msk [vmem:[%s3708_s12] sm:$0xff] %vm2342_vm8, %v2310_v0  ;;  %v2101_v34 = vadd.f32 %v2022_v20, %v1943_v44  ;;  %v4079_v20 = vld [vmem:[#allocation3_spill] sm:$0xff] }
 0x1fe   : > { %v1813_v8 = vadd.f32 %v1737_v60, %v4076_v3  ;;  %v4082_v3 = vld [vmem:[#allocation36_spill] sm:$0xff] }
 0x1ff   : > { %v2239_v62 = vadd.f32 %v2160_v51, %v2101_v34  ;;  %v1867_v16 = vpop.f32.mrf.mxu2 }
 0x200   : > { %v1944_v32 = vadd.f32 %v1867_v16, %v1812_v50 }
 0x201   : > { %v2275_v61 = vmul.f32 %v3691_v57, %v2239_v62  ;;  %2648 = vmatmul.msk.bf16.gmra.mxu3 %vm697_vm4, %v4074_v46 }
 0x203   : > { %v2311_v28 = vadd.f32 %v3699_v36, %v2275_v61  ;;  %v2163_v58 = vpop.f32.mrf.mxu0  ;;  %v4080_v61 = vld [vmem:[#allocation35_spill] sm:$0xff] }
 0x204   : > { %v2025_v21 = vpop.f32.mrf.mxu3 }
 0x205   : > { %v1740_v26 = vpop.f32.mrf.mxu1  ;;  %2344 = vst.msk [vmem:[%s3708_s12 + $0x8] sm:$0xff] %vm2342_vm8, %v2311_v28  ;;  %v2102_v27 = vadd.f32 %v2025_v21, %v1944_v32  ;;  %v4081_v32 = vld [vmem:[#allocation33_spill] sm:$0xff] }
 0x206   : > { %2665 = vmatmul.msk.bf16.gmra.mxu0 %vm697_vm4, %v4075_v55  ;;  %v1814_v44 = vadd.f32 %v1740_v26, %v4078_v38 }
 0x207   : > { %v2240_v25 = vadd.f32 %v2163_v58, %v2102_v27  ;;  %v1869_v43 = vpop.f32.mrf.mxu2 }
 0x208   : > { %2613 = vmatmul.msk.bf16.gmra.mxu1 %vm697_vm4, %v4075_v55  ;;  %v1945_v12 = vadd.f32 %v1869_v43, %v1813_v8 }
 0x209   : > { %v2276_v7 = vmul.f32 %v3691_v57, %v2240_v25 }
 0x20b   : > { %v2312_v23 = vadd.f32 %v3699_v36, %v2276_v7  ;;  %v2165_v1 = vpop.f32.mrf.mxu0 }
 0x20c   : > { %v2027_v56 = vpop.f32.mrf.mxu3  ;;  %2633 = vmatmul.msk.bf16.gmra.mxu2 %vm697_vm4, %v4077_v30  ;;  %v4084_v30 = vld [vmem:[#allocation4_spill] sm:$0xff] }
 0x20d   : > { %v1742_v37 = vpop.f32.mrf.mxu1  ;;  %2345 = vst.msk [vmem:[%s3708_s12 + $0x10] sm:$0xff] %vm2342_vm8, %v2312_v23  ;;  %v2103_v33 = vadd.f32 %v2027_v56, %v1945_v12  ;;  %v4083_v12 = vld [vmem:[#allocation34_spill] sm:$0xff] }
 0x20e   : > { %v1815_v28 = vadd.f32 %v1742_v37, %v4081_v32  ;;  %v4087_v32 = vld [vmem:[#allocation6_spill] sm:$0xff] }
 0x20f   : > { %v2241_v59 = vadd.f32 %v2165_v1, %v2103_v33  ;;  %v1872_v0 = vpop.f32.mrf.mxu2 }
 0x210   : > { %v1946_v60 = vadd.f32 %v1872_v0, %v1814_v44 }
 0x211   : > { %v2277_v51 = vmul.f32 %v3691_v57, %v2241_v59  ;;  %2649 = vmatmul.msk.bf16.gmra.mxu3 %vm697_vm4, %v4079_v20 }
 0x213   : > { %v2313_v34 = vadd.f32 %v3699_v36, %v2277_v51  ;;  %v2168_v62 = vpop.f32.mrf.mxu0  ;;  %v4085_v51 = vld [vmem:[#allocation39_spill] sm:$0xff] }
 0x214   : > { %v2030_v24 = vpop.f32.mrf.mxu3 }
 0x215   : > { %v1745_v50 = vpop.f32.mrf.mxu1  ;;  %2346 = vst.msk [vmem:[%s3708_s12 + $0x18] sm:$0xff] %vm2342_vm8, %v2313_v34  ;;  %v2104_v16 = vadd.f32 %v2030_v24, %v1946_v60  ;;  %v4086_v60 = vld [vmem:[#allocation37_spill] sm:$0xff] }
 0x216   : > { %2666 = vmatmul.msk.bf16.gmra.mxu0 %vm697_vm4, %v4080_v61  ;;  %v1816_v23 = vadd.f32 %v1745_v50, %v4083_v12 }
 0x217   : > { %v2242_v46 = vadd.f32 %v2168_v62, %v2104_v16  ;;  %v1874_v58 = vpop.f32.mrf.mxu2 }
 0x218   : > { %2614 = vmatmul.msk.bf16.gmra.mxu1 %vm697_vm4, %v4080_v61  ;;  %v1947_v26 = vadd.f32 %v1874_v58, %v1815_v28 }
 0x219   : > { %v2278_v21 = vmul.f32 %v3691_v57, %v2242_v46 }
 0x21b   : > { %v2314_v27 = vadd.f32 %v3699_v36, %v2278_v21  ;;  %v2170_v55 = vpop.f32.mrf.mxu0 }
 0x21c   : > { %v2032_v25 = vpop.f32.mrf.mxu3  ;;  %2634 = vmatmul.msk.bf16.gmra.mxu2 %vm697_vm4, %v4082_v3  ;;  %v4089_v3 = vld [vmem:[#allocation10_spill] sm:$0xff] }
 0x21d   : > { %v1747_v8 = vpop.f32.mrf.mxu1  ;;  %2347 = vst.msk [vmem:[%s3708_s12 + $0x20] sm:$0xff] %vm2342_vm8, %v2314_v27  ;;  %v2105_v43 = vadd.f32 %v2032_v25, %v1947_v26  ;;  %v4088_v26 = vld [vmem:[#allocation38_spill] sm:$0xff] }
 0x21e   : > { %v1817_v34 = vadd.f32 %v1747_v8, %v4086_v60 }
 0x21f   : > { %v2243_v7 = vadd.f32 %v2170_v55, %v2105_v43  ;;  %v1877_v1 = vpop.f32.mrf.mxu2 }
 0x220   : > { %v1948_v37 = vadd.f32 %v1877_v1, %v1816_v23 }
 0x221   : > { %v2279_v56 = vmul.f32 %v3691_v57, %v2243_v7  ;;  %2650 = vmatmul.msk.bf16.gmra.mxu3 %vm697_vm4, %v4084_v30 }
 0x223   : > { %v2315_v33 = vadd.f32 %v3699_v36, %v2279_v56  ;;  %v2173_v59 = vpop.f32.mrf.mxu0  ;;  %v4090_v56 = vld [vmem:[#allocation41_spill] sm:$0xff] }
 0x224   : > { %v2035_v38 = vpop.f32.mrf.mxu3 }
 0x225   : > { %v1750_v44 = vpop.f32.mrf.mxu1  ;;  %2348 = vst.msk [vmem:[%s3708_s12 + $0x28] sm:$0xff] %vm2342_vm8, %v2315_v33  ;;  %v2106_v0 = vadd.f32 %v2035_v38, %v1948_v37  ;;  %v4091_v37 = vld [vmem:[#allocation7_spill] sm:$0xff] }
 0x226   : > { %2667 = vmatmul.msk.bf16.gmra.mxu0 %vm697_vm4, %v4085_v51  ;;  %v1818_v27 = vadd.f32 %v1750_v44, %v4088_v26  ;;  %v3797_v26 = vld [vmem:[%s2774_s26 + $0xd0] sm:$0xf] }
 0x227   : > { %v2244_v20 = vadd.f32 %v2173_v59, %v2106_v0  ;;  %v1879_v62 = vpop.f32.mrf.mxu2 }
 0x228   : > { %2615 = vmatmul.msk.bf16.gmra.mxu1 %vm697_vm4, %v4085_v51  ;;  %v1949_v50 = vadd.f32 %v1879_v62, %v1817_v34 }
 0x229   : > { %v2280_v24 = vmul.f32 %v3691_v57, %v2244_v20 }
 0x22b   : > { %v2316_v16 = vadd.f32 %v3699_v36, %v2280_v24  ;;  %v2175_v61 = vpop.f32.mrf.mxu0  ;;  %v4092_v24 = vld [vmem:[#allocation40_spill] sm:$0xff] }
 0x22c   : > { %v2037_v46 = vpop.f32.mrf.mxu3  ;;  %2635 = vmatmul.msk.bf16.gmra.mxu2 %vm697_vm4, %v4087_v32 }
 0x22d   : > { %v1752_v28 = vpop.f32.mrf.mxu1  ;;  %2349 = vst.msk [vmem:[%s3708_s12 + $0x30] sm:$0xff] %vm2342_vm8, %v2316_v16  ;;  %v2107_v58 = vadd.f32 %v2037_v46, %v1949_v50 }
 0x22e   : > { %v1819_v33 = vadd.f32 %v1752_v28, %v4091_v37  ;;  %v1706_v37 = vrot.slane %v3528_v42, 5 }
 0x22f   : > { %v2245_v21 = vadd.f32 %v2175_v61, %v2107_v58  ;;  %v1882_v55 = vpop.f32.mrf.mxu2  ;;  %v4093_v58 = vld [vmem:[#allocation42_spill] sm:$0xff] }
 0x230   : > { %v1950_v8 = vadd.f32 %v1882_v55, %v1818_v27 }
 0x231   : > { %v2281_v25 = vmul.f32 %v3691_v57, %v2245_v21  ;;  %2651 = vmatmul.msk.bf16.gmra.mxu3 %vm697_vm4, %v4089_v3  ;;  %v3794_v21 = vld [vmem:[%s2774_s26 + $0xcc] sm:$0xf]  ;;  %v4094_v3 = vld [vmem:[#allocation5_spill] sm:$0xff] }
 0x233   : > { %v2317_v43 = vadd.f32 %v3699_v36, %v2281_v25  ;;  %v2178_v7 = vpop.f32.mrf.mxu0 }
 0x234   : > { %v2040_v12 = vpop.f32.mrf.mxu3 }
 0x235   : > { %v1755_v23 = vpop.f32.mrf.mxu1  ;;  %2350 = vst.msk [vmem:[%s3708_s12 + $0x38] sm:$0xff] %vm2342_vm8, %v2317_v43  ;;  %v2108_v1 = vadd.f32 %v2040_v12, %v1950_v8  ;;  %v2602_v8 = vrot.slane %v4094_v3, 9  ;;  %v1978_v43 = vshll.u32 %v3794_v21, 16  ;;  %v1988_v12 = vshrl.u32 %v3797_v26, 16 }
 0x236   : > { %2668 = vmatmul.msk.bf16.gmra.mxu0 %vm697_vm4, %v4090_v56  ;;  %v1820_v50 = vadd.f32 %v1755_v23, %v4092_v24 }
 0x237   : > { %v2246_v30 = vadd.f32 %v2178_v7, %v2108_v1  ;;  %v1884_v59 = vpop.f32.mrf.mxu2  ;;  %v1984_v7 = vshll.u32 %v3797_v26, 16 }
 0x238   : > { %2616 = vmatmul.msk.bf16.gmra.mxu1 %vm697_vm4, %v4090_v56  ;;  %v1951_v44 = vadd.f32 %v1884_v59, %v1819_v33 }
 0x239   : > { %v2282_v38 = vmul.f32 %v3691_v57, %v2246_v30 }
 0x23b   : > { %v2318_v0 = vadd.f32 %v3699_v36, %v2282_v38  ;;  %v2180_v51 = vpop.f32.mrf.mxu0 }
 0x23c   : > { %v2042_v20 = vpop.f32.mrf.mxu3  ;;  %2636 = vmatmul.msk.bf16.gmra.mxu2 %vm697_vm4, %v3521_v40  ;;  %v1703_v40 = vrot.slane %v4093_v58, 5 }
 0x23d   : > { %v1757_v60 = vpop.f32.mrf.mxu1  ;;  %2351 = vst.msk [vmem:[%s3708_s12 + $0x40] sm:$0xff] %vm2342_vm8, %v2318_v0  ;;  %v2109_v34 = vadd.f32 %v2042_v20, %v1951_v44  ;;  %v1980_v0 = vrot.slane %v1978_v43, 5  ;;  %v1990_v20 = vrot.slane %v1988_v12, 4  ;;  %v2135_v12 = vrot.slane %v3797_v26, 5 }
 0x23e   : > { %v1821_v1 = vadd.f32 %v1757_v60, %v3525_v19  ;;  %v1705_v30 = vrot.slane %v1703_v40, 4  ;;  %v1704_v38 = vsel %vm3103_vm7, %v2602_v8, %v1703_v40 }
 0x23f   : > { %v2247_v62 = vadd.f32 %v2180_v51, %v2109_v34  ;;  %v1887_v16 = vpop.f32.mrf.mxu2  ;;  %v1986_v51 = vrot.slane %v1984_v7, 5  ;;  %v252_v34 = vld [vmem:[%s2774_s26 + $0xd4] sm:$0x1]  ;;  %v2137_v26 = vrot.slane %v2135_v12, 4 }
 0x240   : > { %v1952_v46 = vadd.f32 %v1887_v16, %v1820_v50  ;;  %v1708_v50 = vunpack.c.l.b16 %v1704_v38  ;;  %v2692_v38 = vld [vmem:[%s2774_s26 + $0xcc] sm:$0xff] }
 0x241   : > { %v2283_v61 = vmul.f32 %v3691_v57, %v2247_v62  ;;  %2652 = vmatmul.msk.bf16.gmra.mxu3 %vm697_vm4, %v3110_v17  ;;  %v1975_v17 = vshrl.u32 %v3794_v21, 16 }
 0x243   : > { %v2319_v32 = vadd.f32 %v3699_v36, %v2283_v61  ;;  %v2183_v28 = vpop.f32.mrf.mxu0  ;;  %v1977_v44 = vrot.slane %v1975_v17, 4 }
 0x244   : > { %v2045_v27 = vpop.f32.mrf.mxu3 }
 0x245   : > { %v1760_v55 = vpop.f32.mrf.mxu1  ;;  %2352 = vst.msk [vmem:[%s3708_s12 + $0x48] sm:$0xff] %vm2342_vm8, %v2319_v32  ;;  %v2110_v25 = vadd.f32 %v2045_v27, %v1952_v46  ;;  %v1981_v61 = vor.u32 %v1980_v0, %v1977_v44  ;;  %v1991_v46 = vor.u32 %v1990_v20, %v1986_v51  ;;  %v1994_v32 = vshll.u32 %v252_v34, 16 }
 0x246   : > { %2669 = vmatmul.msk.bf16.gmra.mxu0 %vm697_vm4, %v3544_v52  ;;  %v1822_v58 = vadd.f32 %v1760_v55, %v3542_v35 }
 0x247   : > { %v2248_v23 = vadd.f32 %v2183_v28, %v2110_v25  ;;  %v1889_v56 = vpop.f32.mrf.mxu2  ;;  %v1982_v3 = vrot.slane %v1981_v61, 4  ;;  %v1992_v8 = vrot.slane %v1991_v46, 4  ;;  %v1996_v17 = vrot.slane %v1994_v32, 5 }
 0x248   : > { %2617 = vmatmul.msk.bf16.gmra.mxu1 %vm697_vm4, %v3544_v52  ;;  %v1953_v59 = vadd.f32 %v1889_v56, %v1821_v1  ;;  %v1707_v52 = vsel %vm3103_vm7, %v1705_v30, %v1706_v37  ;;  %v2655_v56 = vrot.slane %v3794_v21, 9 }
 0x249   : > { %v2284_v33 = vmul.f32 %v3691_v57, %v2248_v23  ;;  %v1709_v16 = vunpack.c.l.b16 %v1707_v52  ;;  %v1997_v55 = vsel %vm2803_vm3, %v1992_v8, %v1996_v17 }
 0x24a   : > { %v2136_v21 = vsel %vm3103_vm7, %v2655_v56, %v2135_v12 }
 0x24b   : > { %v2320_v19 = vadd.f32 %v3699_v36, %v2284_v33  ;;  %v2185_v60 = vpop.f32.mrf.mxu0  ;;  %v1710_v25 = vpack.c.b16 %v1709_v16, %v1708_v50 }
 0x24c   : > { %v2047_v62 = vpop.f32.mrf.mxu3  ;;  %2637 = vmatmul.msk.bf16.gmra.mxu2 %vm697_vm4, %v3553_v29 }
 0x24d   : > { %v1762_v42 = vpop.f32.mrf.mxu1  ;;  %2353 = vst.msk [vmem:[%s3708_s12 + $0x50] sm:$0xff] %vm2342_vm8, %v2320_v19  ;;  %v2111_v24 = vadd.f32 %v2047_v62, %v1953_v59  ;;  %v2138_v59 = vrot.slane %v252_v34, 5 }
 0x24e   : > { %v1823_v37 = vadd.f32 %v1762_v42, %v3556_v2  ;;  %v2140_v42 = vunpack.c.l.b16 %v2136_v21 }
 0x24f   : > { %v2249_v28 = vadd.f32 %v2185_v60, %v2111_v24  ;;  %v1892_v40 = vpop.f32.mrf.mxu2  ;;  %v2139_v2 = vsel %vm3103_vm7, %v2137_v26, %v2138_v59 }
 0x250   : > { %v1954_v29 = vadd.f32 %v1892_v40, %v1822_v58  ;;  %v2141_v24 = vunpack.c.l.b16 %v2139_v2 }
 0x251   : > { %v2285_v27 = vmul.f32 %v3691_v57, %v2249_v28  ;;  %2653 = vmatmul.msk.bf16.gmra.mxu3 %vm697_vm4, %v3560_v5  ;;  %v1987_v5 = vsel %vm2803_vm3, %v1982_v3, %v1986_v51  ;;  %v1999_v51 = vunpack.c.l.b16 %v1997_v55 }
 0x252   : > { %v1998_v20 = vunpack.c.l.b16 %v1987_v5  ;;  %v2142_v32 = vpack.c.b16 %v2141_v24, %v2140_v42 }
 0x253   : > { %v2321_v43 = vadd.f32 %v3699_v36, %v2285_v27  ;;  %v2188_v7 = vpop.f32.mrf.mxu0 }
 0x254   : > { %v2050_v23 = vpop.f32.mrf.mxu3  ;;  %v2000_v62 = vpack.c.b16 %v1999_v51, %v1998_v20 }
 0x255   : > { %v1765_v1 = vpop.f32.mrf.mxu1  ;;  %2354 = vst.msk [vmem:[%s3708_s12 + $0x58] sm:$0xff] %vm2342_vm8, %v2321_v43  ;;  %v2112_v35 = vadd.f32 %v2050_v23, %v1954_v29 }
 0x256   : > { %2670 = vmatmul.msk.bf16.gmra.mxu0 %vm697_vm4, %v1710_v25  ;;  %v1824_v16 = vadd.f32 %v1765_v1, %v3567_v22 }
 0x257   : > { %v2250_v30 = vadd.f32 %v2188_v7, %v2112_v35  ;;  %v1894_v33 = vpop.f32.mrf.mxu2 }
 0x258   : > { %2618 = vmatmul.msk.bf16.gmra.mxu1 %vm697_vm4, %v1710_v25  ;;  %v1955_v0 = vadd.f32 %v1894_v33, %v1823_v37 }
 0x259   : > { %v2286_v44 = vmul.f32 %v3691_v57, %v2250_v30 }
 0x25b   : > { %v2322_v39 = vadd.f32 %v3699_v36, %v2286_v44  ;;  %v2190_v19 = vpop.f32.mrf.mxu0 }
 0x25c   : > { %v2052_v60 = vpop.f32.mrf.mxu3  ;;  %2638 = vmatmul.msk.bf16.gmra.mxu2 %vm697_vm4, %v2692_v38 }
 0x25d   : > { %v1767_v52 = vpop.f32.mrf.mxu1  ;;  %2355 = vst.msk [vmem:[%s3708_s12 + $0x60] sm:$0xff] %vm2342_vm8, %v2322_v39  ;;  %v2113_v34 = vadd.f32 %v2052_v60, %v1955_v0 }
 0x25e   : > { %v1825_v22 = vadd.f32 %v1767_v52, %v3572_v53 }
 0x25f   : > { %v2251_v50 = vadd.f32 %v2190_v19, %v2113_v34  ;;  %v1897_v61 = vpop.f32.mrf.mxu2 }
 0x260   : > { %v1956_v18 = vadd.f32 %v1897_v61, %v1824_v16 }
 0x261   : > { %v2287_v46 = vmul.f32 %v3691_v57, %v2251_v50  ;;  %2654 = vmatmul.msk.bf16.gmra.mxu3 %vm697_vm4, %v2000_v62 }
 0x263   : > { %v2323_v28 = vadd.f32 %v3699_v36, %v2287_v46  ;;  %v2193_v58 = vpop.f32.mrf.mxu0 }
 0x264   : > { %v2055_v40 = vpop.f32.mrf.mxu3 }
 0x265   : > { %v1770_v27 = vpop.f32.mrf.mxu1  ;;  %2356 = vst.msk [vmem:[%s3708_s12 + $0x68] sm:$0xff] %vm2342_vm8, %v2323_v28  ;;  %v2114_v29 = vadd.f32 %v2055_v40, %v1956_v18 }
 0x266   : > { %2671 = vmatmul.msk.bf16.gmra.mxu0 %vm697_vm4, %v2142_v32  ;;  %v1826_v5 = vadd.f32 %v1770_v27, %v3581_v48 }
 0x267   : > { %v2252_v25 = vadd.f32 %v2193_v58, %v2114_v29  ;;  %v1899_v3 = vpop.f32.mrf.mxu2 }
 0x268   : > { %v1957_v17 = vadd.f32 %v1899_v3, %v1825_v22 }
 0x269   : > { %v2288_v8 = vmul.f32 %v3691_v57, %v2252_v25 }
 0x26b   : > { %v2324_v43 = vadd.f32 %v3699_v36, %v2288_v8  ;;  %v2195_v7 = vpop.f32.mrf.mxu0 }
 0x26c   : > { %v2057_v12 = vpop.f32.mrf.mxu3 }
 0x26d   : > { %v1772_v23 = vpop.f32.mrf.mxu1  ;;  %2357 = vst.msk [vmem:[%s3708_s12 + $0x70] sm:$0xff] %vm2342_vm8, %v2324_v43  ;;  %v2115_v1 = vadd.f32 %v2057_v12, %v1957_v17 }
 0x26e   : > { %v1827_v44 = vadd.f32 %v1772_v23, %v3586_v14 }
 0x26f   : > { %v2253_v35 = vadd.f32 %v2195_v7, %v2115_v1  ;;  %v1902_v55 = vpop.f32.mrf.mxu2 }
 0x270   : > { %v1958_v53 = vadd.f32 %v1902_v55, %v1826_v5 }
 0x271   : > { %v2289_v56 = vmul.f32 %v3691_v57, %v2253_v35 }
 0x273   : > { %v2325_v30 = vadd.f32 %v3699_v36, %v2289_v56  ;;  %v2198_v37 = vpop.f32.mrf.mxu0 }
 0x274   : > { %v2060_v33 = vpop.f32.mrf.mxu3 }
 0x275   : > { %v1775_v26 = vpop.f32.mrf.mxu1  ;;  %2358 = vst.msk [vmem:[%s3708_s12 + $0x78] sm:$0xff] %vm2342_vm8, %v2325_v30  ;;  %v2116_v59 = vadd.f32 %v2060_v33, %v1958_v53 }
 0x276   : > { %v1828_v52 = vadd.f32 %v1775_v26, %v3595_v6 }
 0x277   : > { %v2254_v38 = vadd.f32 %v2198_v37, %v2116_v59  ;;  %v1904_v0 = vpop.f32.mrf.mxu2 }
 0x278   : > { %v1959_v48 = vadd.f32 %v1904_v0, %v1827_v44 }
 0x279   : > { %v2290_v20 = vmul.f32 %v3691_v57, %v2254_v38 }
 0x27b   : > { %v2326_v51 = vadd.f32 %v3699_v36, %v2290_v20  ;;  %v2200_v39 = vpop.f32.mrf.mxu0 }
 0x27c   : > { %v2062_v19 = vpop.f32.mrf.mxu3 }
 0x27d   : > { %v1777_v21 = vpop.f32.mrf.mxu1  ;;  %2359 = vst.msk [vmem:[%s3708_s12 + $0x80] sm:$0xff] %vm2342_vm8, %v2326_v51  ;;  %v2117_v2 = vadd.f32 %v2062_v19, %v1959_v48 }
 0x27e   : > { %v1829_v18 = vadd.f32 %v1777_v21, %v3600_v49 }
 0x27f   : > { %v2255_v60 = vadd.f32 %v2200_v39, %v2117_v2  ;;  %v1907_v34 = vpop.f32.mrf.mxu2 }
 0x280   : > { %v1960_v14 = vadd.f32 %v1907_v34, %v1828_v52 }
 0x281   : > { %v2291_v62 = vmul.f32 %v3691_v57, %v2255_v60 }
 0x283   : > { %v2327_v42 = vadd.f32 %v3699_v36, %v2291_v62  ;;  %v2203_v24 = vpop.f32.mrf.mxu0 }
 0x284   : > { %v2065_v50 = vpop.f32.mrf.mxu3 }
 0x285   : > { %v1780_v16 = vpop.f32.mrf.mxu1  ;;  %2360 = vst.msk [vmem:[%s3708_s12 + $0x88] sm:$0xff] %vm2342_vm8, %v2327_v42  ;;  %v2118_v61 = vadd.f32 %v2065_v50, %v1960_v14 }
 0x286   : > { %v1830_v3 = vadd.f32 %v1780_v16, %v3609_v31 }
 0x287   : > { %v2256_v46 = vadd.f32 %v2203_v24, %v2118_v61  ;;  %v1909_v32 = vpop.f32.mrf.mxu2 }
 0x288   : > { %v1961_v6 = vadd.f32 %v1909_v32, %v1829_v18 }
 0x289   : > { %v2292_v28 = vmul.f32 %v3691_v57, %v2256_v46 }
 0x28b   : > { %v2328_v58 = vadd.f32 %v3699_v36, %v2292_v28  ;;  %v2205_v40 = vpop.f32.mrf.mxu0 }
 0x28c   : > { %v2067_v27 = vpop.f32.mrf.mxu3 }
 0x28d   : > { %v1782_v29 = vpop.f32.mrf.mxu1  ;;  %2361 = vst.msk [vmem:[%s3708_s12 + $0x90] sm:$0xff] %vm2342_vm8, %v2328_v58  ;;  %v2119_v25 = vadd.f32 %v2067_v27, %v1961_v6 }
 0x28e   : > { %v1831_v5 = vadd.f32 %v1782_v29, %v3614_v63 }
 0x28f   : > { %v2257_v22 = vadd.f32 %v2205_v40, %v2119_v25  ;;  %v1912_v8 = vpop.f32.mrf.mxu2 }
 0x290   : > { %v1962_v49 = vadd.f32 %v1912_v8, %v1830_v3 }
 0x291   : > { %v2293_v17 = vmul.f32 %v3691_v57, %v2257_v22 }
 0x293   : > { %v2329_v43 = vadd.f32 %v3699_v36, %v2293_v17  ;;  %v2208_v7 = vpop.f32.mrf.mxu0 }
 0x294   : > { %v2070_v12 = vpop.f32.mrf.mxu3 }
 0x295   : > { %v1785_v23 = vpop.f32.mrf.mxu1  ;;  %2362 = vst.msk [vmem:[%s3708_s12 + $0x98] sm:$0xff] %vm2342_vm8, %v2329_v43  ;;  %v2120_v1 = vadd.f32 %v2070_v12, %v1962_v49 }
 0x296   : > { %v1832_v38 = vadd.f32 %v1785_v23, %v3623_v9 }
 0x297   : > { %v2258_v35 = vadd.f32 %v2208_v7, %v2120_v1  ;;  %v1914_v55 = vpop.f32.mrf.mxu2 }
 0x298   : > { %v1963_v31 = vadd.f32 %v1914_v55, %v1831_v5 }
 0x299   : > { %v2294_v56 = vmul.f32 %v3691_v57, %v2258_v35 }
 0x29b   : > { %v2330_v53 = vadd.f32 %v3699_v36, %v2294_v56  ;;  %v2210_v30 = vpop.f32.mrf.mxu0 }
 0x29c   : > { %v2072_v37 = vpop.f32.mrf.mxu3 }
 0x29d   : > { %v1787_v33 = vpop.f32.mrf.mxu1  ;;  %2363 = vst.msk [vmem:[%s3708_s12 + $0xa0] sm:$0xff] %vm2342_vm8, %v2330_v53  ;;  %v2121_v26 = vadd.f32 %v2072_v37, %v1963_v31 }
 0x29e   : > { %v1833_v2 = vadd.f32 %v1787_v33, %v3628_v54 }
 0x29f   : > { %v2259_v59 = vadd.f32 %v2210_v30, %v2121_v26  ;;  %v1917_v44 = vpop.f32.mrf.mxu2 }
 0x2a0   : > { %v1964_v63 = vadd.f32 %v1917_v44, %v1832_v38 }
 0x2a1   : > { %v2295_v0 = vmul.f32 %v3691_v57, %v2259_v59 }
 0x2a3   : > { %v2331_v20 = vadd.f32 %v3699_v36, %v2295_v0  ;;  %v2213_v48 = vpop.f32.mrf.mxu0 }
 0x2a4   : > { %v2075_v51 = vpop.f32.mrf.mxu3 }
 0x2a5   : > { %v1790_v39 = vpop.f32.mrf.mxu1  ;;  %2364 = vst.msk [vmem:[%s3708_s12 + $0xa8] sm:$0xff] %vm2342_vm8, %v2331_v20  ;;  %v2122_v19 = vadd.f32 %v2075_v51, %v1964_v63 }
 0x2a6   : > { %v1834_v16 = vadd.f32 %v1790_v39, %v3637_v47 }
 0x2a7   : > { %v2260_v21 = vadd.f32 %v2213_v48, %v2122_v19  ;;  %v1919_v60 = vpop.f32.mrf.mxu2 }
 0x2a8   : > { %v1965_v9 = vadd.f32 %v1919_v60, %v1833_v2 }
 0x2a9   : > { %v2296_v52 = vmul.f32 %v3691_v57, %v2260_v21 }
 0x2ab   : > { %v2332_v34 = vadd.f32 %v3699_v36, %v2296_v52  ;;  %v2215_v62 = vpop.f32.mrf.mxu0 }
 0x2ac   : > { %v2077_v14 = vpop.f32.mrf.mxu3 }
 0x2ad   : > { %v1792_v42 = vpop.f32.mrf.mxu1  ;;  %2365 = vst.msk [vmem:[%s3708_s12 + $0xb0] sm:$0xff] %vm2342_vm8, %v2332_v34  ;;  %v2123_v24 = vadd.f32 %v2077_v14, %v1965_v9 }
 0x2ae   : > { %v1835_v27 = vadd.f32 %v1792_v42, %v3642_v15 }
 0x2af   : > { %v2261_v50 = vadd.f32 %v2215_v62, %v2123_v24  ;;  %v1922_v61 = vpop.f32.mrf.mxu2 }
 0x2b0   : > { %v1966_v54 = vadd.f32 %v1922_v61, %v1834_v16 }
 0x2b1   : > { %v2297_v46 = vmul.f32 %v3691_v57, %v2261_v50 }
 0x2b3   : > { %v2333_v18 = vadd.f32 %v3699_v36, %v2297_v46  ;;  %v2218_v32 = vpop.f32.mrf.mxu0 }
 0x2b4   : > { %v2080_v28 = vpop.f32.mrf.mxu3 }
 0x2b5   : > { %v1795_v6 = vpop.f32.mrf.mxu1  ;;  %2366 = vst.msk [vmem:[%s3708_s12 + $0xb8] sm:$0xff] %vm2342_vm8, %v2333_v18  ;;  %v2124_v58 = vadd.f32 %v2080_v28, %v1966_v54 }
 0x2b6   : > { %v1836_v7 = vadd.f32 %v1795_v6, %v3651_v41 }
 0x2b7   : > { %v2262_v40 = vadd.f32 %v2218_v32, %v2124_v58  ;;  %v1924_v29 = vpop.f32.mrf.mxu2 }
 0x2b8   : > { %v1967_v47 = vadd.f32 %v1924_v29, %v1835_v27 }
 0x2b9   : > { %v2298_v25 = vmul.f32 %v3691_v57, %v2262_v40 }
 0x2bb   : > { %v2334_v22 = vadd.f32 %v3699_v36, %v2298_v25  ;;  %v2220_v3 = vpop.f32.mrf.mxu0 }
 0x2bc   : > { %v2082_v8 = vpop.f32.mrf.mxu3 }
 0x2bd   : > { %v1797_v17 = vpop.f32.mrf.mxu1  ;;  %2367 = vst.msk [vmem:[%s3708_s12 + $0xc0] sm:$0xff] %vm2342_vm8, %v2334_v22  ;;  %v2125_v49 = vadd.f32 %v2082_v8, %v1967_v47 }
 0x2be   : > { %v1837_v53 = vadd.f32 %v1797_v17, %v3656_v4 }
 0x2bf   : > { %v2263_v43 = vadd.f32 %v2220_v3, %v2125_v49  ;;  %v1927_v12 = vpop.f32.mrf.mxu2 }
 0x2c0   : > { %v1968_v15 = vadd.f32 %v1927_v12, %v1836_v7 }
 0x2c1   : > { %v2299_v23 = vmul.f32 %v3691_v57, %v2263_v43 }
 0x2c3   : > { %v2335_v1 = vadd.f32 %v3699_v36, %v2299_v23  ;;  %v2223_v35 = vpop.f32.mrf.mxu0 }
 0x2c4   : > { %v2085_v5 = vpop.f32.mrf.mxu3 }
 0x2c5   : > { %2368 = vst.msk [vmem:[%s3708_s12 + $0xc8] sm:$0xff] %vm2342_vm8, %v2335_v1  ;;  %v2126_v55 = vadd.f32 %v2085_v5, %v1968_v15  ;;  %v1800_v56 = vpop.f32.mrf.mxu1 }
 0x2c6   : > { %v1838_v0 = vadd.f32 %v1800_v56, %v3665_v13 }
 0x2c7   : > { %v2264_v31 = vadd.f32 %v2223_v35, %v2126_v55  ;;  %v1929_v30 = vpop.f32.mrf.mxu2 }
 0x2c8   : > { %v1969_v41 = vadd.f32 %v1929_v30, %v1837_v53 }
 0x2c9   : > { %v2300_v37 = vmul.f32 %v3691_v57, %v2264_v31 }
 0x2cb   : > { %v2336_v33 = vadd.f32 %v3699_v36, %v2300_v37  ;;  %v2225_v26 = vpop.f32.mrf.mxu0 }
 0x2cc   : > { %v2087_v59 = vpop.f32.mrf.mxu3 }
 0x2cd   : > { %2369 = vst.msk [vmem:[%s3708_s12 + $0xd0] sm:$0xff] %vm2342_vm8, %v2336_v33  ;;  %v2127_v38 = vadd.f32 %v2087_v59, %v1969_v41  ;;  %v1802_v20 = vpop.f32.mrf.mxu1 }
 0x2ce   : > { %v1839_v60 = vadd.f32 %v1802_v20, %v3670_v45 }
 0x2cf   : > { %v2265_v44 = vadd.f32 %v2225_v26, %v2127_v38  ;;  %v1932_v63 = vpop.f32.mrf.mxu2 }
 0x2d0   : > { %v1970_v4 = vadd.f32 %v1932_v63, %v1838_v0 }
 0x2d1   : > { %v2301_v48 = vmul.f32 %v3691_v57, %v2265_v44 }
 0x2d3   : > { %v2337_v51 = vadd.f32 %v3699_v36, %v2301_v48  ;;  %v2228_v39 = vpop.f32.mrf.mxu0 }
 0x2d4   : > { %v2090_v19 = vpop.f32.mrf.mxu3 }
 0x2d5   : > { %2370 = vst.msk [vmem:[%s3708_s12 + $0xd8] sm:$0xff] %vm2342_vm8, %v2337_v51  ;;  %v2128_v21 = vadd.f32 %v2090_v19, %v1970_v4  ;;  %v1805_v34 = vpop.f32.mrf.mxu1 }
 0x2d6   : > { %v1840_v16 = vadd.f32 %v1805_v34, %v3679_v10 }
 0x2d7   : > { %v2266_v2 = vadd.f32 %v2228_v39, %v2128_v21  ;;  %v1934_v52 = vpop.f32.mrf.mxu2 }
 0x2d8   : > { %v1971_v13 = vadd.f32 %v1934_v52, %v1839_v60 }
 0x2d9   : > { %v2302_v9 = vmul.f32 %v3691_v57, %v2266_v2 }
 0x2db   : > { %v2338_v62 = vadd.f32 %v3699_v36, %v2302_v9  ;;  %v2230_v14 = vpop.f32.mrf.mxu0 }
 0x2dc   : > { %v2092_v42 = vpop.f32.mrf.mxu3 }
 0x2dd   : > { %2371 = vst.msk [vmem:[%s3708_s12 + $0xe0] sm:$0xff] %vm2342_vm8, %v2338_v62  ;;  %v2129_v24 = vadd.f32 %v2092_v42, %v1971_v13  ;;  %v1807_v18 = vpop.f32.mrf.mxu1 }
 0x2de   : > { %v1841_v40 = vadd.f32 %v1807_v18, %v3684_v11 }
 0x2df   : > { %v2267_v50 = vadd.f32 %v2230_v14, %v2129_v24  ;;  %v1937_v61 = vpop.f32.mrf.mxu2 }
 0x2e0   : > { %v1972_v46 = vadd.f32 %v1937_v61, %v1840_v16 }
 0x2e1   : > { %v2303_v45 = vmul.f32 %v3691_v57, %v2267_v50 }
 0x2e3   : > { %v2339_v54 = vadd.f32 %v3699_v36, %v2303_v45  ;;  %v2233_v32 = vpop.f32.mrf.mxu0 }
 0x2e4   : > { %v2095_v28 = vpop.f32.mrf.mxu3 }
 0x2e5   : > { %2372 = vst.msk [vmem:[%s3708_s12 + $0xe8] sm:$0xff] %vm2342_vm8, %v2339_v54  ;;  %v2130_v6 = vadd.f32 %v2095_v28, %v1972_v46 }
 0x2e7   : > { %v2268_v58 = vadd.f32 %v2233_v32, %v2130_v6  ;;  %v1939_v27 = vpop.f32.mrf.mxu2 }
 0x2e8   : > { %v1973_v29 = vadd.f32 %v1939_v27, %v1841_v40 }
 0x2e9   : > { %v2304_v10 = vmul.f32 %v3691_v57, %v2268_v58 }
 0x2eb   : > { %v2340_v25 = vadd.f32 %v3699_v36, %v2304_v10  ;;  %v2235_v3 = vpop.f32.mrf.mxu0 }
 0x2ec   : > { %v2097_v47 = vpop.f32.mrf.mxu3 }
 0x2ed   : > { %2373 = vst.msk [vmem:[%s3708_s12 + $0xf0] sm:$0xff] %vm2342_vm8, %v2340_v25  ;;  %v2131_v22 = vadd.f32 %v2097_v47, %v1973_v29 }
 0x2ef   : > { %v2269_v8 = vadd.f32 %v2235_v3, %v2131_v22 }
 0x2f1   : > { %v2305_v17 = vmul.f32 %v3691_v57, %v2269_v8 }
 0x2f3   : > { %v2341_v49 = vadd.f32 %v3699_v36, %v2305_v17 }
 0x2f5   : > { %2374 = vst.msk [vmem:[%s3708_s12 + $0xf8] sm:$0xff] %vm2342_vm8, %v2341_v49 }
 0x2f6 PF: > { %s14_s15 = sadd.s32 1, %s2722_s15  }
 0x2f7   : > { %p11_p4 = scmp.ge.s32.totalorder %s14_s15, 4  }
 0x2f9   :  { %13 = sbr.rel (!%p11_p4) target bundleno = 1 (0x1), region = 66 }

// kernel: decoder_block.2
= control target key start
LH: loop header
LB: loop body
LE: loop exit
PB: predicated region body
PF: predicated region fallthrough
CT: control target
= control target key end

     0   :  { %s2756_s12 = smov 0   ;;  %s3897_s0 = inlined_call_operand.vmem [shape: bf16[2,18,18,4], index: 0, kind: input, shape index: {}]   ;;  %s3898_s1 = inlined_call_operand.vmem [shape: bf16[36,32], index: 1, kind: input, shape index: {}]   ;;  %s3899_s2 = inlined_call_operand.vmem [shape: f32[1,32], index: 2, kind: output, shape index: {0}]   ;;  %s3900_s3 = inlined_call_operand.vmem [shape: f32[1,32], index: 3, kind: output, shape index: {1}]  }
   0x1 LB: > { %s2445_s13 = sadd.s32 4294967295, %s2733_s12   ;;  %p2448_p0 = scmp.ge.s32.totalorder %s2733_s12, 1  ;;  %s2733_s12 = sphi %s2756_s12, %s14_s12  }
   0x2   : > { %p130_p1 = scmp.lt.s32.totalorder %s2733_s12, 3 }
   0x4   : > { %p131_p2 = pnand %p2448_p0, %p130_p1 }
   0x6   : > { %134 = sbr.rel (%p131_p2) target bundleno = 782 (0x30e), region = 28 }
   0xb   : > { %p149_p3 = scmp.lt.s32.totalorder %s2445_s13, 1  ;;  %p2450_p4 = scmp.ne.s32.totalorder %s2445_s13, 0 }
   0xd   : > { %s150_s14 = scalar_select %p149_p3, %s2445_s13, 1 }
   0xe   : > { %158 = sbr.rel (%p2450_p4) target bundleno = 22 (0x16), region = 32 }
   0xf   : > { %s2708_s15 = smul.u32 216, %s150_s14 }
  0x11   : > { %s2767_s18 = scalar_lea.vmem %s3897_s0, %s2708_s15 }
  0x13   : > { %vm159_vm0 = vcmask 253952   ;;  %v2735_v0 = vmov 0.0  }
  0x14   : > { %160 = vst.msk [vmem:[%s3899_s2] sm:$0x1] %vm159_vm0, %v2735_v0 }
  0x15   : > { %161 = vst.msk [vmem:[%s3900_s3] sm:$0x1] %vm159_vm0, %v2735_v0 }
  0x16 PF: > { %v2778_v1 = vld [vmem:[%s3898_s1] sm:$0xf]  ;;  %vm709_vm1 = vcmask 1041408   ;;  %v2781_v2 = vld [vmem:[%s2767_s18 + $0x30] sm:$0xf]  ;;  %vm660_vm5 = vcmask 31744  }
  0x17   : > { %v657_v3 = vunpack.c.l.b16 %v2778_v1  ;;  %v2785_v4 = vld [vmem:[%s2767_s18 + $0x34] sm:$0xf]  ;;  %v2788_v5 = vld [vmem:[%s2767_s18 + $0x38] sm:$0x1]  ;;  %vm221_vm2 = vsmask.f32 3328 }
  0x18   : > { %vm222_vm3 = vsmask.f32 7440  ;;  %v321_v6 = vshrl.u32 %v2781_v2, 16  ;;  %v324_v7 = vshll.u32 %v2781_v2, 16  ;;  %v330_v8 = vshll.u32 %v2785_v4, 16 }
  0x19   : > { %v658_v9 = vpack.c.b16 %v657_v3, %v657_v3  ;;  %v334_v10 = vshrl.u32 %v2785_v4, 16  ;;  %v340_v11 = vshll.u32 %v2788_v5, 16  ;;  %v186_v12 = vld [vmem:[%s2767_s18 + $0x60] sm:$0xf]  ;;  %v187_v13 = vld [vmem:[%s2767_s18 + $0x64] sm:$0xf]  ;;  %vm2802_vm4 = vmor %vm221_vm2, %vm222_vm3 }
  0x1a   : > { %v323_v14 = vrot.slane %v321_v6, 4  ;;  %v326_v15 = vrot.slane %v324_v7, 5  ;;  %v332_v16 = vrot.slane %v330_v8, 5  ;;  %v188_v17 = vld [vmem:[%s2767_s18 + $0x68] sm:$0x1]  ;;  %v417_v18 = vshrl.u32 %v186_v12, 16 }
  0x1b   : > { %v659_v19 = vrot.slane %v658_v9, 2  ;;  %v336_v20 = vrot.slane %v334_v10, 4  ;;  %v342_v21 = vrot.slane %v340_v11, 5  ;;  %v420_v22 = vshll.u32 %v186_v12, 16  ;;  %v198_v27 = vld [vmem:[%s2767_s18 + $0x90] sm:$0xf] }
  0x1c   : > { %v327_v23 = vor.u32 %v326_v15, %v323_v14  ;;  %v419_v24 = vrot.slane %v417_v18, 4  ;;  %v426_v25 = vshll.u32 %v187_v13, 16  ;;  %v430_v26 = vshrl.u32 %v187_v13, 16  ;;  %v199_v33 = vld [vmem:[%s2767_s18 + $0x94] sm:$0xf] }
  0x1d   : > { %v711_v28 = vsel %vm709_vm1, %v659_v19, 0  ;;  %v337_v30 = vor.u32 %v336_v20, %v332_v16  ;;  %v422_v31 = vrot.slane %v420_v22, 5  ;;  %v436_v32 = vshll.u32 %v188_v17, 16  ;;  %v200_v43 = vld [vmem:[%s2767_s18 + $0x98] sm:$0x1] }
  0x1e   : > { %2705 = vmatpush.bf16.msra.mxu1 %v711_v28  ;;  %2706 = vmatpush.bf16.msra.mxu2 %v711_v28  ;;  %v328_v34 = vrot.slane %v327_v23, 4  ;;  %v428_v35 = vrot.slane %v426_v25, 5  ;;  %v432_v36 = vrot.slane %v430_v26, 4  ;;  %v513_v40 = vshrl.u32 %v198_v27, 16  ;;  %v217_v53 = vld [vmem:[%s3898_s1 + $0x4] sm:$0xf] }
  0x1f   : > { %2707 = vmatpush.bf16.msra.mxu3 %v711_v28  ;;  %720 = vmatpush.bf16.msra.mxu0 %v711_v28  ;;  %v338_v37 = vrot.slane %v337_v30, 4  ;;  %v423_v38 = vor.u32 %v422_v31, %v419_v24  ;;  %v438_v39 = vrot.slane %v436_v32, 5  ;;  %v516_v44 = vshll.u32 %v198_v27, 16  ;;  %v2818_v58 = vld [vmem:[%s2767_s18] sm:$0xf] }
  0x20   : > { %v333_v41 = vsel %vm2802_vm4, %v328_v34, %v332_v16  ;;  %v433_v42 = vor.u32 %v432_v36, %v428_v35  ;;  %v522_v45 = vshll.u32 %v199_v33, 16  ;;  %v515_v49 = vrot.slane %v513_v40, 4  ;;  %v2825_v63 = vld [vmem:[%s2767_s18 + $0x4] sm:$0xf]  ;;  %v2829_v8 = vld [vmem:[%s2767_s18 + $0x8] sm:$0x1] }
  0x21   : > { %v343_v46 = vsel %vm2802_vm4, %v338_v37, %v342_v21  ;;  %v616_v47 = vunpack.c.l.b16 %v333_v41  ;;  %v424_v48 = vrot.slane %v423_v38, 4  ;;  %v518_v52 = vrot.slane %v516_v44, 5  ;;  %v2845_v21 = vld [vmem:[%s3898_s1 + $0x8] sm:$0xf]  ;;  %v2850_v30 = vld [vmem:[%s2767_s18 + $0x3c] sm:$0xf] }
  0x22   : > { %v617_v50 = vunpack.c.l.b16 %v343_v46  ;;  %v434_v51 = vrot.slane %v433_v42, 4  ;;  %v524_v55 = vrot.slane %v522_v45, 5  ;;  %v526_v56 = vshrl.u32 %v199_v33, 16  ;;  %v2853_v31 = vld [vmem:[%s2767_s18 + $0x40] sm:$0xf] }
  0x23   : > { %v429_v54 = vsel %vm2802_vm4, %v424_v48, %v428_v35  ;;  %v532_v57 = vshll.u32 %v200_v43, 16  ;;  %v519_v62 = vor.u32 %v518_v52, %v515_v49  ;;  %v1250_v7 = vsel %vm709_vm1, %v217_v53, 0  ;;  %v2870_v45 = vld [vmem:[%s2767_s18 + $0x44] sm:$0x1]  ;;  %v2873_v46 = vld [vmem:[%s2767_s18 + $0x6c] sm:$0xf] }
  0x24   : > { %v2820_v59 = vpack.c.b16 %v617_v50, %v616_v47  ;;  %v439_v60 = vsel %vm2802_vm4, %v434_v51, %v438_v39  ;;  %v624_v61 = vunpack.c.l.b16 %v429_v54  ;;  %v528_v3 = vrot.slane %v526_v56, 4  ;;  %1259 = vmatpush.bf16.msrb.mxu2 %v1250_v7  ;;  %v2878_v51 = vld [vmem:[%s2767_s18 + $0x70] sm:$0xf]  ;;  %v201_v7 = vld [vmem:[%s2767_s18 + $0x9c] sm:$0xf] }
  0x25   : > { %v625_v0 = vunpack.c.l.b16 %v439_v60  ;;  %v534_v6 = vrot.slane %v532_v57, 5  ;;  %v520_v9 = vrot.slane %v519_v62, 4  ;;  %v1379_v10 = vunpack.c.l.b16 %v217_v53  ;;  %v2885_v57 = vld [vmem:[%s2767_s18 + $0x74] sm:$0x1] }
  0x26   : > { %2455 = vmatmul.msk.bf16.vlgmr.msra.gmra.mxu1 %vm660_vm5, %v2820_v59  ;;  %v225_v11 = vshrl.u32 %v2818_v58, 16  ;;  %v228_v12 = vshll.u32 %v2818_v58, 16  ;;  %v529_v14 = vor.u32 %v528_v3, %v524_v55  ;;  %v234_v15 = vshll.u32 %v2825_v63, 16 }
  0x27   : > { %v2835_v13 = vpack.c.b16 %v625_v0, %v624_v61  ;;  %v238_v16 = vshrl.u32 %v2825_v63, 16  ;;  %v525_v17 = vsel %vm2802_vm4, %v520_v9, %v524_v55  ;;  %v244_v20 = vshll.u32 %v2829_v8, 16 }
  0x28   : > { %v227_v18 = vrot.slane %v225_v11, 4  ;;  %v230_v19 = vrot.slane %v228_v12, 5  ;;  %v530_v22 = vrot.slane %v529_v14, 4  ;;  %v236_v23 = vrot.slane %v234_v15, 5 }
  0x29   : > { %3943 = vst [vmem:[#allocation2_spill] sm:$0xff] %v2835_v13  ;;  %2459 = vmatmul.msk.bf16.vlgmr.msra.gmra.mxu2 %vm660_vm5, %v2835_v13  ;;  %v240_v24 = vrot.slane %v238_v16, 4  ;;  %v632_v25 = vunpack.c.l.b16 %v525_v17  ;;  %v246_v27 = vrot.slane %v244_v20, 5  ;;  %v1380_v28 = vpack.c.b16 %v1379_v10, %v1379_v10 }
  0x2a   : > { %v231_v26 = vor.u32 %v230_v19, %v227_v18  ;;  %v535_v32 = vsel %vm2802_vm4, %v530_v22, %v534_v6  ;;  %v931_v34 = vsel %vm709_vm1, %v2778_v1, 0  ;;  %v1540_v35 = vsel %vm709_vm1, %v2845_v21, 0  ;;  %v202_v18 = vld [vmem:[%s2767_s18 + $0xa0] sm:$0xf]  ;;  %v203_v22 = vld [vmem:[%s2767_s18 + $0xa4] sm:$0x1] }
  0x2b   : > { %v241_v33 = vor.u32 %v240_v24, %v236_v23  ;;  %v633_v36 = vunpack.c.l.b16 %v535_v32  ;;  %v1381_v38 = vrot.slane %v1380_v28, 2  ;;  %940 = vmatpush.bf16.msrb.mxu1 %v931_v34  ;;  %1549 = vmatpush.bf16.msrb.mxu0 %v1540_v35  ;;  %v345_v40 = vshrl.u32 %v2850_v30, 16 }
  0x2c   : > { %v232_v37 = vrot.slane %v231_v26, 4  ;;  %v348_v41 = vshll.u32 %v2850_v30, 16  ;;  %v354_v42 = vshll.u32 %v2853_v31, 16  ;;  %v358_v54 = vshrl.u32 %v2853_v31, 16 }
  0x2d   : > { %v242_v39 = vrot.slane %v241_v33, 4  ;;  %v2864_v43 = vpack.c.b16 %v633_v36, %v632_v25  ;;  %v1386_v44 = vsel %vm709_vm1, %v1381_v38, 0  ;;  %v347_v49 = vrot.slane %v345_v40, 4 }
  0x2e   : > { %v237_v1 = vsel %vm2802_vm4, %v232_v37, %v236_v23  ;;  %1395 = vmatpush.bf16.msrb.mxu3 %v1386_v44  ;;  %v350_v50 = vrot.slane %v348_v41, 5  ;;  %v356_v53 = vrot.slane %v354_v42, 5  ;;  %v364_v56 = vshll.u32 %v2870_v45, 16  ;;  %v2906_v44 = vld [vmem:[%s2767_s18 + $0x10] sm:$0xf] }
  0x2f   : > { %3944 = vst [vmem:[#allocation3_spill] sm:$0xff] %v2864_v43  ;;  %v247_v47 = vsel %vm2802_vm4, %v242_v39, %v246_v27  ;;  %v608_v48 = vunpack.c.l.b16 %v237_v1  ;;  %2463 = vmatmul.msk.bf16.vlgmr.msra.gmra.mxu3 %vm660_vm5, %v2864_v43  ;;  %v441_v60 = vshrl.u32 %v2873_v46, 16  ;;  %v444_v61 = vshll.u32 %v2873_v46, 16  ;;  %v2903_v1 = vld [vmem:[%s2767_s18 + $0xc] sm:$0xf] }
  0x30   : > { %v609_v52 = vunpack.c.l.b16 %v247_v47  ;;  %v351_v55 = vor.u32 %v350_v50, %v347_v49  ;;  %v360_v0 = vrot.slane %v358_v54, 4  ;;  %v450_v3 = vshll.u32 %v2878_v51, 16  ;;  %v2911_v50 = vld [vmem:[%s2767_s18 + $0x14] sm:$0x1]  ;;  %v3084_v43 = vld [vmem:[%s2767_s18 + $0x24] sm:$0xf] }
  0x31   : > { %v454_v6 = vshrl.u32 %v2878_v51, 16  ;;  %v366_v10 = vrot.slane %v364_v56, 5  ;;  %v443_v11 = vrot.slane %v441_v60, 4  ;;  %v446_v12 = vrot.slane %v444_v61, 5 }
  0x32   : > { %v640_v62 = vpack.c.b16 %v609_v52, %v608_v48  ;;  %v352_v9 = vrot.slane %v351_v55, 4  ;;  %v361_v14 = vor.u32 %v360_v0, %v356_v53  ;;  %v452_v15 = vrot.slane %v450_v3, 5  ;;  %v2919_v0 = vld [vmem:[%s2767_s18 + $0x48] sm:$0xf] }
  0x33   : > { %v456_v16 = vrot.slane %v454_v6, 4  ;;  %v460_v17 = vshll.u32 %v2885_v57, 16  ;;  %v447_v20 = vor.u32 %v446_v12, %v443_v11  ;;  %v537_v23 = vshrl.u32 %v201_v7, 16 }
  0x34   : > { %2451 = vmatmul.msk.bf16.vlgmr.msra.gmra.mxu0 %vm660_vm5, %v640_v62  ;;  %v357_v19 = vsel %vm2802_vm4, %v352_v9, %v356_v53  ;;  %v362_v24 = vrot.slane %v361_v14, 4  ;;  %v540_v33 = vshll.u32 %v201_v7, 16  ;;  %v546_v34 = vshll.u32 %v202_v18, 16 }
  0x35   : > { %v618_v25 = vunpack.c.l.b16 %v357_v19  ;;  %v457_v26 = vor.u32 %v456_v16, %v452_v15  ;;  %v462_v27 = vrot.slane %v460_v17, 5  ;;  %v448_v28 = vrot.slane %v447_v20, 4  ;;  %v2935_v19 = vld [vmem:[%s2767_s18 + $0x50] sm:$0x1] }
  0x36   : > { %v539_v32 = vrot.slane %v537_v23, 4  ;;  %v367_v35 = vsel %vm2802_vm4, %v362_v24, %v366_v10  ;;  %v550_v37 = vshrl.u32 %v202_v18, 16  ;;  %v556_v38 = vshll.u32 %v203_v22, 16 }
  0x37   : > { %v458_v36 = vrot.slane %v457_v26, 4  ;;  %v619_v39 = vunpack.c.l.b16 %v367_v35  ;;  %v453_v40 = vsel %vm2802_vm4, %v448_v28, %v452_v15  ;;  %v542_v41 = vrot.slane %v540_v33, 5  ;;  %v2928_v15 = vld [vmem:[%s2767_s18 + $0x4c] sm:$0xf]  ;;  %v2942_v26 = vld [vmem:[%s2767_s18 + $0x78] sm:$0xf] }
  0x38   : > { %v548_v42 = vrot.slane %v546_v34, 5  ;;  %v626_v48 = vunpack.c.l.b16 %v453_v40  ;;  %v552_v49 = vrot.slane %v550_v37, 4  ;;  %v558_v55 = vrot.slane %v556_v38, 5 }
  0x39   : > { %v463_v47 = vsel %vm2802_vm4, %v458_v36, %v462_v27  ;;  %v2913_v52 = vpack.c.b16 %v619_v39, %v618_v25  ;;  %v543_v54 = vor.u32 %v542_v41, %v539_v32  ;;  %v249_v60 = vshrl.u32 %v2903_v1, 16  ;;  %v2950_v41 = vld [vmem:[%s2767_s18 + $0x7c] sm:$0xf] }
  0x3a   : > { %v627_v53 = vunpack.c.l.b16 %v463_v47  ;;  %v553_v56 = vor.u32 %v552_v49, %v548_v42  ;;  %v252_v61 = vshll.u32 %v2903_v1, 16  ;;  %v258_v62 = vshll.u32 %v2906_v44, 16 }
  0x3b   : > { %2456 = vmatmul.msk.bf16.gmra.mxu1 %vm660_vm5, %v2913_v52  ;;  %v544_v6 = vrot.slane %v543_v54, 4  ;;  %v262_v7 = vshrl.u32 %v2906_v44, 16  ;;  %v268_v9 = vshll.u32 %v2911_v50, 16  ;;  %v251_v11 = vrot.slane %v249_v60, 4  ;;  %v2956_v54 = vld [vmem:[%s2767_s18 + $0x80] sm:$0x1] }
  0x3c   : > { %v2923_v3 = vpack.c.b16 %v627_v53, %v626_v48  ;;  %v554_v10 = vrot.slane %v553_v56, 4  ;;  %v254_v12 = vrot.slane %v252_v61, 5  ;;  %v260_v14 = vrot.slane %v258_v62, 5 }
  0x3d   : > { %v549_v16 = vsel %vm2802_vm4, %v544_v6, %v548_v42  ;;  %v264_v17 = vrot.slane %v262_v7, 4  ;;  %v270_v18 = vrot.slane %v268_v9, 5  ;;  %v369_v20 = vshrl.u32 %v2919_v0, 16 }
  0x3e   : > { %2460 = vmatmul.msk.bf16.gmra.mxu2 %vm660_vm5, %v2923_v3  ;;  %v559_v22 = vsel %vm2802_vm4, %v554_v10, %v558_v55  ;;  %v634_v23 = vunpack.c.l.b16 %v549_v16  ;;  %v255_v24 = vor.u32 %v254_v12, %v251_v11  ;;  %v372_v25 = vshll.u32 %v2919_v0, 16  ;;  %v2965_v10 = vld [vmem:[%s2767_s18 + $0xa8] sm:$0xf]  ;;  %v3045_v11 = vld [vmem:[%s2767_s18 + $0x8c] sm:$0x1] }
  0x3f   : > { %v635_v27 = vunpack.c.l.b16 %v559_v22  ;;  %v265_v28 = vor.u32 %v264_v17, %v260_v14  ;;  %v371_v32 = vrot.slane %v369_v20, 4  ;;  %v378_v33 = vshll.u32 %v2928_v15, 16  ;;  %3946 = vst [vmem:[#allocation5_spill] sm:$0xff] %v2965_v10  ;;  %v2971_v17 = vld [vmem:[%s2767_s18 + $0xac] sm:$0xf] }
  0x40   : > { %v256_v34 = vrot.slane %v255_v24, 4  ;;  %v374_v35 = vrot.slane %v372_v25, 5  ;;  %v382_v36 = vshrl.u32 %v2928_v15, 16  ;;  %v388_v37 = vshll.u32 %v2935_v19, 16  ;;  %3947 = vst [vmem:[#allocation6_spill] sm:$0xff] %v2971_v17 }
  0x41   : > { %v2947_v38 = vpack.c.b16 %v635_v27, %v634_v23  ;;  %v266_v39 = vrot.slane %v265_v28, 4  ;;  %v380_v40 = vrot.slane %v378_v33, 5  ;;  %v465_v42 = vshrl.u32 %v2942_v26, 16  ;;  %3952 = vst [vmem:[#allocation11_spill] sm:$0xff] %v3045_v11 }
  0x42   : > { %v261_v47 = vsel %vm2802_vm4, %v256_v34, %v260_v14  ;;  %v375_v48 = vor.u32 %v374_v35, %v371_v32  ;;  %v384_v49 = vrot.slane %v382_v36, 4  ;;  %v390_v53 = vrot.slane %v388_v37, 5  ;;  %v2978_v32 = vld [vmem:[%s2767_s18 + $0xb0] sm:$0x1] }
  0x43   : > { %3945 = vst [vmem:[#allocation4_spill] sm:$0xff] %v2947_v38  ;;  %2464 = vmatmul.msk.bf16.gmra.mxu3 %vm660_vm5, %v2947_v38  ;;  %v271_v55 = vsel %vm2802_vm4, %v266_v39, %v270_v18  ;;  %v610_v56 = vunpack.c.l.b16 %v261_v47  ;;  %v467_v60 = vrot.slane %v465_v42, 4  ;;  %v468_v61 = vshll.u32 %v2942_v26, 16 }
  0x44   : > { %v611_v62 = vunpack.c.l.b16 %v271_v55  ;;  %v376_v6 = vrot.slane %v375_v48, 4  ;;  %v385_v7 = vor.u32 %v384_v49, %v380_v40  ;;  %v474_v9 = vshll.u32 %v2950_v41, 16  ;;  %3948 = vst [vmem:[#allocation7_spill] sm:$0xff] %v2978_v32 }
  0x45   : > { %v470_v12 = vrot.slane %v468_v61, 5  ;;  %v478_v14 = vshrl.u32 %v2950_v41, 16  ;;  %v484_v16 = vshll.u32 %v2956_v54, 16  ;;  %v561_v34 = vshrl.u32 %v2965_v10, 16 }
  0x46   : > { %v2973_v18 = vpack.c.b16 %v611_v62, %v610_v56  ;;  %v381_v20 = vsel %vm2802_vm4, %v376_v6, %v380_v40  ;;  %v386_v22 = vrot.slane %v385_v7, 4  ;;  %v476_v23 = vrot.slane %v474_v9, 5  ;;  %v2990_v56 = vld [vmem:[%s2767_s18 + $0x18] sm:$0xf]  ;;  %v2997_v6 = vld [vmem:[%s2767_s18 + $0x1c] sm:$0xf] }
  0x47   : > { %v620_v24 = vunpack.c.l.b16 %v381_v20  ;;  %v471_v25 = vor.u32 %v470_v12, %v467_v60  ;;  %v480_v27 = vrot.slane %v478_v14, 4  ;;  %v486_v28 = vrot.slane %v484_v16, 5  ;;  %v3001_v16 = vld [vmem:[%s2767_s18 + $0x20] sm:$0x1] }
  0x48   : > { %2452 = vmatmul.msk.bf16.gmra.mxu0 %vm660_vm5, %v2973_v18  ;;  %v391_v33 = vsel %vm2802_vm4, %v386_v22, %v390_v53  ;;  %v564_v35 = vshll.u32 %v2965_v10, 16  ;;  %v570_v36 = vshll.u32 %v2971_v17, 16  ;;  %v574_v42 = vshrl.u32 %v2971_v17, 16  ;;  %v3057_v10 = vld [vmem:[%s2767_s18 + $0xb4] sm:$0xf] }
  0x49   : > { %v621_v37 = vunpack.c.l.b16 %v391_v33  ;;  %v472_v39 = vrot.slane %v471_v25, 4  ;;  %v481_v40 = vor.u32 %v480_v27, %v476_v23  ;;  %v563_v47 = vrot.slane %v561_v34, 4  ;;  %3953 = vst [vmem:[#allocation12_spill] sm:$0xff] %v3057_v10  ;;  %v3072_v17 = vld [vmem:[%s2767_s18 + $0xbc] sm:$0x1] }
  0x4a   : > { %v566_v48 = vrot.slane %v564_v35, 5  ;;  %v572_v49 = vrot.slane %v570_v36, 5  ;;  %v580_v55 = vshll.u32 %v2978_v32, 16  ;;  %v576_v62 = vrot.slane %v574_v42, 4  ;;  %3956 = vst [vmem:[#allocation14_spill] sm:$0xff] %v3072_v17 }
  0x4b   : > { %v2992_v53 = vpack.c.b16 %v621_v37, %v620_v24  ;;  %v477_v60 = vsel %vm2802_vm4, %v472_v39, %v476_v23  ;;  %v482_v61 = vrot.slane %v481_v40, 4  ;;  %v273_v23 = vshrl.u32 %v2990_v56, 16  ;;  %v3013_v40 = vld [vmem:[%s2767_s18 + $0x54] sm:$0xf] }
  0x4c   : > { %v628_v9 = vunpack.c.l.b16 %v477_v60  ;;  %v567_v12 = vor.u32 %v566_v48, %v563_v47  ;;  %v582_v14 = vrot.slane %v580_v55, 5  ;;  %v577_v22 = vor.u32 %v576_v62, %v572_v49  ;;  %v3020_v55 = vld [vmem:[%s2767_s18 + $0x58] sm:$0xf]  ;;  %v3023_v60 = vld [vmem:[%s2767_s18 + $0x5c] sm:$0x1] }
  0x4d   : > { %3949 = vst [vmem:[#allocation8_spill] sm:$0xff] %v2992_v53  ;;  %2457 = vmatmul.msk.bf16.gmra.mxu1 %vm660_vm5, %v2992_v53  ;;  %v487_v20 = vsel %vm2802_vm4, %v482_v61, %v486_v28  ;;  %v276_v24 = vshll.u32 %v2990_v56, 16  ;;  %v282_v33 = vshll.u32 %v2997_v6, 16  ;;  %v286_v34 = vshrl.u32 %v2997_v6, 16 }
  0x4e   : > { %v629_v25 = vunpack.c.l.b16 %v487_v20  ;;  %v568_v27 = vrot.slane %v567_v12, 4  ;;  %v578_v35 = vrot.slane %v577_v22, 4  ;;  %v275_v36 = vrot.slane %v273_v23, 4 }
  0x4f   : > { %v278_v37 = vrot.slane %v276_v24, 5  ;;  %v292_v39 = vshll.u32 %v3001_v16, 16  ;;  %v284_v47 = vrot.slane %v282_v33, 5  ;;  %v288_v48 = vrot.slane %v286_v34, 4  ;;  %v3035_v33 = vld [vmem:[%s2767_s18 + $0x84] sm:$0xf] }
  0x50   : > { %v3015_v28 = vpack.c.b16 %v629_v25, %v628_v9  ;;  %v573_v42 = vsel %vm2802_vm4, %v568_v27, %v572_v49  ;;  %v583_v61 = vsel %vm2802_vm4, %v578_v35, %v582_v14  ;;  %v393_v49 = vshrl.u32 %v3013_v40, 16  ;;  %3950 = vst [vmem:[#allocation9_spill] sm:$0xff] %v3035_v33 }
  0x51   : > { %v636_v62 = vunpack.c.l.b16 %v573_v42  ;;  %v279_v12 = vor.u32 %v278_v37, %v275_v36  ;;  %v294_v20 = vrot.slane %v292_v39, 5  ;;  %v637_v9 = vunpack.c.l.b16 %v583_v61  ;;  %v3040_v39 = vld [vmem:[%s2767_s18 + $0x88] sm:$0xf] }
  0x52   : > { %2461 = vmatmul.msk.bf16.gmra.mxu2 %vm660_vm5, %v3015_v28  ;;  %v289_v22 = vor.u32 %v288_v48, %v284_v47  ;;  %v396_v23 = vshll.u32 %v3013_v40, 16  ;;  %v402_v25 = vshll.u32 %v3020_v55, 16  ;;  %v406_v27 = vshrl.u32 %v3020_v55, 16 }
  0x53   : > { %v280_v24 = vrot.slane %v279_v12, 4  ;;  %v412_v14 = vshll.u32 %v3023_v60, 16  ;;  %v3037_v34 = vpack.c.b16 %v637_v9, %v636_v62  ;;  %v395_v36 = vrot.slane %v393_v49, 4 }
  0x54   : > { %v290_v35 = vrot.slane %v289_v22, 4  ;;  %v398_v37 = vrot.slane %v396_v23, 5  ;;  %v404_v48 = vrot.slane %v402_v25, 5  ;;  %v408_v61 = vrot.slane %v406_v27, 4 }
  0x55   : > { %3951 = vst [vmem:[#allocation10_spill] sm:$0xff] %v3037_v34  ;;  %v285_v42 = vsel %vm2802_vm4, %v280_v24, %v284_v47  ;;  %v414_v12 = vrot.slane %v412_v14, 5  ;;  %2465 = vmatmul.msk.bf16.gmra.mxu3 %vm660_vm5, %v3037_v34  ;;  %v489_v49 = vshrl.u32 %v3035_v33, 16  ;;  %v492_v47 = vshll.u32 %v3035_v33, 16 }
  0x56   : > { %v295_v62 = vsel %vm2802_vm4, %v290_v35, %v294_v20  ;;  %v612_v9 = vunpack.c.l.b16 %v285_v42  ;;  %v399_v22 = vor.u32 %v398_v37, %v395_v36  ;;  %v409_v7 = vor.u32 %v408_v61, %v404_v48  ;;  %v3062_v42 = vld [vmem:[%s2767_s18 + $0xb8] sm:$0xf] }
  0x57   : > { %v613_v23 = vunpack.c.l.b16 %v295_v62  ;;  %v498_v24 = vshll.u32 %v3040_v39, 16  ;;  %v491_v27 = vrot.slane %v489_v49, 4  ;;  %v502_v14 = vshrl.u32 %v3040_v39, 16  ;;  %3954 = vst [vmem:[#allocation13_spill] sm:$0xff] %v3062_v42 }
  0x58   : > { %v400_v25 = vrot.slane %v399_v22, 4  ;;  %v508_v34 = vshll.u32 %v3045_v11, 16  ;;  %v410_v35 = vrot.slane %v409_v7, 4  ;;  %v494_v36 = vrot.slane %v492_v47, 5 }
  0x59   : > { %v3059_v20 = vpack.c.b16 %v613_v23, %v612_v9  ;;  %v500_v37 = vrot.slane %v498_v24, 5  ;;  %v3955_v61 = vunpack.c.l.b16 %v2845_v21  ;;  %v504_v49 = vrot.slane %v502_v14, 4 }
  0x5a   : > { %v405_v22 = vsel %vm2802_vm4, %v400_v25, %v404_v48  ;;  %v510_v32 = vrot.slane %v508_v34, 5  ;;  %v415_v7 = vsel %vm2802_vm4, %v410_v35, %v414_v12  ;;  %v495_v21 = vor.u32 %v494_v36, %v491_v27 }
  0x5b   : > { %v3067_v62 = vpack.c.b16 %v3955_v61, %v3955_v61  ;;  %2453 = vmatmul.msk.bf16.gmra.mxu0 %vm660_vm5, %v3059_v20  ;;  %v622_v9 = vunpack.c.l.b16 %v405_v22  ;;  %v585_v23 = vshrl.u32 %v3057_v10, 16  ;;  %v623_v47 = vunpack.c.l.b16 %v415_v7  ;;  %v3089_v22 = vld [vmem:[%s2767_s18 + $0x28] sm:$0xf] }
  0x5c   : > { %v505_v24 = vor.u32 %v504_v49, %v500_v37  ;;  %v588_v48 = vshll.u32 %v3057_v10, 16  ;;  %v594_v34 = vshll.u32 %v3062_v42, 16  ;;  %v496_v25 = vrot.slane %v495_v21, 4  ;;  %v3095_v10 = vld [vmem:[%s2767_s18 + $0x2c] sm:$0x1] }
  0x5d   : > { %v587_v14 = vrot.slane %v585_v23, 4  ;;  %v598_v61 = vshrl.u32 %v3062_v42, 16  ;;  %v604_v38 = vshll.u32 %v3072_v17, 16  ;;  %v3086_v12 = vpack.c.b16 %v623_v47, %v622_v9 }
  0x5e   : > { %v506_v27 = vrot.slane %v505_v24, 4  ;;  %v590_v35 = vrot.slane %v588_v48, 5  ;;  %v596_v36 = vrot.slane %v594_v34, 5  ;;  %v1677_v49 = vrot.slane %v3067_v62, 2 }
  0x5f   : > { %3957 = vst [vmem:[#allocation15_spill] sm:$0xff] %v3086_v12  ;;  %v501_v7 = vsel %vm2802_vm4, %v496_v25, %v500_v37  ;;  %v600_v21 = vrot.slane %v598_v61, 4  ;;  %v606_v23 = vrot.slane %v604_v38, 5  ;;  %2458 = vmatmul.msk.bf16.gmra.mxu1 %vm660_vm5, %v3086_v12  ;;  %v297_v48 = vshrl.u32 %v3084_v43, 16 }
  0x60   : > { %v511_v9 = vsel %vm2802_vm4, %v506_v27, %v510_v32  ;;  %v630_v47 = vunpack.c.l.b16 %v501_v7  ;;  %v591_v24 = vor.u32 %v590_v35, %v587_v14  ;;  %v300_v62 = vshll.u32 %v3084_v43, 16 }
  0x61   : > { %v631_v34 = vunpack.c.l.b16 %v511_v9  ;;  %v601_v17 = vor.u32 %v600_v21, %v596_v36  ;;  %v306_v37 = vshll.u32 %v3089_v22, 16  ;;  %v299_v38 = vrot.slane %v297_v48, 4  ;;  %v219_v21 = vld [vmem:[%s3898_s1 + $0xc] sm:$0xf] }
  0x62   : > { %v592_v25 = vrot.slane %v591_v24, 4  ;;  %v310_v61 = vshrl.u32 %v3089_v22, 16  ;;  %v316_v42 = vshll.u32 %v3095_v10, 16  ;;  %v302_v32 = vrot.slane %v300_v62, 5  ;;  %v220_v62 = vld [vmem:[%s3898_s1 + $0x10] sm:$0x3] }
  0x63   : > { %v3106_v33 = vpack.c.b16 %v631_v34, %v630_v47  ;;  %v602_v11 = vrot.slane %v601_v17, 4  ;;  %v308_v27 = vrot.slane %v306_v37, 5  ;;  %vm1038_vm6 = vcmask 1042432  }
  0x64   : > { %v597_v14 = vsel %vm2802_vm4, %v592_v25, %v596_v36  ;;  %v312_v35 = vrot.slane %v310_v61, 4  ;;  %v318_v7 = vrot.slane %v316_v42, 5  ;;  %v303_v17 = vor.u32 %v302_v32, %v299_v38 }
  0x65   : > { %3958 = vst [vmem:[#allocation16_spill] sm:$0xff] %v3106_v33  ;;  %2462 = vmatmul.msk.bf16.gmra.mxu2 %vm660_vm5, %v3106_v33  ;;  %v607_v9 = vsel %vm2802_vm4, %v602_v11, %v606_v23  ;;  %v638_v47 = vunpack.c.l.b16 %v597_v14  ;;  %vm1039_vm7 = vcmask 1046532   ;;  %v2547_v42 = vrot.slane %v2818_v58, 9 }
  0x66   : > { %v639_v24 = vunpack.c.l.b16 %v607_v9  ;;  %v313_v48 = vor.u32 %v312_v35, %v308_v27  ;;  %vm3117_vm8 = vmor %vm1038_vm6, %vm1039_vm7  ;;  %v1043_v34 = vrot.slane %v2825_v63, 5  ;;  %v304_v37 = vrot.slane %v303_v17, 4 }
  0x67   : > { %v1814_v11 = vsel %vm709_vm1, %v219_v21, 0  ;;  %v1965_v23 = vunpack.c.l.b16 %v219_v21  ;;  %v1682_v25 = vsel %vm709_vm1, %v1677_v49, 0  ;;  %v2110_v35 = vsel %vm709_vm1, %v220_v62, 0 }
  0x68   : > { %v3128_v38 = vpack.c.b16 %v639_v24, %v638_v47  ;;  %v314_v61 = vrot.slane %v313_v48, 4  ;;  %v1045_v32 = vrot.slane %v1043_v34, 4  ;;  %1823 = vmatpush.bf16.msra.mxu2 %v1814_v11  ;;  %1691 = vmatpush.bf16.msra.mxu1 %v1682_v25  ;;  %v309_v58 = vsel %vm2802_vm4, %v304_v37, %v308_v27 }
  0x69   : > { %v1044_v63 = vsel %vm3117_vm8, %v2547_v42, %v1043_v34  ;;  %v1966_v14 = vpack.c.b16 %v1965_v23, %v1965_v23  ;;  %v614_v21 = vunpack.c.l.b16 %v309_v58  ;;  %v3961_v9 = vrot.slane %v2829_v8, 5  ;;  %2119 = vmatpush.bf16.msra.mxu0 %v2110_v35  ;;  %v2687_v42 = vld [vmem:[%s2767_s18] sm:$0xff] }
  0x6a   : > { %2466 = vmatmul.msk.bf16.gmra.mxu3 %vm660_vm5, %v3128_v38  ;;  %v319_v49 = vsel %vm2802_vm4, %v314_v61, %v318_v7  ;;  %v2548_v27 = vrot.slane %v2903_v1, 9  ;;  %v1050_v48 = vrot.slane %v2906_v44, 5  ;;  %v1153_v34 = vunpack.c.l.b16 %v1044_v63  ;;  %v3169_v63 = vld [vmem:[%s2767_s18 + $0x18] sm:$0xff] }
  0x6b   : > { %v1047_v47 = vsel %vm3117_vm8, %v1045_v32, %v3961_v9  ;;  %v615_v17 = vunpack.c.l.b16 %v319_v49  ;;  %v1967_v24 = vrot.slane %v1966_v14, 2  ;;  %v1053_v62 = vrot.slane %v2911_v50, 5  ;;  %v2688_v32 = vld [vmem:[%s2767_s18 + $0xc] sm:$0xff] }
  0x6c   : > { %v1154_v7 = vunpack.c.l.b16 %v1047_v47  ;;  %v1051_v11 = vsel %vm3117_vm8, %v2548_v27, %v1050_v48  ;;  %v1052_v1 = vrot.slane %v1050_v48, 4  ;;  %v1057_v58 = vrot.slane %v2997_v6, 5  ;;  %v3189_v47 = vld [vmem:[%s2767_s18 + $0x24] sm:$0xff] }
  0x6d   : > { %v3147_v37 = vpack.c.b16 %v615_v17, %v614_v21  ;;  %v1972_v8 = vsel %vm709_vm1, %v1967_v24, 0  ;;  %v1155_v44 = vunpack.c.l.b16 %v1051_v11  ;;  %v2549_v14 = vrot.slane %v2990_v56, 9 }
  0x6e   : > { %1981 = vmatpush.bf16.msra.mxu3 %v1972_v8  ;;  %v1054_v50 = vsel %vm3117_vm8, %v1052_v1, %v1053_v62  ;;  %v1185_v23 = vpack.c.b16 %v1154_v7, %v1153_v34  ;;  %v1059_v35 = vrot.slane %v1057_v58, 4  ;;  %v1060_v49 = vrot.slane %v3001_v16, 5  ;;  %v3211_v7 = vld [vmem:[%s2767_s18 + $0x30] sm:$0xff] }
  0x6f   : > { %2454 = vmatmul.msk.bf16.gmra.mxu0 %vm660_vm5, %v3147_v37  ;;  %2531 = vmatmul.msk.bf16.vlgmr.msrb.gmra.mxu1 %vm660_vm5, %v2687_v42  ;;  %v1156_v25 = vunpack.c.l.b16 %v1054_v50  ;;  %v1064_v16 = vrot.slane %v3089_v22, 5  ;;  %v2550_v27 = vrot.slane %v3084_v43, 9  ;;  %v1067_v24 = vrot.slane %v3095_v10, 5 }
  0x70   : > { %v1061_v6 = vsel %vm3117_vm8, %v1059_v35, %v1060_v49  ;;  %v1071_v10 = vrot.slane %v2785_v4, 5  ;;  %v2551_v8 = vrot.slane %v2781_v2, 9  ;;  %v1074_v1 = vrot.slane %v2788_v5, 5  ;;  %v3239_v35 = vld [vmem:[%s2767_s18 + $0x3c] sm:$0xff] }
  0x71   : > { %v3157_v61 = vpack.c.b16 %v1156_v25, %v1155_v44  ;;  %v1158_v9 = vunpack.c.l.b16 %v1061_v6  ;;  %v1066_v17 = vrot.slane %v1064_v16, 4  ;;  %v1065_v48 = vsel %vm3117_vm8, %v2550_v27, %v1064_v16 }
  0x72   : > { %v1159_v42 = vunpack.c.l.b16 %v1065_v48  ;;  %v1073_v11 = vrot.slane %v1071_v10, 4  ;;  %v1072_v44 = vsel %vm3117_vm8, %v2551_v8, %v1071_v10  ;;  %v2552_v49 = vrot.slane %v2850_v30, 9  ;;  %v3273_v10 = vld [vmem:[%s2767_s18 + $0x48] sm:$0xff] }
  0x73   : > { %v1068_v22 = vsel %vm3117_vm8, %v1066_v17, %v1067_v24  ;;  %v1161_v50 = vunpack.c.l.b16 %v1072_v44  ;;  %v1081_v6 = vrot.slane %v2870_v45, 5  ;;  %3964 = vst [vmem:[#allocation19_spill] sm:$0xff] %v3273_v10  ;;  %v1088_v44 = vrot.slane %v2935_v19, 5 }
  0x74   : > { %v1160_v34 = vunpack.c.l.b16 %v1068_v22  ;;  %v1075_v4 = vsel %vm3117_vm8, %v1073_v11, %v1074_v1  ;;  %v2553_v11 = vrot.slane %v2919_v0, 9  ;;  %vm2234_vm9 = vcmask 261120  }
  0x75   : > { %2563 = vmatmul.msk.bf16.vlgmr.msrb.gmra.mxu2 %vm660_vm5, %v1185_v23  ;;  %v1162_v23 = vunpack.c.l.b16 %v1075_v4  ;;  %vm2305_vm10 = vcmask 253952  }
  0x76   : > { %v3203_v43 = vpack.c.b16 %v1160_v34, %v1159_v42  ;;  %v1085_v42 = vrot.slane %v2928_v15, 5 }
  0x77   : > { %v3231_v5 = vpack.c.b16 %v1162_v23, %v1161_v50 }
  0x78   : > { %v1087_v1 = vrot.slane %v1085_v42, 4  ;;  %v1086_v15 = vsel %vm3117_vm8, %v2553_v11, %v1085_v42  ;;  %v1095_v11 = vrot.slane %v3023_v60, 5 }
  0x7a   : > { %2583 = vmatmul.msk.bf16.vlgmr.msrb.gmra.mxu3 %vm660_vm5, %v2688_v32  ;;  %v1089_v50 = vsel %vm3117_vm8, %v1087_v1, %v1088_v44 }
  0x7f   : > { %2599 = vmatmul.msk.bf16.vlgmr.msrb.gmra.mxu0 %vm660_vm5, %v2973_v18  ;;  %2532 = vmatmul.msk.bf16.gmra.mxu1 %vm660_vm5, %v2688_v32  ;;  %v1058_v18 = vsel %vm3117_vm8, %v2549_v14, %v1057_v58  ;;  %v1078_v14 = vrot.slane %v2853_v31, 5 }
  0x80   : > { %v1157_v21 = vunpack.c.l.b16 %v1058_v18 }
  0x81   : > { %v1080_v18 = vrot.slane %v1078_v14, 4  ;;  %v1079_v31 = vsel %vm3117_vm8, %v2552_v49, %v1078_v14  ;;  %v1165_v14 = vunpack.c.l.b16 %v1086_v15  ;;  %v1166_v49 = vunpack.c.l.b16 %v1089_v50 }
  0x82   : > { %v3183_v56 = vpack.c.b16 %v1158_v9, %v1157_v21  ;;  %v1163_v17 = vunpack.c.l.b16 %v1079_v31 }
  0x83   : > { %v1082_v16 = vsel %vm3117_vm8, %v1080_v18, %v1081_v6  ;;  %v3297_v18 = vpack.c.b16 %v1166_v49, %v1165_v14  ;;  %v1092_v6 = vrot.slane %v3020_v55, 5 }
  0x84   : > { %v1164_v45 = vunpack.c.l.b16 %v1082_v16 }
  0x85   : > { %2564 = vmatmul.msk.bf16.gmra.mxu2 %vm660_vm5, %v3157_v61  ;;  %3967 = vst [vmem:[#allocation22_spill] sm:$0xff] %v3297_v18  ;;  %v1094_v42 = vrot.slane %v1092_v6, 4 }
  0x86   : > { %v3263_v48 = vpack.c.b16 %v1164_v45, %v1163_v17  ;;  %v3307_v17 = vld [vmem:[%s2767_s18 + $0x54] sm:$0xff]  ;;  %v2554_v45 = vrot.slane %v3013_v40, 9 }
  0x87   : > { %3968 = vst [vmem:[#allocation23_spill] sm:$0xff] %v3307_v17  ;;  %v1096_v15 = vsel %vm3117_vm8, %v1094_v42, %v1095_v11 }
  0x88   : > { %v1093_v55 = vsel %vm3117_vm8, %v2554_v45, %v1092_v6  ;;  %v1168_v60 = vunpack.c.l.b16 %v1096_v15  ;;  %v2718_v45 = vld [vmem:[%s2767_s18 + $0x64] sm:$0xf]  ;;  %v2719_v15 = vld [vmem:[%s2767_s18 + $0x68] sm:$0x1] }
  0x89   : > { %v1167_v50 = vunpack.c.l.b16 %v1093_v55  ;;  %v1099_v42 = vrot.slane %v2718_v45, 5 }
  0x8a   : > { %2584 = vmatmul.msk.bf16.gmra.mxu3 %vm660_vm5, %v3169_v63 }
  0x8b   : > { %v3329_v49 = vpack.c.b16 %v1168_v60, %v1167_v50 }
  0x8d   : > { %3970 = vst [vmem:[#allocation25_spill] sm:$0xff] %v3329_v49 }
  0x8f   : > { %2600 = vmatmul.msk.bf16.gmra.mxu0 %vm660_vm5, %v3059_v20  ;;  %2533 = vmatmul.msk.bf16.gmra.mxu1 %vm660_vm5, %v3169_v63 }
  0x95   : > { %2565 = vmatmul.msk.bf16.gmra.mxu2 %vm660_vm5, %v3183_v56 }
  0x9a   : > { %2585 = vmatmul.msk.bf16.gmra.mxu3 %vm660_vm5, %v3189_v47 }
  0x9f   : > { %2601 = vmatmul.msk.bf16.gmra.mxu0 %vm660_vm5, %v3147_v37  ;;  %2534 = vmatmul.msk.bf16.gmra.mxu1 %vm660_vm5, %v3189_v47 }
  0xa3   : > { %v3206_v62 = vpop.f32.mrf.mxu1 }
  0xa5   : > { %2566 = vmatmul.msk.bf16.gmra.mxu2 %vm660_vm5, %v3203_v43 }
  0xaa   : > { %2586 = vmatmul.msk.bf16.gmra.mxu3 %vm660_vm5, %v3211_v7 }
  0xab   : > { %v3223_v32 = vpop.f32.mrf.mxu1 }
  0xac   : > { %v3221_v25 = vpop.f32.mrf.mxu2 }
  0xaf   : > { %2602 = vmatmul.msk.bf16.gmra.mxu0 %vm660_vm5, %v2820_v59  ;;  %2535 = vmatmul.msk.bf16.gmra.mxu1 %vm660_vm5, %v3211_v7 }
  0xb1   : > { %v3229_v2 = vpop.f32.mrf.mxu0 }
  0xb2   : > { %v3233_v58 = vpop.f32.mrf.mxu3 }
  0xb3   : > { %3962 = vst [vmem:[#allocation17_spill] sm:$0xff] %v3233_v58 }
  0xb4   : > { %v3243_v21 = vpop.f32.mrf.mxu2 }
  0xb5   : > { %2567 = vmatmul.msk.bf16.gmra.mxu2 %vm660_vm5, %v3231_v5 }
  0xb8   : > { %v3245_v9 = vpop.f32.mrf.mxu1 }
  0xb9   : > { %v3253_v27 = vpop.f32.mrf.mxu0 }
  0xba   : > { %2587 = vmatmul.msk.bf16.gmra.mxu3 %vm660_vm5, %v3239_v35  ;;  %v3255_v30 = vpop.f32.mrf.mxu3 }
  0xbb   : > { %3963 = vst [vmem:[#allocation18_spill] sm:$0xff] %v3255_v30 }
  0xbf   : > { %2603 = vmatmul.msk.bf16.gmra.mxu0 %vm660_vm5, %v2913_v52  ;;  %2536 = vmatmul.msk.bf16.gmra.mxu1 %vm660_vm5, %v3239_v35 }
  0xc0   : > { %v3261_v24 = vpop.f32.mrf.mxu1 }
  0xc1   : > { %v3265_v22 = vpop.f32.mrf.mxu2 }
  0xc5   : > { %v3268_v34 = vpop.f32.mrf.mxu0  ;;  %2568 = vmatmul.msk.bf16.gmra.mxu2 %vm660_vm5, %v3263_v48 }
  0xc6   : > { %v3275_v8 = vpop.f32.mrf.mxu3 }
  0xc7   : > { %3965 = vst [vmem:[#allocation20_spill] sm:$0xff] %v3275_v8 }
  0xc9   : > { %v3287_v23 = vpop.f32.mrf.mxu2 }
  0xca   : > { %2588 = vmatmul.msk.bf16.gmra.mxu3 %vm660_vm5, %v3273_v10  ;;  %v3281_v4 = vpop.f32.mrf.mxu1 }
  0xcd   : > { %v3289_v0 = vpop.f32.mrf.mxu0 }
  0xce   : > { %v3293_v19 = vpop.f32.mrf.mxu3 }
  0xcf   : > { %2604 = vmatmul.msk.bf16.gmra.mxu0 %vm660_vm5, %v2992_v53  ;;  %3966 = vst [vmem:[#allocation21_spill] sm:$0xff] %v3293_v19  ;;  %2537 = vmatmul.msk.bf16.gmra.mxu1 %vm660_vm5, %v3273_v10  ;;  %v3342_v19 = vld [vmem:[%s2767_s18 + $0x60] sm:$0xff] }
  0xd0   : > { %3972 = vst [vmem:[#allocation27_spill] sm:$0xff] %v3342_v19 }
  0xd2   : > { %v3300_v31 = vpop.f32.mrf.mxu1 }
  0xd5   : > { %2569 = vmatmul.msk.bf16.gmra.mxu2 %vm660_vm5, %v3297_v18  ;;  %v3304_v16 = vpop.f32.mrf.mxu2 }
  0xd8   : > { %v3311_v1 = vpop.f32.mrf.mxu0  ;;  %v3313_v44 = vpop.f32.mrf.mxu3 }
  0xd9   : > { %3969 = vst [vmem:[#allocation24_spill] sm:$0xff] %v3313_v44  ;;  %v1102_v44 = vrot.slane %v2719_v15, 5 }
  0xda   : > { %2589 = vmatmul.msk.bf16.gmra.mxu3 %vm660_vm5, %v3307_v17 }
  0xdc   : > { %v3321_v40 = vpop.f32.mrf.mxu1 }
  0xdd   : > { %v3323_v14 = vpop.f32.mrf.mxu2 }
  0xdf   : > { %2605 = vmatmul.msk.bf16.gmra.mxu0 %vm660_vm5, %v3086_v12  ;;  %2538 = vmatmul.msk.bf16.gmra.mxu1 %vm660_vm5, %v3307_v17  ;;  %v2720_v12 = vld [vmem:[%s2767_s18 + $0x60] sm:$0xf]  ;;  %v1101_v17 = vrot.slane %v1099_v42, 4 }
  0xe0   : > { %v3331_v6 = vpop.f32.mrf.mxu0  ;;  %v3334_v11 = vpop.f32.mrf.mxu3  ;;  %v2555_v8 = vrot.slane %v2720_v12, 9 }
  0xe1   : > { %3971 = vst [vmem:[#allocation26_spill] sm:$0xff] %v3334_v11  ;;  %v1103_v45 = vsel %vm3117_vm8, %v1101_v17, %v1102_v44  ;;  %v1106_v17 = vrot.slane %v2878_v51, 5 }
  0xe2   : > { %v1100_v60 = vsel %vm3117_vm8, %v2555_v8, %v1099_v42  ;;  %v1170_v12 = vunpack.c.l.b16 %v1103_v45 }
  0xe3   : > { %v1169_v30 = vunpack.c.l.b16 %v1100_v60  ;;  %v3375_v60 = vld [vmem:[%s2767_s18 + $0x6c] sm:$0xff] }
  0xe4   : > { %v3338_v55 = vpop.f32.mrf.mxu1 }
  0xe5   : > { %2570 = vmatmul.msk.bf16.gmra.mxu2 %vm660_vm5, %v3329_v49  ;;  %v3364_v8 = vpack.c.b16 %v1170_v12, %v1169_v30  ;;  %v1108_v30 = vrot.slane %v1106_v17, 4 }
  0xe7   : > { %3974 = vst [vmem:[#allocation29_spill] sm:$0xff] %v3364_v8 }
  0xe8   : > { %v3345_v50 = vpop.f32.mrf.mxu2 }
  0xea   : > { %2590 = vmatmul.msk.bf16.gmra.mxu3 %vm660_vm5, %v3342_v19 }
  0xec   : > { %v3353_v11 = vpop.f32.mrf.mxu0  ;;  %v942_v49 = vpop.f32.mrf.mxu1 }
  0xed   : > { %v3355_v15 = vpop.f32.mrf.mxu3  ;;  %v943_v18 = vadd.f32 %v942_v49, %v3229_v2  ;;  %v1109_v49 = vrot.slane %v2885_v57, 5 }
  0xee   : > { %3973 = vst [vmem:[#allocation28_spill] sm:$0xff] %v3355_v15  ;;  %v2556_v15 = vrot.slane %v2873_v46, 9 }
  0xef   : > { %2606 = vmatmul.msk.bf16.gmra.mxu0 %vm660_vm5, %v2835_v13  ;;  %2539 = vmatmul.msk.bf16.gmra.mxu1 %vm660_vm5, %v3342_v19 }
  0xf0   : > { %v3360_v53 = vpop.f32.mrf.mxu2  ;;  %v1107_v51 = vsel %vm3117_vm8, %v2556_v15, %v1106_v17 }
  0xf1   : > { %v1171_v58 = vunpack.c.l.b16 %v1107_v51 }
  0xf4   : > { %v3367_v44 = vpop.f32.mrf.mxu0  ;;  %v944_v2 = vpop.f32.mrf.mxu1 }
  0xf5   : > { %v3369_v42 = vpop.f32.mrf.mxu3  ;;  %2571 = vmatmul.msk.bf16.gmra.mxu2 %vm660_vm5, %v3364_v8  ;;  %v945_v45 = vadd.f32 %v944_v2, %v3253_v27 }
  0xf6   : > { %3975 = vst [vmem:[#allocation30_spill] sm:$0xff] %v3369_v42  ;;  %v1110_v42 = vsel %vm3117_vm8, %v1108_v30, %v1109_v49  ;;  %v1113_v49 = vrot.slane %v2950_v41, 5 }
  0xf7   : > { %v1172_v10 = vunpack.c.l.b16 %v1110_v42  ;;  %v1116_v42 = vrot.slane %v2956_v54, 5 }
  0xf8   : > { %v1261_v12 = vpop.f32.mrf.mxu2 }
  0xf9   : > { %v1341_v13 = vadd.f32 %v1261_v12, %v943_v18  ;;  %v3392_v2 = vpack.c.b16 %v1172_v10, %v1171_v58  ;;  %v3399_v12 = vld [vmem:[%s2767_s18 + $0x78] sm:$0xff] }
  0xfa   : > { %2591 = vmatmul.msk.bf16.gmra.mxu3 %vm660_vm5, %v3375_v60 }
  0xfc   : > { %v1551_v8 = vpop.f32.mrf.mxu0  ;;  %v947_v19 = vpop.f32.mrf.mxu1 }
  0xfd   : > { %v1397_v57 = vpop.f32.mrf.mxu3  ;;  %v948_v46 = vadd.f32 %v947_v19, %v3268_v34 }
  0xfe   : > { %v1477_v27 = vadd.f32 %v1397_v57, %v1341_v13 }
  0xff   : > { %2607 = vmatmul.msk.bf16.gmra.mxu0 %vm660_vm5, %v2923_v3  ;;  %2540 = vmatmul.msk.bf16.gmra.mxu1 %vm660_vm5, %v3375_v60 }
 0x100   : > { %v1263_v18 = vpop.f32.mrf.mxu2  ;;  %v3390_v15 = vadd.f32 %v1551_v8, %v1477_v27  ;;  %v2557_v8 = vrot.slane %v2942_v26, 9 }
 0x101   : > { %v1342_v17 = vadd.f32 %v1263_v18, %v945_v45  ;;  %v1115_v45 = vrot.slane %v1113_v49, 4 }
 0x102   : > { %v1114_v54 = vsel %vm3117_vm8, %v2557_v8, %v1113_v49 }
 0x103   : > { %v1117_v57 = vsel %vm3117_vm8, %v1115_v45, %v1116_v42  ;;  %v3976_v45 = vld [vmem:[#allocation11_spill] sm:$0xff] }
 0x104   : > { %v1553_v30 = vpop.f32.mrf.mxu0  ;;  %v949_v34 = vpop.f32.mrf.mxu1 }
 0x105   : > { %v1399_v13 = vpop.f32.mrf.mxu3  ;;  %2572 = vmatmul.msk.bf16.gmra.mxu2 %vm660_vm5, %v3392_v2  ;;  %v950_v51 = vadd.f32 %v949_v34, %v3289_v0  ;;  %v1173_v0 = vunpack.c.l.b16 %v1114_v54 }
 0x106   : > { %v1478_v19 = vadd.f32 %v1399_v13, %v1342_v17  ;;  %v1174_v13 = vunpack.c.l.b16 %v1117_v57  ;;  %v3425_v57 = vld [vmem:[%s2767_s18 + $0x84] sm:$0xff] }
 0x108   : > { %v1266_v58 = vpop.f32.mrf.mxu2  ;;  %v3403_v10 = vadd.f32 %v1553_v30, %v1478_v19  ;;  %v3418_v42 = vpack.c.b16 %v1174_v13, %v1173_v0  ;;  %v1120_v19 = vrot.slane %v3040_v39, 5 }
 0x109   : > { %v1343_v41 = vadd.f32 %v1266_v58, %v948_v46  ;;  %v1123_v58 = vrot.slane %v3976_v45, 5 }
 0x10a   : > { %2592 = vmatmul.msk.bf16.gmra.mxu3 %vm660_vm5, %v3399_v12 }
 0x10c   : > { %v1556_v27 = vpop.f32.mrf.mxu0  ;;  %v952_v17 = vpop.f32.mrf.mxu1 }
 0x10d   : > { %v1402_v18 = vpop.f32.mrf.mxu3  ;;  %v953_v30 = vadd.f32 %v952_v17, %v3311_v1 }
 0x10e   : > { %v1479_v26 = vadd.f32 %v1402_v18, %v1343_v41 }
 0x10f   : > { %2608 = vmatmul.msk.bf16.gmra.mxu0 %vm660_vm5, %v3015_v28  ;;  %2541 = vmatmul.msk.bf16.gmra.mxu1 %vm660_vm5, %v3399_v12 }
 0x110   : > { %v1268_v46 = vpop.f32.mrf.mxu2  ;;  %v3416_v49 = vadd.f32 %v1556_v27, %v1479_v26  ;;  %v3977_v27 = vld [vmem:[#allocation9_spill] sm:$0xff] }
 0x111   : > { %v1344_v34 = vadd.f32 %v1268_v46, %v950_v51  ;;  %v2558_v17 = vrot.slane %v3977_v27, 9  ;;  %v1122_v51 = vrot.slane %v1120_v19, 4 }
 0x113   : > { %v1121_v26 = vsel %vm3117_vm8, %v2558_v17, %v1120_v19  ;;  %v1124_v46 = vsel %vm3117_vm8, %v1122_v51, %v1123_v58  ;;  %v2721_v17 = vld [vmem:[%s2767_s18 + $0x94] sm:$0xf] }
 0x114   : > { %v1558_v8 = vpop.f32.mrf.mxu0  ;;  %v954_v1 = vpop.f32.mrf.mxu1  ;;  %v1127_v51 = vrot.slane %v2721_v17, 5 }
 0x115   : > { %v1404_v41 = vpop.f32.mrf.mxu3  ;;  %2573 = vmatmul.msk.bf16.gmra.mxu2 %vm660_vm5, %v3418_v42  ;;  %v955_v18 = vadd.f32 %v954_v1, %v3331_v6  ;;  %v1176_v1 = vunpack.c.l.b16 %v1124_v46 }
 0x116   : > { %v1480_v54 = vadd.f32 %v1404_v41, %v1344_v34  ;;  %v1175_v41 = vunpack.c.l.b16 %v1121_v26 }
 0x118   : > { %v1271_v0 = vpop.f32.mrf.mxu2  ;;  %v3429_v13 = vadd.f32 %v1558_v8, %v1480_v54  ;;  %v3444_v54 = vpack.c.b16 %v1176_v1, %v1175_v41 }
 0x119   : > { %v1345_v39 = vadd.f32 %v1271_v0, %v953_v30 }
 0x11a   : > { %3978 = vst [vmem:[#allocation11_spill] sm:$0xff] %v3429_v13  ;;  %2593 = vmatmul.msk.bf16.gmra.mxu3 %vm660_vm5, %v3425_v57 }
 0x11b   : > { %3980 = vst [vmem:[#allocation31_spill] sm:$0xff] %v3444_v54 }
 0x11c   : > { %v1561_v34 = vpop.f32.mrf.mxu0  ;;  %v957_v45 = vpop.f32.mrf.mxu1 }
 0x11d   : > { %v1407_v6 = vpop.f32.mrf.mxu3  ;;  %v958_v8 = vadd.f32 %v957_v45, %v3353_v11  ;;  %v3451_v45 = vld [vmem:[%s2767_s18 + $0x90] sm:$0xff] }
 0x11e   : > { %v1481_v27 = vadd.f32 %v1407_v6, %v1345_v39  ;;  %v2722_v39 = vld [vmem:[%s2767_s18 + $0x98] sm:$0x1]  ;;  %3981 = vst [vmem:[#allocation32_spill] sm:$0xff] %v3451_v45 }
 0x11f   : > { %2609 = vmatmul.msk.bf16.gmra.mxu0 %vm660_vm5, %v3106_v33  ;;  %2542 = vmatmul.msk.bf16.gmra.mxu1 %vm660_vm5, %v3425_v57  ;;  %v1130_v26 = vrot.slane %v2722_v39, 5 }
 0x120   : > { %v1273_v30 = vpop.f32.mrf.mxu2  ;;  %v3442_v19 = vadd.f32 %v1561_v34, %v1481_v27  ;;  %v2723_v34 = vld [vmem:[%s2767_s18 + $0x90] sm:$0xf] }
 0x121   : > { %v1346_v58 = vadd.f32 %v1273_v30, %v955_v18  ;;  %v2559_v27 = vrot.slane %v2723_v34, 9  ;;  %v1129_v18 = vrot.slane %v1127_v51, 4 }
 0x122   : > { %3979 = vst [vmem:[#allocation9_spill] sm:$0xff] %v3442_v19  ;;  %v2726_v19 = vld [vmem:[%s2767_s18 + $0x9c] sm:$0xf] }
 0x123   : > { %v1128_v17 = vsel %vm3117_vm8, %v2559_v27, %v1127_v51  ;;  %v2724_v27 = vld [vmem:[%s2767_s18 + $0xa0] sm:$0xf] }
 0x124   : > { %v1563_v0 = vpop.f32.mrf.mxu0  ;;  %v959_v46 = vpop.f32.mrf.mxu1 }
 0x125   : > { %v1409_v11 = vpop.f32.mrf.mxu3  ;;  %2574 = vmatmul.msk.bf16.gmra.mxu2 %vm660_vm5, %v3444_v54  ;;  %v960_v33 = vadd.f32 %v959_v46, %v3367_v44  ;;  %v1177_v46 = vunpack.c.l.b16 %v1128_v17 }
 0x126   : > { %v1482_v6 = vadd.f32 %v1409_v11, %v1346_v58  ;;  %v1131_v58 = vsel %vm3117_vm8, %v1129_v18, %v1130_v26  ;;  %v1134_v18 = vrot.slane %v2724_v27, 5 }
 0x127   : > { %v1178_v34 = vunpack.c.l.b16 %v1131_v58  ;;  %v2725_v58 = vld [vmem:[%s2767_s18 + $0xa4] sm:$0x1] }
 0x128   : > { %v1276_v41 = vpop.f32.mrf.mxu2  ;;  %v3455_v1 = vadd.f32 %v1563_v0, %v1482_v6  ;;  %v3983_v0 = vld [vmem:[#allocation3_spill] sm:$0xff] }
 0x129   : > { %v1347_v30 = vadd.f32 %v1276_v41, %v958_v8  ;;  %v3469_v26 = vpack.c.b16 %v1178_v34, %v1177_v46 }
 0x12a   : > { %3982 = vst [vmem:[#allocation33_spill] sm:$0xff] %v3455_v1  ;;  %2594 = vmatmul.msk.bf16.gmra.mxu3 %vm660_vm5, %v3451_v45  ;;  %v3476_v1 = vld [vmem:[%s2767_s18 + $0x9c] sm:$0xff] }
 0x12b   : > { %3985 = vst [vmem:[#allocation35_spill] sm:$0xff] %v3469_v26 }
 0x12c   : > { %v1566_v39 = vpop.f32.mrf.mxu0  ;;  %v962_v44 = vpop.f32.mrf.mxu1  ;;  %3986 = vst [vmem:[#allocation36_spill] sm:$0xff] %v3476_v1 }
 0x12d   : > { %v1412_v11 = vpop.f32.mrf.mxu3 }
 0x12e   : > { %v1483_v54 = vadd.f32 %v1412_v11, %v1347_v30  ;;  %v1137_v11 = vrot.slane %v2725_v58, 5 }
 0x12f   : > { %2610 = vmatmul.msk.bf16.gmra.mxu0 %vm660_vm5, %v3983_v0  ;;  %2543 = vmatmul.msk.bf16.gmra.mxu1 %vm660_vm5, %v3451_v45  ;;  %v2560_v45 = vrot.slane %v2726_v19, 9 }
 0x130   : > { %v1278_v8 = vpop.f32.mrf.mxu2  ;;  %v3467_v51 = vadd.f32 %v1566_v39, %v1483_v54  ;;  %v1136_v54 = vrot.slane %v1134_v18, 4 }
 0x131   : > { %v1348_v6 = vadd.f32 %v1278_v8, %v960_v33  ;;  %v963_v33 = vadd.f32 %v962_v44, %v3206_v62  ;;  %v1135_v8 = vsel %vm3117_vm8, %v2560_v45, %v1134_v18  ;;  %v3988_v44 = vld [vmem:[#allocation4_spill] sm:$0xff] }
 0x132   : > { %3984 = vst [vmem:[#allocation34_spill] sm:$0xff] %v3467_v51  ;;  %v1179_v19 = vunpack.c.l.b16 %v1135_v8 }
 0x134   : > { %v1568_v41 = vpop.f32.mrf.mxu0  ;;  %v964_v30 = vpop.f32.mrf.mxu1 }
 0x135   : > { %v1414_v17 = vpop.f32.mrf.mxu3  ;;  %2575 = vmatmul.msk.bf16.gmra.mxu2 %vm660_vm5, %v3469_v26 }
 0x136   : > { %v1484_v0 = vadd.f32 %v1414_v17, %v1348_v6  ;;  %v1138_v6 = vsel %vm3117_vm8, %v1136_v54, %v1137_v11  ;;  %v3991_v54 = vld [vmem:[#allocation6_spill] sm:$0xff] }
 0x137   : > { %v1180_v26 = vunpack.c.l.b16 %v1138_v6  ;;  %v3992_v6 = vld [vmem:[#allocation7_spill] sm:$0xff] }
 0x138   : > { %v1281_v39 = vpop.f32.mrf.mxu2  ;;  %v3480_v46 = vadd.f32 %v1568_v41, %v1484_v0  ;;  %v965_v0 = vadd.f32 %v964_v30, %v3223_v32  ;;  %v3502_v30 = vld [vmem:[%s2767_s18 + $0xa8] sm:$0xff] }
 0x139   : > { %v1349_v34 = vadd.f32 %v1281_v39, %v963_v33  ;;  %v3495_v11 = vpack.c.b16 %v1180_v26, %v1179_v19  ;;  %v1141_v33 = vrot.slane %v3991_v54, 5  ;;  %3993 = vst [vmem:[#allocation6_spill] sm:$0xff] %v3502_v30 }
 0x13a   : > { %3987 = vst [vmem:[#allocation37_spill] sm:$0xff] %v3480_v46  ;;  %2595 = vmatmul.msk.bf16.gmra.mxu3 %vm660_vm5, %v3476_v1 }
 0x13b   : > { %3990 = vst [vmem:[#allocation39_spill] sm:$0xff] %v3495_v11 }
 0x13c   : > { %v1571_v27 = vpop.f32.mrf.mxu0  ;;  %v967_v58 = vpop.f32.mrf.mxu1 }
 0x13d   : > { %v1417_v17 = vpop.f32.mrf.mxu3 }
 0x13e   : > { %v1485_v62 = vadd.f32 %v1417_v17, %v1349_v34  ;;  %v1144_v17 = vrot.slane %v3992_v6, 5 }
 0x13f   : > { %2611 = vmatmul.msk.bf16.gmra.mxu0 %vm660_vm5, %v3988_v44  ;;  %2544 = vmatmul.msk.bf16.gmra.mxu1 %vm660_vm5, %v3476_v1  ;;  %v3994_v44 = vld [vmem:[#allocation5_spill] sm:$0xff] }
 0x140   : > { %v1283_v41 = vpop.f32.mrf.mxu2  ;;  %v3493_v45 = vadd.f32 %v1571_v27, %v1485_v62  ;;  %v2561_v46 = vrot.slane %v3994_v44, 9  ;;  %v1143_v27 = vrot.slane %v1141_v33, 4  ;;  %v968_v62 = vadd.f32 %v967_v58, %v3245_v9 }
 0x141   : > { %v1350_v18 = vadd.f32 %v1283_v41, %v965_v0 }
 0x142   : > { %3989 = vst [vmem:[#allocation38_spill] sm:$0xff] %v3493_v45  ;;  %v1142_v41 = vsel %vm3117_vm8, %v2561_v46, %v1141_v33  ;;  %v3520_v46 = vld [vmem:[%s2767_s18 + $0xc0] sm:$0xf] }
 0x143   : > { %v1181_v6 = vunpack.c.l.b16 %v1142_v41  ;;  %3997 = vst [vmem:[#allocation5_spill] sm:$0xff] %v3520_v46  ;;  %v1510_v41 = vshrl.u32 %v3520_v46, 16 }
 0x144   : > { %v1573_v39 = vpop.f32.mrf.mxu0  ;;  %v969_v34 = vpop.f32.mrf.mxu1 }
 0x145   : > { %v1419_v8 = vpop.f32.mrf.mxu3  ;;  %2576 = vmatmul.msk.bf16.gmra.mxu2 %vm660_vm5, %v3495_v11  ;;  %v3996_v11 = vld [vmem:[#allocation10_spill] sm:$0xff] }
 0x146   : > { %v1486_v32 = vadd.f32 %v1419_v8, %v1350_v18  ;;  %v1145_v18 = vsel %vm3117_vm8, %v1143_v27, %v1144_v17 }
 0x147   : > { %v1182_v9 = vunpack.c.l.b16 %v1145_v18 }
 0x148   : > { %v1286_v26 = vpop.f32.mrf.mxu2  ;;  %v3506_v19 = vadd.f32 %v1573_v39, %v1486_v32  ;;  %v970_v39 = vadd.f32 %v969_v34, %v3261_v24  ;;  %v1513_v24 = vshll.u32 %v3520_v46, 16 }
 0x149   : > { %v1351_v0 = vadd.f32 %v1286_v26, %v968_v62  ;;  %v3524_v27 = vpack.c.b16 %v1182_v9, %v1181_v6  ;;  %v3527_v62 = vld [vmem:[%s2767_s18 + $0xc4] sm:$0xf]  ;;  %v4001_v26 = vld [vmem:[#allocation13_spill] sm:$0xff] }
 0x14a   : > { %3995 = vst [vmem:[#allocation7_spill] sm:$0xff] %v3506_v19  ;;  %2596 = vmatmul.msk.bf16.gmra.mxu3 %vm660_vm5, %v3502_v30  ;;  %v1519_v34 = vshll.u32 %v3527_v62, 16  ;;  %v4002_v6 = vld [vmem:[#allocation14_spill] sm:$0xff]  ;;  %v1512_v19 = vrot.slane %v1510_v41, 4  ;;  %v1515_v45 = vrot.slane %v1513_v24, 5 }
 0x14b   : > { %3999 = vst [vmem:[#allocation41_spill] sm:$0xff] %v3524_v27  ;;  %v1151_v9 = vrot.slane %v4002_v6, 5 }
 0x14c   : > { %v1576_v54 = vpop.f32.mrf.mxu0  ;;  %v972_v8 = vpop.f32.mrf.mxu1  ;;  %4000 = vst [vmem:[#allocation42_spill] sm:$0xff] %v3527_v62 }
 0x14d   : > { %v1422_v44 = vpop.f32.mrf.mxu3  ;;  %v973_v46 = vadd.f32 %v972_v8, %v3281_v4  ;;  %v1516_v8 = vor.u32 %v1515_v45, %v1512_v19 }
 0x14e   : > { %v1487_v58 = vadd.f32 %v1422_v44, %v1351_v0  ;;  %v1148_v0 = vrot.slane %v4001_v26, 5  ;;  %v1523_v44 = vshrl.u32 %v3527_v62, 16  ;;  %v1521_v62 = vrot.slane %v1519_v34, 5 }
 0x14f   : > { %2612 = vmatmul.msk.bf16.gmra.mxu0 %vm660_vm5, %v3996_v11  ;;  %2545 = vmatmul.msk.bf16.gmra.mxu1 %vm660_vm5, %v3502_v30 }
 0x150   : > { %v1288_v32 = vpop.f32.mrf.mxu2  ;;  %v3522_v33 = vadd.f32 %v1576_v54, %v1487_v58  ;;  %v1525_v1 = vrot.slane %v1523_v44, 4 }
 0x151   : > { %v1352_v17 = vadd.f32 %v1288_v32, %v970_v39  ;;  %v3538_v39 = vld [vmem:[%s2767_s18 + $0xb4] sm:$0xff] }
 0x152   : > { %3998 = vst [vmem:[#allocation40_spill] sm:$0xff] %v3522_v33  ;;  %v4003_v32 = vld [vmem:[#allocation12_spill] sm:$0xff]  ;;  %v1150_v33 = vrot.slane %v1148_v0, 4  ;;  %v1526_v41 = vor.u32 %v1525_v1, %v1521_v62 }
 0x153   : > { %v2562_v26 = vrot.slane %v4003_v32, 9 }
 0x154   : > { %v1578_v18 = vpop.f32.mrf.mxu0  ;;  %v974_v54 = vpop.f32.mrf.mxu1  ;;  %v1527_v45 = vrot.slane %v1526_v41, 4 }
 0x155   : > { %v1424_v11 = vpop.f32.mrf.mxu3  ;;  %2577 = vmatmul.msk.bf16.gmra.mxu2 %vm660_vm5, %v3524_v27  ;;  %v3545_v27 = vld [vmem:[%s2767_s18 + $0xc8] sm:$0x1]  ;;  %v975_v6 = vadd.f32 %v974_v54, %v3300_v31 }
 0x156   : > { %v1488_v58 = vadd.f32 %v1424_v11, %v1352_v17  ;;  %v1149_v11 = vsel %vm3117_vm8, %v2562_v26, %v1148_v0  ;;  %v1152_v17 = vsel %vm3117_vm8, %v1150_v33, %v1151_v9  ;;  %v1529_v24 = vshll.u32 %v3545_v27, 16 }
 0x157   : > { %v1183_v44 = vunpack.c.l.b16 %v1149_v11  ;;  %v1517_v33 = vrot.slane %v1516_v8, 4 }
 0x158   : > { %v1291_v30 = vpop.f32.mrf.mxu2  ;;  %v3542_v51 = vadd.f32 %v1578_v18, %v1488_v58  ;;  %v1531_v1 = vrot.slane %v1529_v24, 5 }
 0x159   : > { %v1353_v13 = vadd.f32 %v1291_v30, %v973_v46  ;;  %v1184_v30 = vunpack.c.l.b16 %v1152_v17  ;;  %v3570_v17 = vld [vmem:[%s2767_s18 + $0xc0] sm:$0xff] }
 0x15a   : > { %2597 = vmatmul.msk.bf16.gmra.mxu3 %vm660_vm5, %v3538_v39  ;;  %v1532_v31 = vsel %vm2802_vm4, %v1527_v45, %v1531_v1 }
 0x15b   : > { %v3561_v58 = vpack.c.b16 %v1184_v30, %v1183_v44  ;;  %v1534_v41 = vunpack.c.l.b16 %v1532_v31 }
 0x15c   : > { %v1581_v4 = vpop.f32.mrf.mxu0  ;;  %v977_v18 = vpop.f32.mrf.mxu1 }
 0x15d   : > { %v1427_v34 = vpop.f32.mrf.mxu3 }
 0x15e   : > { %v1489_v46 = vadd.f32 %v1427_v34, %v1353_v13  ;;  %v1522_v13 = vsel %vm2802_vm4, %v1517_v33, %v1521_v62 }
 0x15f   : > { %2613 = vmatmul.msk.bf16.gmra.mxu0 %vm660_vm5, %v3128_v38  ;;  %2546 = vmatmul.msk.bf16.gmra.mxu1 %vm660_vm5, %v3538_v39  ;;  %v1533_v8 = vunpack.c.l.b16 %v1522_v13 }
 0x160   : > { %v1293_v0 = vpop.f32.mrf.mxu2  ;;  %v3559_v19 = vadd.f32 %v1581_v4, %v1489_v46  ;;  %v978_v4 = vadd.f32 %v977_v18, %v3321_v40 }
 0x161   : > { %v1354_v9 = vadd.f32 %v1293_v0, %v975_v6  ;;  %v3577_v62 = vpack.c.b16 %v1534_v41, %v1533_v8 }
 0x164   : > { %v1583_v32 = vpop.f32.mrf.mxu0  ;;  %v979_v26 = vpop.f32.mrf.mxu1 }
 0x165   : > { %v1429_v54 = vpop.f32.mrf.mxu3  ;;  %2578 = vmatmul.msk.bf16.gmra.mxu2 %vm660_vm5, %v3561_v58  ;;  %v980_v40 = vadd.f32 %v979_v26, %v3338_v55 }
 0x166   : > { %v1490_v11 = vadd.f32 %v1429_v54, %v1354_v9 }
 0x168   : > { %v1296_v24 = vpop.f32.mrf.mxu2  ;;  %v3573_v34 = vadd.f32 %v1583_v32, %v1490_v11 }
 0x169   : > { %v1355_v44 = vadd.f32 %v1296_v24, %v978_v4 }
 0x16a   : > { %2598 = vmatmul.msk.bf16.gmra.mxu3 %vm660_vm5, %v3570_v17 }
 0x16c   : > { %v1586_v30 = vpop.f32.mrf.mxu0  ;;  %v982_v6 = vpop.f32.mrf.mxu1 }
 0x16d   : > { %v1432_v46 = vpop.f32.mrf.mxu3  ;;  %v983_v31 = vadd.f32 %v982_v6, %v3221_v25 }
 0x16e   : > { %v1491_v0 = vadd.f32 %v1432_v46, %v1355_v44 }
 0x16f   : > { %2614 = vmatmul.msk.bf16.gmra.mxu0 %vm660_vm5, %v3577_v62  ;;  %2616 = vmatmul.msk.bf16.vlgmr.msra.gmra.mxu1 %vm660_vm5, %v3157_v61 }
 0x170   : > { %v1298_v18 = vpop.f32.mrf.mxu2  ;;  %v3584_v33 = vadd.f32 %v1586_v30, %v1491_v0 }
 0x171   : > { %v1356_v45 = vadd.f32 %v1298_v18, %v980_v40 }
 0x174   : > { %v1588_v1 = vpop.f32.mrf.mxu0  ;;  %v984_v32 = vpop.f32.mrf.mxu1 }
 0x175   : > { %v1434_v9 = vpop.f32.mrf.mxu3  ;;  %2636 = vmatmul.msk.bf16.vlgmr.msra.gmra.mxu2 %vm660_vm5, %v3169_v63  ;;  %v985_v63 = vadd.f32 %v984_v32, %v3243_v21 }
 0x176   : > { %v1492_v13 = vadd.f32 %v1434_v9, %v1356_v45 }
 0x178   : > { %v1301_v54 = vpop.f32.mrf.mxu2  ;;  %v3589_v11 = vadd.f32 %v1588_v1, %v1492_v13 }
 0x179   : > { %v1357_v55 = vadd.f32 %v1301_v54, %v983_v31 }
 0x17a   : > { %2652 = vmatmul.msk.bf16.vlgmr.msra.gmra.mxu3 %vm660_vm5, %v3059_v20 }
 0x17c   : > { %v1591_v61 = vpop.f32.mrf.mxu0  ;;  %v987_v4 = vpop.f32.mrf.mxu1 }
 0x17d   : > { %v1437_v26 = vpop.f32.mrf.mxu3  ;;  %v988_v6 = vadd.f32 %v987_v4, %v3265_v22 }
 0x17e   : > { %v1493_v8 = vadd.f32 %v1437_v26, %v1357_v55 }
 0x17f   : > { %2669 = vmatmul.msk.bf16.vlgmr.msra.gmra.mxu0 %vm660_vm5, %v3183_v56  ;;  %2617 = vmatmul.msk.bf16.gmra.mxu1 %vm660_vm5, %v3183_v56 }
 0x180   : > { %v1303_v41 = vpop.f32.mrf.mxu2  ;;  %v3598_v25 = vadd.f32 %v1591_v61, %v1493_v8 }
 0x181   : > { %v1358_v24 = vadd.f32 %v1303_v41, %v985_v63 }
 0x184   : > { %v1593_v44 = vpop.f32.mrf.mxu0  ;;  %v989_v20 = vpop.f32.mrf.mxu1 }
 0x185   : > { %v1439_v30 = vpop.f32.mrf.mxu3  ;;  %2637 = vmatmul.msk.bf16.gmra.mxu2 %vm660_vm5, %v3189_v47  ;;  %v990_v47 = vadd.f32 %v989_v20, %v3287_v23 }
 0x186   : > { %v1494_v46 = vadd.f32 %v1439_v30, %v1358_v24 }
 0x188   : > { %v1306_v0 = vpop.f32.mrf.mxu2  ;;  %v3603_v40 = vadd.f32 %v1593_v44, %v1494_v46 }
 0x189   : > { %v1359_v21 = vadd.f32 %v1306_v0, %v988_v6 }
 0x18a   : > { %2653 = vmatmul.msk.bf16.gmra.mxu3 %vm660_vm5, %v3147_v37 }
 0x18c   : > { %v1596_v56 = vpop.f32.mrf.mxu0  ;;  %v992_v45 = vpop.f32.mrf.mxu1 }
 0x18d   : > { %v1442_v18 = vpop.f32.mrf.mxu3  ;;  %v993_v55 = vadd.f32 %v992_v45, %v3304_v16 }
 0x18e   : > { %v1495_v1 = vadd.f32 %v1442_v18, %v1359_v21 }
 0x18f   : > { %2670 = vmatmul.msk.bf16.gmra.mxu0 %vm660_vm5, %v3203_v43  ;;  %2618 = vmatmul.msk.bf16.gmra.mxu1 %vm660_vm5, %v3203_v43 }
 0x190   : > { %v1308_v9 = vpop.f32.mrf.mxu2  ;;  %v3612_v22 = vadd.f32 %v1596_v56, %v1495_v1 }
 0x191   : > { %v1360_v32 = vadd.f32 %v1308_v9, %v990_v47 }
 0x194   : > { %v1598_v13 = vpop.f32.mrf.mxu0  ;;  %v994_v37 = vpop.f32.mrf.mxu1 }
 0x195   : > { %v1444_v31 = vpop.f32.mrf.mxu3  ;;  %2638 = vmatmul.msk.bf16.gmra.mxu2 %vm660_vm5, %v3211_v7  ;;  %v995_v7 = vadd.f32 %v994_v37, %v3323_v14 }
 0x196   : > { %v1496_v54 = vadd.f32 %v1444_v31, %v1360_v32  ;;  %v4004_v32 = vld [vmem:[#allocation19_spill] sm:$0xff]  ;;  %v4005_v31 = vld [vmem:[#allocation17_spill] sm:$0xff] }
 0x198   : > { %v1311_v61 = vpop.f32.mrf.mxu2  ;;  %v3617_v26 = vadd.f32 %v1598_v13, %v1496_v54 }
 0x199   : > { %v1361_v23 = vadd.f32 %v1311_v61, %v993_v55  ;;  %v4006_v61 = vld [vmem:[#allocation8_spill] sm:$0xff] }
 0x19a   : > { %2654 = vmatmul.msk.bf16.gmra.mxu3 %vm660_vm5, %v2820_v59 }
 0x19c   : > { %v1601_v43 = vpop.f32.mrf.mxu0  ;;  %v997_v8 = vpop.f32.mrf.mxu1 }
 0x19d   : > { %v1447_v4 = vpop.f32.mrf.mxu3  ;;  %v998_v46 = vadd.f32 %v997_v8, %v3345_v50  ;;  %v4007_v8 = vld [vmem:[#allocation22_spill] sm:$0xff] }
 0x19e   : > { %v1497_v63 = vadd.f32 %v1447_v4, %v1361_v23 }
 0x19f   : > { %2671 = vmatmul.msk.bf16.gmra.mxu0 %vm660_vm5, %v3231_v5  ;;  %2619 = vmatmul.msk.bf16.gmra.mxu1 %vm660_vm5, %v3231_v5 }
 0x1a0   : > { %v1313_v41 = vpop.f32.mrf.mxu2  ;;  %v3626_v16 = vadd.f32 %v1601_v43, %v1497_v63  ;;  %v4008_v63 = vld [vmem:[#allocation18_spill] sm:$0xff] }
 0x1a1   : > { %v1362_v24 = vadd.f32 %v1313_v41, %v995_v7 }
 0x1a4   : > { %v1603_v44 = vpop.f32.mrf.mxu0  ;;  %v999_v59 = vpop.f32.mrf.mxu1 }
 0x1a5   : > { %v1449_v30 = vpop.f32.mrf.mxu3  ;;  %2639 = vmatmul.msk.bf16.gmra.mxu2 %vm660_vm5, %v3239_v35  ;;  %v1000_v35 = vadd.f32 %v999_v59, %v3360_v53 }
 0x1a6   : > { %v1498_v20 = vadd.f32 %v1449_v30, %v1362_v24 }
 0x1a8   : > { %v1316_v6 = vpop.f32.mrf.mxu2  ;;  %v3631_v0 = vadd.f32 %v1603_v44, %v1498_v20  ;;  %v4009_v20 = vld [vmem:[#allocation23_spill] sm:$0xff] }
 0x1a9   : > { %v1363_v14 = vadd.f32 %v1316_v6, %v998_v46 }
 0x1aa   : > { %2655 = vmatmul.msk.bf16.gmra.mxu3 %vm660_vm5, %v2913_v52 }
 0x1ac   : > { %v1606_v5 = vpop.f32.mrf.mxu0  ;;  %v1002_v56 = vpop.f32.mrf.mxu1 }
 0x1ad   : > { %v1452_v21 = vpop.f32.mrf.mxu3  ;;  %v1003_v37 = vadd.f32 %v1002_v56, %v4005_v31 }
 0x1ae   : > { %v1499_v18 = vadd.f32 %v1452_v21, %v1363_v14  ;;  %v4010_v14 = vld [vmem:[#allocation20_spill] sm:$0xff] }
 0x1af   : > { %2672 = vmatmul.msk.bf16.gmra.mxu0 %vm660_vm5, %v3263_v48  ;;  %2620 = vmatmul.msk.bf16.gmra.mxu1 %vm660_vm5, %v3263_v48 }
 0x1b0   : > { %v1318_v45 = vpop.f32.mrf.mxu2  ;;  %v3640_v50 = vadd.f32 %v1606_v5, %v1499_v18 }
 0x1b1   : > { %v1364_v1 = vadd.f32 %v1318_v45, %v1000_v35  ;;  %v4011_v35 = vld [vmem:[#allocation15_spill] sm:$0xff] }
 0x1b4   : > { %v1608_v47 = vpop.f32.mrf.mxu0  ;;  %v1004_v52 = vpop.f32.mrf.mxu1 }
 0x1b5   : > { %v1454_v9 = vpop.f32.mrf.mxu3  ;;  %2640 = vmatmul.msk.bf16.gmra.mxu2 %vm660_vm5, %v4004_v32  ;;  %v1005_v7 = vadd.f32 %v1004_v52, %v4008_v63  ;;  %v4012_v32 = vld [vmem:[#allocation25_spill] sm:$0xff] }
 0x1b6   : > { %v1500_v13 = vadd.f32 %v1454_v9, %v1364_v1  ;;  %v4013_v52 = vld [vmem:[#allocation21_spill] sm:$0xff] }
 0x1b8   : > { %v1321_v54 = vpop.f32.mrf.mxu2  ;;  %v3645_v55 = vadd.f32 %v1608_v47, %v1500_v13 }
 0x1b9   : > { %v1365_v53 = vadd.f32 %v1321_v54, %v1003_v37 }
 0x1ba   : > { %2656 = vmatmul.msk.bf16.gmra.mxu3 %vm660_vm5, %v4006_v61 }
 0x1bc   : > { %v1611_v48 = vpop.f32.mrf.mxu0  ;;  %v1007_v43 = vpop.f32.mrf.mxu1 }
 0x1bd   : > { %v1457_v23 = vpop.f32.mrf.mxu3  ;;  %v1008_v5 = vadd.f32 %v1007_v43, %v4010_v14  ;;  %v4018_v14 = vld [vmem:[#allocation26_spill] sm:$0xff] }
 0x1be   : > { %v1501_v4 = vadd.f32 %v1457_v23, %v1365_v53 }
 0x1bf   : > { %2673 = vmatmul.msk.bf16.gmra.mxu0 %vm660_vm5, %v4007_v8  ;;  %2621 = vmatmul.msk.bf16.gmra.mxu1 %vm660_vm5, %v4007_v8 }
 0x1c0   : > { %v1323_v41 = vpop.f32.mrf.mxu2  ;;  %v3654_v24 = vadd.f32 %v1611_v48, %v1501_v4  ;;  %v4014_v48 = vld [vmem:[#allocation27_spill] sm:$0xff]  ;;  %v4015_v4 = vld [vmem:[#allocation24_spill] sm:$0xff] }
 0x1c1   : > { %v1366_v44 = vadd.f32 %v1323_v41, %v1005_v7 }
 0x1c4   : > { %v1613_v30 = vpop.f32.mrf.mxu0  ;;  %v1009_v46 = vpop.f32.mrf.mxu1 }
 0x1c5   : > { %v1459_v59 = vpop.f32.mrf.mxu3  ;;  %2641 = vmatmul.msk.bf16.gmra.mxu2 %vm660_vm5, %v4009_v20  ;;  %v1010_v13 = vadd.f32 %v1009_v46, %v4013_v52 }
 0x1c6   : > { %v1502_v6 = vadd.f32 %v1459_v59, %v1366_v44  ;;  %v4016_v44 = vld [vmem:[#allocation2_spill] sm:$0xff] }
 0x1c8   : > { %v1326_v21 = vpop.f32.mrf.mxu2  ;;  %v3659_v56 = vadd.f32 %v1613_v30, %v1502_v6  ;;  %v4017_v6 = vld [vmem:[#allocation29_spill] sm:$0xff] }
 0x1c9   : > { %v1367_v18 = vadd.f32 %v1326_v21, %v1008_v5 }
 0x1ca   : > { %2657 = vmatmul.msk.bf16.gmra.mxu3 %vm660_vm5, %v4011_v35 }
 0x1cc   : > { %v1616_v45 = vpop.f32.mrf.mxu0  ;;  %v1012_v47 = vpop.f32.mrf.mxu1 }
 0x1cd   : > { %v1462_v1 = vpop.f32.mrf.mxu3  ;;  %v1013_v8 = vadd.f32 %v1012_v47, %v4015_v4 }
 0x1ce   : > { %v1503_v9 = vadd.f32 %v1462_v1, %v1367_v18 }
 0x1cf   : > { %2674 = vmatmul.msk.bf16.gmra.mxu0 %vm660_vm5, %v4012_v32  ;;  %2622 = vmatmul.msk.bf16.gmra.mxu1 %vm660_vm5, %v4012_v32  ;;  %v4019_v32 = vld [vmem:[#allocation28_spill] sm:$0xff] }
 0x1d0   : > { %v1328_v31 = vpop.f32.mrf.mxu2  ;;  %v3668_v37 = vadd.f32 %v1616_v45, %v1503_v9 }
 0x1d1   : > { %v1368_v54 = vadd.f32 %v1328_v31, %v1010_v13 }
 0x1d4   : > { %v1618_v53 = vpop.f32.mrf.mxu0  ;;  %v1014_v23 = vpop.f32.mrf.mxu1 }
 0x1d5   : > { %v1464_v61 = vpop.f32.mrf.mxu3  ;;  %2642 = vmatmul.msk.bf16.gmra.mxu2 %vm660_vm5, %v4014_v48  ;;  %v1015_v5 = vadd.f32 %v1014_v23, %v4018_v14 }
 0x1d6   : > { %v1504_v43 = vadd.f32 %v1464_v61, %v1368_v54 }
 0x1d8   : > { %v1331_v63 = vpop.f32.mrf.mxu2  ;;  %v3673_v7 = vadd.f32 %v1618_v53, %v1504_v43 }
 0x1d9   : > { %v1369_v41 = vadd.f32 %v1331_v63, %v1013_v8 }
 0x1da   : > { %2658 = vmatmul.msk.bf16.gmra.mxu3 %vm660_vm5, %v4016_v44 }
 0x1dc   : > { %v1621_v30 = vpop.f32.mrf.mxu0  ;;  %v1017_v20 = vpop.f32.mrf.mxu1 }
 0x1dd   : > { %v1467_v59 = vpop.f32.mrf.mxu3  ;;  %v1018_v52 = vadd.f32 %v1017_v20, %v4019_v32  ;;  %v4021_v32 = vld [vmem:[#allocation11_spill] sm:$0xff] }
 0x1de   : > { %v1505_v46 = vadd.f32 %v1467_v59, %v1369_v41 }
 0x1df   : > { %2675 = vmatmul.msk.bf16.gmra.mxu0 %vm660_vm5, %v4017_v6  ;;  %2623 = vmatmul.msk.bf16.gmra.mxu1 %vm660_vm5, %v4017_v6 }
 0x1e0   : > { %v1333_v21 = vpop.f32.mrf.mxu2  ;;  %v3682_v18 = vadd.f32 %v1621_v30, %v1505_v46 }
 0x1e1   : > { %v1370_v35 = vadd.f32 %v1333_v21, %v1015_v5 }
 0x1e4   : > { %v1623_v45 = vpop.f32.mrf.mxu0  ;;  %v1019_v47 = vpop.f32.mrf.mxu1 }
 0x1e5   : > { %v1469_v1 = vpop.f32.mrf.mxu3  ;;  %2643 = vmatmul.msk.bf16.gmra.mxu2 %vm660_vm5, %v3375_v60  ;;  %v4020_v60 = vld [vmem:[#allocation30_spill] sm:$0xff] }
 0x1e6   : > { %v1506_v9 = vadd.f32 %v1469_v1, %v1370_v35  ;;  %v1020_v4 = vadd.f32 %v1019_v47, %v4020_v60 }
 0x1e8   : > { %v1336_v13 = vpop.f32.mrf.mxu2  ;;  %v3687_v31 = vadd.f32 %v1623_v45, %v1506_v9 }
 0x1e9   : > { %v1371_v54 = vadd.f32 %v1336_v13, %v1018_v52 }
 0x1ea   : > { %2659 = vmatmul.msk.bf16.gmra.mxu3 %vm660_vm5, %v2923_v3 }
 0x1ec   : > { %v1626_v53 = vpop.f32.mrf.mxu0  ;;  %v1693_v48 = vpop.f32.mrf.mxu1 }
 0x1ed   : > { %v1472_v61 = vpop.f32.mrf.mxu3  ;;  %v1773_v43 = vadd.f32 %v1693_v48, %v3390_v15 }
 0x1ee   : > { %v1507_v23 = vadd.f32 %v1472_v61, %v1371_v54 }
 0x1ef   : > { %2676 = vmatmul.msk.bf16.gmra.mxu0 %vm660_vm5, %v3392_v2  ;;  %2624 = vmatmul.msk.bf16.gmra.mxu1 %vm660_vm5, %v3392_v2 }
 0x1f0   : > { %v1338_v8 = vpop.f32.mrf.mxu2  ;;  %v3697_v63 = vadd.f32 %v1626_v53, %v1507_v23  ;;  %v4022_v23 = vld [vmem:[#allocation16_spill] sm:$0xff] }
 0x1f1   : > { %v1372_v41 = vadd.f32 %v1338_v8, %v1020_v4 }
 0x1f4   : > { %v1628_v44 = vpop.f32.mrf.mxu0  ;;  %v1695_v30 = vpop.f32.mrf.mxu1 }
 0x1f5   : > { %v1474_v3 = vpop.f32.mrf.mxu3  ;;  %2644 = vmatmul.msk.bf16.gmra.mxu2 %vm660_vm5, %v3399_v12  ;;  %v1774_v15 = vadd.f32 %v1695_v30, %v3403_v10  ;;  %v4023_v30 = vld [vmem:[#allocation9_spill] sm:$0xff] }
 0x1f6   : > { %v1508_v59 = vadd.f32 %v1474_v3, %v1372_v41 }
 0x1f8   : > { %v1825_v20 = vpop.f32.mrf.mxu2  ;;  %v3702_v46 = vadd.f32 %v1628_v44, %v1508_v59 }
 0x1f9   : > { %v1905_v6 = vadd.f32 %v1825_v20, %v1773_v43 }
 0x1fa   : > { %2660 = vmatmul.msk.bf16.gmra.mxu3 %vm660_vm5, %v3015_v28 }
 0x1fc   : > { %v2121_v2 = vpop.f32.mrf.mxu0  ;;  %v1698_v5 = vpop.f32.mrf.mxu1 }
 0x1fd   : > { %v1983_v14 = vpop.f32.mrf.mxu3  ;;  %v1775_v35 = vadd.f32 %v1698_v5, %v3416_v49 }
 0x1fe   : > { %v2063_v21 = vadd.f32 %v1983_v14, %v1905_v6 }
 0x1ff   : > { %2677 = vmatmul.msk.bf16.gmra.mxu0 %vm660_vm5, %v3418_v42  ;;  %2625 = vmatmul.msk.bf16.gmra.mxu1 %vm660_vm5, %v3418_v42 }
 0x200   : > { %v2201_v12 = vadd.f32 %v2121_v2, %v2063_v21  ;;  %v1827_v45 = vpop.f32.mrf.mxu2 }
 0x201   : > { %v1906_v10 = vadd.f32 %v1827_v45, %v1774_v15  ;;  %v4024_v15 = vld [vmem:[#allocation31_spill] sm:$0xff] }
 0x202   : > { %v2308_v49 = vmul.f32 %v2201_v12, %v2201_v12  ;;  %v2235_v61 = vsel %vm2234_vm9, %v2201_v12, 0.0 }
 0x204   : > { %v2123_v1 = vpop.f32.mrf.mxu0  ;;  %v1700_v28 = vpop.f32.mrf.mxu1 }
 0x205   : > { %v1985_v47 = vpop.f32.mrf.mxu3  ;;  %2645 = vmatmul.msk.bf16.gmra.mxu2 %vm660_vm5, %v3425_v57  ;;  %v1776_v52 = vadd.f32 %v1700_v28, %v4021_v32  ;;  %v2340_v57 = vsel %vm2234_vm9, %v2308_v49, 0.0 }
 0x206   : > { %v2064_v9 = vadd.f32 %v1985_v47, %v1906_v10 }
 0x208   : > { %v2202_v13 = vadd.f32 %v2123_v1, %v2064_v9  ;;  %v1830_v54 = vpop.f32.mrf.mxu2  ;;  %v4025_v1 = vld [vmem:[#allocation32_spill] sm:$0xff]  ;;  %v4026_v9 = vld [vmem:[#allocation33_spill] sm:$0xff] }
 0x209   : > { %v1907_v53 = vadd.f32 %v1830_v54, %v1775_v35 }
 0x20a   : > { %v2236_v48 = vsel %vm2234_vm9, %v2202_v13, 0.0  ;;  %v2309_v42 = vmul.f32 %v2202_v13, %v2202_v13  ;;  %2661 = vmatmul.msk.bf16.gmra.mxu3 %vm660_vm5, %v4022_v23 }
 0x20b   : > { %v2237_v43 = vadd.f32 %v2236_v48, %v2235_v61  ;;  %v4027_v61 = vld [vmem:[#allocation3_spill] sm:$0xff] }
 0x20c   : > { %v2341_v60 = vsel %vm2234_vm9, %v2309_v42, 0.0  ;;  %v2126_v4 = vpop.f32.mrf.mxu0  ;;  %v1703_v44 = vpop.f32.mrf.mxu1 }
 0x20d   : > { %v2342_v8 = vadd.f32 %v2341_v60, %v2340_v57  ;;  %v1988_v41 = vpop.f32.mrf.mxu3  ;;  %v1777_v59 = vadd.f32 %v1703_v44, %v4023_v30  ;;  %v4029_v44 = vld [vmem:[#allocation35_spill] sm:$0xff] }
 0x20e   : > { %v2065_v3 = vadd.f32 %v1988_v41, %v1907_v53 }
 0x20f   : > { %2678 = vmatmul.msk.bf16.gmra.mxu0 %vm660_vm5, %v4024_v15  ;;  %2626 = vmatmul.msk.bf16.gmra.mxu1 %vm660_vm5, %v4024_v15 }
 0x210   : > { %v2203_v20 = vadd.f32 %v2126_v4, %v2065_v3  ;;  %v1832_v6 = vpop.f32.mrf.mxu2 }
 0x211   : > { %v1908_v2 = vadd.f32 %v1832_v6, %v1776_v52 }
 0x212   : > { %v2238_v14 = vsel %vm2234_vm9, %v2203_v20, 0.0  ;;  %v2310_v5 = vmul.f32 %v2203_v20, %v2203_v20 }
 0x213   : > { %v2239_v21 = vadd.f32 %v2238_v14, %v2237_v43 }
 0x214   : > { %v2343_v35 = vsel %vm2234_vm9, %v2310_v5, 0.0  ;;  %v2128_v12 = vpop.f32.mrf.mxu0  ;;  %v1705_v47 = vpop.f32.mrf.mxu1 }
 0x215   : > { %v2344_v45 = vadd.f32 %v2343_v35, %v2342_v8  ;;  %v1990_v10 = vpop.f32.mrf.mxu3  ;;  %2646 = vmatmul.msk.bf16.gmra.mxu2 %vm660_vm5, %v4025_v1  ;;  %v1778_v32 = vadd.f32 %v1705_v47, %v4026_v9  ;;  %v4028_v8 = vld [vmem:[#allocation34_spill] sm:$0xff]  ;;  %v4030_v35 = vld [vmem:[#allocation36_spill] sm:$0xff] }
 0x216   : > { %v2066_v28 = vadd.f32 %v1990_v10, %v1908_v2  ;;  %v4031_v10 = vld [vmem:[#allocation37_spill] sm:$0xff] }
 0x218   : > { %v2204_v49 = vadd.f32 %v2128_v12, %v2066_v28  ;;  %v1835_v13 = vpop.f32.mrf.mxu2 }
 0x219   : > { %v1909_v54 = vadd.f32 %v1835_v13, %v1777_v59  ;;  %v4032_v13 = vld [vmem:[#allocation4_spill] sm:$0xff] }
 0x21a   : > { %v2240_v52 = vsel %vm2234_vm9, %v2204_v49, 0.0  ;;  %v2311_v53 = vmul.f32 %v2204_v49, %v2204_v49  ;;  %2662 = vmatmul.msk.bf16.gmra.mxu3 %vm660_vm5, %v4027_v61 }
 0x21b   : > { %v2241_v48 = vadd.f32 %v2240_v52, %v2239_v21 }
 0x21c   : > { %v2345_v42 = vsel %vm2234_vm9, %v2311_v53, 0.0  ;;  %v2131_v23 = vpop.f32.mrf.mxu0  ;;  %v1708_v60 = vpop.f32.mrf.mxu1 }
 0x21d   : > { %v2346_v43 = vadd.f32 %v2345_v42, %v2344_v45  ;;  %v1993_v57 = vpop.f32.mrf.mxu3  ;;  %v1779_v41 = vadd.f32 %v1708_v60, %v4028_v8  ;;  %v4034_v60 = vld [vmem:[#allocation39_spill] sm:$0xff] }
 0x21e   : > { %v2067_v4 = vadd.f32 %v1993_v57, %v1909_v54 }
 0x21f   : > { %2679 = vmatmul.msk.bf16.gmra.mxu0 %vm660_vm5, %v4029_v44  ;;  %2627 = vmatmul.msk.bf16.gmra.mxu1 %vm660_vm5, %v4029_v44 }
 0x220   : > { %v2205_v3 = vadd.f32 %v2131_v23, %v2067_v4  ;;  %v1837_v30 = vpop.f32.mrf.mxu2 }
 0x221   : > { %v1910_v59 = vadd.f32 %v1837_v30, %v1778_v32 }
 0x222   : > { %v2242_v15 = vsel %vm2234_vm9, %v2205_v3, 0.0  ;;  %v2312_v20 = vmul.f32 %v2205_v3, %v2205_v3 }
 0x223   : > { %v2243_v6 = vadd.f32 %v2242_v15, %v2241_v48 }
 0x224   : > { %v2347_v2 = vsel %vm2234_vm9, %v2312_v20, 0.0  ;;  %v2133_v14 = vpop.f32.mrf.mxu0  ;;  %v1710_v12 = vpop.f32.mrf.mxu1 }
 0x225   : > { %v2348_v5 = vadd.f32 %v2347_v2, %v2346_v43  ;;  %v1995_v21 = vpop.f32.mrf.mxu3  ;;  %2647 = vmatmul.msk.bf16.gmra.mxu2 %vm660_vm5, %v4030_v35  ;;  %v1780_v1 = vadd.f32 %v1710_v12, %v4031_v10  ;;  %v4033_v43 = vld [vmem:[#allocation38_spill] sm:$0xff] }
 0x226   : > { %v2068_v45 = vadd.f32 %v1995_v21, %v1910_v59  ;;  %v4035_v2 = vld [vmem:[#allocation6_spill] sm:$0xff]  ;;  %v4036_v21 = vld [vmem:[#allocation7_spill] sm:$0xff] }
 0x228   : > { %v2206_v47 = vadd.f32 %v2133_v14, %v2068_v45  ;;  %v1840_v28 = vpop.f32.mrf.mxu2 }
 0x229   : > { %v1911_v9 = vadd.f32 %v1840_v28, %v1779_v41  ;;  %v4037_v28 = vld [vmem:[#allocation10_spill] sm:$0xff] }
 0x22a   : > { %v2244_v32 = vsel %vm2234_vm9, %v2206_v47, 0.0  ;;  %v2313_v49 = vmul.f32 %v2206_v47, %v2206_v47  ;;  %2663 = vmatmul.msk.bf16.gmra.mxu3 %vm660_vm5, %v4032_v13 }
 0x22b   : > { %v2245_v54 = vadd.f32 %v2244_v32, %v2243_v6 }
 0x22c   : > { %v2349_v52 = vsel %vm2234_vm9, %v2313_v49, 0.0  ;;  %v2136_v53 = vpop.f32.mrf.mxu0  ;;  %v1713_v42 = vpop.f32.mrf.mxu1 }
 0x22d   : > { %v2350_v61 = vadd.f32 %v2349_v52, %v2348_v5  ;;  %v1998_v48 = vpop.f32.mrf.mxu3  ;;  %v1781_v57 = vadd.f32 %v1713_v42, %v4033_v43  ;;  %v4039_v42 = vld [vmem:[#allocation41_spill] sm:$0xff] }
 0x22e   : > { %v2069_v23 = vadd.f32 %v1998_v48, %v1911_v9 }
 0x22f   : > { %2680 = vmatmul.msk.bf16.gmra.mxu0 %vm660_vm5, %v4034_v60  ;;  %2628 = vmatmul.msk.bf16.gmra.mxu1 %vm660_vm5, %v4034_v60 }
 0x230   : > { %v2207_v4 = vadd.f32 %v2136_v53, %v2069_v23  ;;  %v1842_v8 = vpop.f32.mrf.mxu2 }
 0x231   : > { %v1912_v41 = vadd.f32 %v1842_v8, %v1780_v1 }
 0x232   : > { %v2246_v44 = vsel %vm2234_vm9, %v2207_v4, 0.0  ;;  %v2314_v3 = vmul.f32 %v2207_v4, %v2207_v4 }
 0x233   : > { %v2247_v30 = vadd.f32 %v2246_v44, %v2245_v54 }
 0x234   : > { %v2351_v59 = vsel %vm2234_vm9, %v2314_v3, 0.0  ;;  %v2138_v15 = vpop.f32.mrf.mxu0  ;;  %v1715_v14 = vpop.f32.mrf.mxu1 }
 0x235   : > { %v2352_v20 = vadd.f32 %v2351_v59, %v2350_v61  ;;  %v2000_v6 = vpop.f32.mrf.mxu3  ;;  %2648 = vmatmul.msk.bf16.gmra.mxu2 %vm660_vm5, %v4035_v2  ;;  %v1782_v35 = vadd.f32 %v1715_v14, %v4036_v21  ;;  %v4038_v61 = vld [vmem:[#allocation40_spill] sm:$0xff] }
 0x236   : > { %v2070_v5 = vadd.f32 %v2000_v6, %v1912_v41 }
 0x238   : > { %v2208_v12 = vadd.f32 %v2138_v15, %v2070_v5  ;;  %v1845_v45 = vpop.f32.mrf.mxu2  ;;  %v4040_v5 = vld [vmem:[#allocation42_spill] sm:$0xff] }
 0x239   : > { %v1913_v10 = vadd.f32 %v1845_v45, %v1781_v57  ;;  %v1666_v21 = vrot.slane %v4040_v5, 5 }
 0x23a   : > { %v2248_v1 = vsel %vm2234_vm9, %v2208_v12, 0.0  ;;  %v2315_v47 = vmul.f32 %v2208_v12, %v2208_v12  ;;  %2664 = vmatmul.msk.bf16.gmra.mxu3 %vm660_vm5, %v4037_v28 }
 0x23b   : > { %v2249_v9 = vadd.f32 %v2248_v1, %v2247_v30 }
 0x23c   : > { %v2353_v32 = vsel %vm2234_vm9, %v2315_v47, 0.0  ;;  %v2141_v49 = vpop.f32.mrf.mxu0  ;;  %v1718_v52 = vpop.f32.mrf.mxu1  ;;  %v3781_v47 = vld [vmem:[%s2767_s18 + $0xd0] sm:$0xf] }
 0x23d   : > { %v2354_v13 = vadd.f32 %v2353_v32, %v2352_v20  ;;  %v2003_v54 = vpop.f32.mrf.mxu3  ;;  %v1783_v48 = vadd.f32 %v1718_v52, %v4038_v61  ;;  %v4041_v32 = vld [vmem:[#allocation5_spill] sm:$0xff] }
 0x23e   : > { %v2071_v53 = vadd.f32 %v2003_v54, %v1913_v10  ;;  %v3777_v10 = vld [vmem:[%s2767_s18 + $0xcc] sm:$0xf] }
 0x23f   : > { %2681 = vmatmul.msk.bf16.gmra.mxu0 %vm660_vm5, %v4039_v42  ;;  %2629 = vmatmul.msk.bf16.gmra.mxu1 %vm660_vm5, %v4039_v42  ;;  %v1941_v61 = vshll.u32 %v3777_v10, 16  ;;  %v1951_v42 = vshrl.u32 %v3781_v47, 16 }
 0x240   : > { %v2209_v23 = vadd.f32 %v2141_v49, %v2071_v53  ;;  %v1847_v43 = vpop.f32.mrf.mxu2  ;;  %v2615_v49 = vrot.slane %v4041_v32, 9  ;;  %v1669_v53 = vrot.slane %v3545_v27, 5 }
 0x241   : > { %v1914_v57 = vadd.f32 %v1847_v43, %v1782_v35 }
 0x242   : > { %v2250_v60 = vsel %vm2234_vm9, %v2209_v23, 0.0  ;;  %v2316_v4 = vmul.f32 %v2209_v23, %v2209_v23  ;;  %v1667_v27 = vsel %vm3117_vm8, %v2615_v49, %v1666_v21 }
 0x243   : > { %v2251_v8 = vadd.f32 %v2250_v60, %v2249_v9  ;;  %v1671_v5 = vunpack.c.l.b16 %v1667_v27 }
 0x244   : > { %v2355_v41 = vsel %vm2234_vm9, %v2316_v4, 0.0  ;;  %v2143_v44 = vpop.f32.mrf.mxu0  ;;  %v1720_v59 = vpop.f32.mrf.mxu1 }
 0x245   : > { %v2356_v3 = vadd.f32 %v2355_v41, %v2354_v13  ;;  %v2005_v30 = vpop.f32.mrf.mxu3  ;;  %2649 = vmatmul.msk.bf16.gmra.mxu2 %vm660_vm5, %v3538_v39  ;;  %v1784_v20 = vadd.f32 %v1720_v59, %v3542_v51  ;;  %v1668_v13 = vrot.slane %v1666_v21, 4 }
 0x246   : > { %v2072_v15 = vadd.f32 %v2005_v30, %v1914_v57  ;;  %v1953_v30 = vrot.slane %v1951_v42, 4 }
 0x247   : > { %v1670_v4 = vsel %vm3117_vm8, %v1668_v13, %v1669_v53 }
 0x248   : > { %v2210_v6 = vadd.f32 %v2143_v44, %v2072_v15  ;;  %v1850_v2 = vpop.f32.mrf.mxu2  ;;  %v1943_v44 = vrot.slane %v1941_v61, 5  ;;  %v1672_v21 = vunpack.c.l.b16 %v1670_v4  ;;  %v2098_v61 = vrot.slane %v3781_v47, 5 }
 0x249   : > { %v1915_v14 = vadd.f32 %v1850_v2, %v1783_v48  ;;  %v1947_v48 = vshll.u32 %v3781_v47, 16  ;;  %v2668_v47 = vrot.slane %v3777_v10, 9 }
 0x24a   : > { %v2252_v35 = vsel %vm2234_vm9, %v2210_v6, 0.0  ;;  %v2317_v12 = vmul.f32 %v2210_v6, %v2210_v6  ;;  %2665 = vmatmul.msk.bf16.gmra.mxu3 %vm660_vm5, %v3128_v38  ;;  %v1938_v38 = vshrl.u32 %v3777_v10, 16  ;;  %v215_v6 = vld [vmem:[%s2767_s18 + $0xd4] sm:$0x1] }
 0x24b   : > { %v2253_v45 = vadd.f32 %v2252_v35, %v2251_v8  ;;  %v2101_v4 = vrot.slane %v215_v6, 5 }
 0x24c   : > { %v2357_v39 = vsel %vm2234_vm9, %v2317_v12, 0.0  ;;  %v2146_v1 = vpop.f32.mrf.mxu0  ;;  %v1723_v9 = vpop.f32.mrf.mxu1  ;;  %v1940_v8 = vrot.slane %v1938_v38, 4 }
 0x24d   : > { %v2358_v51 = vadd.f32 %v2357_v39, %v2356_v3  ;;  %v2008_v28 = vpop.f32.mrf.mxu3  ;;  %v1785_v52 = vadd.f32 %v1723_v9, %v3559_v19  ;;  %v1949_v3 = vrot.slane %v1947_v48, 5  ;;  %v1957_v39 = vshll.u32 %v215_v6, 16 }
 0x24e   : > { %v2073_v54 = vadd.f32 %v2008_v28, %v1915_v14  ;;  %v1944_v12 = vor.u32 %v1943_v44, %v1940_v8 }
 0x24f   : > { %2682 = vmatmul.msk.bf16.gmra.mxu0 %vm660_vm5, %v3561_v58  ;;  %2630 = vmatmul.msk.bf16.gmra.mxu1 %vm660_vm5, %v3561_v58  ;;  %v1959_v53 = vrot.slane %v1957_v39, 5 }
 0x250   : > { %v2211_v23 = vadd.f32 %v2146_v1, %v2073_v54  ;;  %v1852_v43 = vpop.f32.mrf.mxu2  ;;  %v1945_v13 = vrot.slane %v1944_v12, 4 }
 0x251   : > { %v1916_v19 = vadd.f32 %v1852_v43, %v1784_v20 }
 0x252   : > { %v2254_v57 = vsel %vm2234_vm9, %v2211_v23, 0.0  ;;  %v2318_v60 = vmul.f32 %v2211_v23, %v2211_v23 }
 0x253   : > { %v2255_v41 = vadd.f32 %v2254_v57, %v2253_v45  ;;  %v1954_v45 = vor.u32 %v1953_v30, %v1949_v3 }
 0x254   : > { %v2359_v59 = vsel %vm2234_vm9, %v2318_v60, 0.0  ;;  %v2148_v15 = vpop.f32.mrf.mxu0  ;;  %v1725_v2 = vpop.f32.mrf.mxu1  ;;  %v2100_v60 = vrot.slane %v2098_v61, 4 }
 0x255   : > { %v2360_v58 = vadd.f32 %v2359_v59, %v2358_v51  ;;  %v2010_v20 = vpop.f32.mrf.mxu3  ;;  %2650 = vmatmul.msk.bf16.gmra.mxu2 %vm660_vm5, %v3570_v17  ;;  %v1786_v35 = vadd.f32 %v1725_v2, %v3573_v34  ;;  %v1673_v51 = vpack.c.b16 %v1672_v21, %v1671_v5  ;;  %v1955_v54 = vrot.slane %v1954_v45, 4 }
 0x256   : > { %v2074_v14 = vadd.f32 %v2010_v20, %v1916_v19  ;;  %v2102_v20 = vsel %vm3117_vm8, %v2100_v60, %v2101_v4 }
 0x257   : > { %v1960_v19 = vsel %vm2802_vm4, %v1955_v54, %v1959_v53  ;;  %v2104_v12 = vunpack.c.l.b16 %v2102_v20 }
 0x258   : > { %v2212_v1 = vadd.f32 %v2148_v15, %v2074_v14  ;;  %v1855_v28 = vpop.f32.mrf.mxu2  ;;  %v1962_v59 = vunpack.c.l.b16 %v1960_v19 }
 0x259   : > { %v1917_v9 = vadd.f32 %v1855_v28, %v1785_v52 }
 0x25a   : > { %v2256_v32 = vsel %vm2234_vm9, %v2212_v1, 0.0  ;;  %v2319_v49 = vmul.f32 %v2212_v1, %v2212_v1  ;;  %2666 = vmatmul.msk.bf16.gmra.mxu3 %vm660_vm5, %v3577_v62  ;;  %v1950_v62 = vsel %vm2802_vm4, %v1945_v13, %v1949_v3 }
 0x25b   : > { %v2257_v17 = vadd.f32 %v2256_v32, %v2255_v41  ;;  %v2704_v41 = vld [vmem:[%s2767_s18 + $0xcc] sm:$0xff]  ;;  %v1961_v30 = vunpack.c.l.b16 %v1950_v62 }
 0x25c   : > { %v2361_v38 = vsel %vm2234_vm9, %v2319_v49, 0.0  ;;  %v2151_v34 = vpop.f32.mrf.mxu0  ;;  %v1728_v52 = vpop.f32.mrf.mxu1 }
 0x25d   : > { %v2362_v48 = vadd.f32 %v2361_v38, %v2360_v58  ;;  %v2013_v42 = vpop.f32.mrf.mxu3  ;;  %v1787_v43 = vadd.f32 %v1728_v52, %v3584_v33  ;;  %v2099_v58 = vsel %vm3117_vm8, %v2668_v47, %v2098_v61  ;;  %v1963_v5 = vpack.c.b16 %v1962_v59, %v1961_v30 }
 0x25e   : > { %v2075_v23 = vadd.f32 %v2013_v42, %v1917_v9 }
 0x25f   : > { %2683 = vmatmul.msk.bf16.gmra.mxu0 %vm660_vm5, %v1673_v51  ;;  %2631 = vmatmul.msk.bf16.gmra.mxu1 %vm660_vm5, %v1673_v51 }
 0x260   : > { %v2213_v27 = vadd.f32 %v2151_v34, %v2075_v23  ;;  %v1857_v57 = vpop.f32.mrf.mxu2 }
 0x261   : > { %v1918_v8 = vadd.f32 %v1857_v57, %v1786_v35  ;;  %v2103_v35 = vunpack.c.l.b16 %v2099_v58 }
 0x262   : > { %v2258_v33 = vsel %vm2234_vm9, %v2213_v27, 0.0  ;;  %v2320_v44 = vmul.f32 %v2213_v27, %v2213_v27 }
 0x263   : > { %v2259_v15 = vadd.f32 %v2258_v33, %v2257_v17  ;;  %v2105_v32 = vpack.c.b16 %v2104_v12, %v2103_v35 }
 0x264   : > { %v2363_v3 = vsel %vm2234_vm9, %v2320_v44, 0.0  ;;  %v2153_v29 = vpop.f32.mrf.mxu0  ;;  %v1730_v6 = vpop.f32.mrf.mxu1 }
 0x265   : > { %v2364_v10 = vadd.f32 %v2363_v3, %v2362_v48  ;;  %v2015_v2 = vpop.f32.mrf.mxu3  ;;  %2651 = vmatmul.msk.bf16.gmra.mxu2 %vm660_vm5, %v2704_v41  ;;  %v1788_v21 = vadd.f32 %v1730_v6, %v3589_v11 }
 0x266   : > { %v2076_v14 = vadd.f32 %v2015_v2, %v1918_v8 }
 0x268   : > { %v2214_v45 = vadd.f32 %v2153_v29, %v2076_v14  ;;  %v1860_v39 = vpop.f32.mrf.mxu2 }
 0x269   : > { %v1919_v1 = vadd.f32 %v1860_v39, %v1787_v43 }
 0x26a   : > { %v2260_v28 = vsel %vm2234_vm9, %v2214_v45, 0.0  ;;  %v2321_v9 = vmul.f32 %v2214_v45, %v2214_v45  ;;  %2667 = vmatmul.msk.bf16.gmra.mxu3 %vm660_vm5, %v1963_v5 }
 0x26b   : > { %v2261_v36 = vadd.f32 %v2260_v28, %v2259_v15 }
 0x26c   : > { %v2365_v49 = vsel %vm2234_vm9, %v2321_v9, 0.0  ;;  %v2156_v51 = vpop.f32.mrf.mxu0  ;;  %v1733_v54 = vpop.f32.mrf.mxu1 }
 0x26d   : > { %v2366_v17 = vadd.f32 %v2365_v49, %v2364_v10  ;;  %v2018_v13 = vpop.f32.mrf.mxu3  ;;  %v1789_v11 = vadd.f32 %v1733_v54, %v3598_v25 }
 0x26e   : > { %v2077_v53 = vadd.f32 %v2018_v13, %v1919_v1 }
 0x26f   : > { %2684 = vmatmul.msk.bf16.gmra.mxu0 %vm660_vm5, %v2105_v32 }
 0x270   : > { %v2215_v38 = vadd.f32 %v2156_v51, %v2077_v53  ;;  %v1862_v34 = vpop.f32.mrf.mxu2 }
 0x271   : > { %v1920_v61 = vadd.f32 %v1862_v34, %v1788_v21 }
 0x272   : > { %v2262_v48 = vsel %vm2234_vm9, %v2215_v38, 0.0  ;;  %v2322_v42 = vmul.f32 %v2215_v38, %v2215_v38 }
 0x273   : > { %v2263_v52 = vadd.f32 %v2262_v48, %v2261_v36 }
 0x274   : > { %v2367_v23 = vsel %vm2234_vm9, %v2322_v42, 0.0  ;;  %v2158_v43 = vpop.f32.mrf.mxu0  ;;  %v1735_v27 = vpop.f32.mrf.mxu1 }
 0x275   : > { %v2368_v62 = vadd.f32 %v2367_v23, %v2366_v17  ;;  %v2020_v19 = vpop.f32.mrf.mxu3  ;;  %v1790_v47 = vadd.f32 %v1735_v27, %v3603_v40 }
 0x276   : > { %v2078_v57 = vadd.f32 %v2020_v19, %v1920_v61 }
 0x278   : > { %v2216_v60 = vadd.f32 %v2158_v43, %v2078_v57  ;;  %v1865_v25 = vpop.f32.mrf.mxu2 }
 0x279   : > { %v1921_v4 = vadd.f32 %v1865_v25, %v1789_v11 }
 0x27a   : > { %v2264_v8 = vsel %vm2234_vm9, %v2216_v60, 0.0  ;;  %v2323_v41 = vmul.f32 %v2216_v60, %v2216_v60 }
 0x27b   : > { %v2265_v33 = vadd.f32 %v2264_v8, %v2263_v52 }
 0x27c   : > { %v2369_v44 = vsel %vm2234_vm9, %v2323_v41, 0.0  ;;  %v2161_v30 = vpop.f32.mrf.mxu0  ;;  %v1738_v3 = vpop.f32.mrf.mxu1 }
 0x27d   : > { %v2370_v59 = vadd.f32 %v2369_v44, %v2368_v62  ;;  %v2023_v15 = vpop.f32.mrf.mxu3  ;;  %v1791_v58 = vadd.f32 %v1738_v3, %v3612_v22 }
 0x27e   : > { %v2079_v29 = vadd.f32 %v2023_v15, %v1921_v4 }
 0x280   : > { %v2217_v20 = vadd.f32 %v2161_v30, %v2079_v29  ;;  %v1867_v10 = vpop.f32.mrf.mxu2 }
 0x281   : > { %v1922_v2 = vadd.f32 %v1867_v10, %v1790_v47 }
 0x282   : > { %v2266_v40 = vsel %vm2234_vm9, %v2217_v20, 0.0  ;;  %v2324_v6 = vmul.f32 %v2217_v20, %v2217_v20 }
 0x283   : > { %v2267_v14 = vadd.f32 %v2266_v40, %v2265_v33 }
 0x284   : > { %v2371_v5 = vsel %vm2234_vm9, %v2324_v6, 0.0  ;;  %v2163_v21 = vpop.f32.mrf.mxu0  ;;  %v1740_v45 = vpop.f32.mrf.mxu1 }
 0x285   : > { %v2372_v35 = vadd.f32 %v2371_v5, %v2370_v59  ;;  %v2025_v12 = vpop.f32.mrf.mxu3  ;;  %v1792_v1 = vadd.f32 %v1740_v45, %v3617_v26 }
 0x286   : > { %v2080_v39 = vadd.f32 %v2025_v12, %v1922_v2 }
 0x288   : > { %v2218_v28 = vadd.f32 %v2163_v21, %v2080_v39  ;;  %v1870_v9 = vpop.f32.mrf.mxu2 }
 0x289   : > { %v1923_v36 = vadd.f32 %v1870_v9, %v1791_v58 }
 0x28a   : > { %v2268_v22 = vsel %vm2234_vm9, %v2218_v28, 0.0  ;;  %v2325_v32 = vmul.f32 %v2218_v28, %v2218_v28 }
 0x28b   : > { %v2269_v49 = vadd.f32 %v2268_v22, %v2267_v14 }
 0x28c   : > { %v2373_v51 = vsel %vm2234_vm9, %v2325_v32, 0.0  ;;  %v2166_v17 = vpop.f32.mrf.mxu0  ;;  %v1743_v53 = vpop.f32.mrf.mxu1 }
 0x28d   : > { %v2374_v13 = vadd.f32 %v2373_v51, %v2372_v35  ;;  %v2028_v54 = vpop.f32.mrf.mxu3  ;;  %v1793_v38 = vadd.f32 %v1743_v53, %v3626_v16 }
 0x28e   : > { %v2081_v11 = vadd.f32 %v2028_v54, %v1923_v36 }
 0x290   : > { %v2219_v34 = vadd.f32 %v2166_v17, %v2081_v11  ;;  %v1872_v61 = vpop.f32.mrf.mxu2 }
 0x291   : > { %v1924_v48 = vadd.f32 %v1872_v61, %v1792_v1 }
 0x292   : > { %v2270_v26 = vsel %vm2234_vm9, %v2219_v34, 0.0  ;;  %v2326_v42 = vmul.f32 %v2219_v34, %v2219_v34 }
 0x293   : > { %v2271_v52 = vadd.f32 %v2270_v26, %v2269_v49 }
 0x294   : > { %v2375_v23 = vsel %vm2234_vm9, %v2326_v42, 0.0  ;;  %v2168_v43 = vpop.f32.mrf.mxu0  ;;  %v1745_v27 = vpop.f32.mrf.mxu1 }
 0x295   : > { %v2376_v62 = vadd.f32 %v2375_v23, %v2374_v13  ;;  %v2030_v19 = vpop.f32.mrf.mxu3  ;;  %v1794_v29 = vadd.f32 %v1745_v27, %v3631_v0 }
 0x296   : > { %v2082_v57 = vadd.f32 %v2030_v19, %v1924_v48 }
 0x298   : > { %v2220_v47 = vadd.f32 %v2168_v43, %v2082_v57  ;;  %v1875_v60 = vpop.f32.mrf.mxu2 }
 0x299   : > { %v1925_v25 = vadd.f32 %v1875_v60, %v1793_v38 }
 0x29a   : > { %v2272_v4 = vsel %vm2234_vm9, %v2220_v47, 0.0  ;;  %v2327_v16 = vmul.f32 %v2220_v47, %v2220_v47 }
 0x29b   : > { %v2273_v8 = vadd.f32 %v2272_v4, %v2271_v52 }
 0x29c   : > { %v2377_v41 = vsel %vm2234_vm9, %v2327_v16, 0.0  ;;  %v2171_v33 = vpop.f32.mrf.mxu0  ;;  %v1748_v59 = vpop.f32.mrf.mxu1 }
 0x29d   : > { %v2378_v44 = vadd.f32 %v2377_v41, %v2376_v62  ;;  %v2033_v30 = vpop.f32.mrf.mxu3  ;;  %v1795_v39 = vadd.f32 %v1748_v59, %v3640_v50 }
 0x29e   : > { %v2083_v15 = vadd.f32 %v2033_v30, %v1925_v25 }
 0x2a0   : > { %v2221_v3 = vadd.f32 %v2171_v33, %v2083_v15  ;;  %v1877_v58 = vpop.f32.mrf.mxu2 }
 0x2a1   : > { %v1926_v2 = vadd.f32 %v1877_v58, %v1794_v29 }
 0x2a2   : > { %v2274_v20 = vsel %vm2234_vm9, %v2221_v3, 0.0  ;;  %v2328_v10 = vmul.f32 %v2221_v3, %v2221_v3 }
 0x2a3   : > { %v2275_v40 = vadd.f32 %v2274_v20, %v2273_v8 }
 0x2a4   : > { %v2379_v6 = vsel %vm2234_vm9, %v2328_v10, 0.0  ;;  %v2173_v14 = vpop.f32.mrf.mxu0  ;;  %v1750_v35 = vpop.f32.mrf.mxu1 }
 0x2a5   : > { %v2380_v5 = vadd.f32 %v2379_v6, %v2378_v44  ;;  %v2035_v21 = vpop.f32.mrf.mxu3  ;;  %v1796_v53 = vadd.f32 %v1750_v35, %v3645_v55 }
 0x2a6   : > { %v2084_v12 = vadd.f32 %v2035_v21, %v1926_v2 }
 0x2a8   : > { %v2222_v45 = vadd.f32 %v2173_v14, %v2084_v12  ;;  %v1880_v1 = vpop.f32.mrf.mxu2 }
 0x2a9   : > { %v1927_v9 = vadd.f32 %v1880_v1, %v1795_v39 }
 0x2aa   : > { %v2276_v28 = vsel %vm2234_vm9, %v2222_v45, 0.0  ;;  %v2329_v0 = vmul.f32 %v2222_v45, %v2222_v45 }
 0x2ab   : > { %v2277_v36 = vadd.f32 %v2276_v28, %v2275_v40 }
 0x2ac   : > { %v2381_v22 = vsel %vm2234_vm9, %v2329_v0, 0.0  ;;  %v2176_v32 = vpop.f32.mrf.mxu0  ;;  %v1753_v17 = vpop.f32.mrf.mxu1 }
 0x2ad   : > { %v2382_v49 = vadd.f32 %v2381_v22, %v2380_v5  ;;  %v2038_v51 = vpop.f32.mrf.mxu3  ;;  %v1797_v19 = vadd.f32 %v1753_v17, %v3654_v24 }
 0x2ae   : > { %v2085_v13 = vadd.f32 %v2038_v51, %v1927_v9 }
 0x2b0   : > { %v2223_v54 = vadd.f32 %v2176_v32, %v2085_v13  ;;  %v1882_v11 = vpop.f32.mrf.mxu2 }
 0x2b1   : > { %v1928_v34 = vadd.f32 %v1882_v11, %v1796_v53 }
 0x2b2   : > { %v2278_v38 = vsel %vm2234_vm9, %v2223_v54, 0.0  ;;  %v2330_v50 = vmul.f32 %v2223_v54, %v2223_v54 }
 0x2b3   : > { %v2279_v61 = vadd.f32 %v2278_v38, %v2277_v36 }
 0x2b4   : > { %v2383_v48 = vsel %vm2234_vm9, %v2330_v50, 0.0  ;;  %v2178_v26 = vpop.f32.mrf.mxu0  ;;  %v1755_v23 = vpop.f32.mrf.mxu1 }
 0x2b5   : > { %v2384_v42 = vadd.f32 %v2383_v48, %v2382_v49  ;;  %v2040_v52 = vpop.f32.mrf.mxu3  ;;  %v1798_v30 = vadd.f32 %v1755_v23, %v3659_v56 }
 0x2b6   : > { %v2086_v43 = vadd.f32 %v2040_v52, %v1928_v34 }
 0x2b8   : > { %v2224_v62 = vadd.f32 %v2178_v26, %v2086_v43  ;;  %v1885_v27 = vpop.f32.mrf.mxu2 }
 0x2b9   : > { %v1929_v47 = vadd.f32 %v1885_v27, %v1797_v19 }
 0x2ba   : > { %v2280_v57 = vsel %vm2234_vm9, %v2224_v62, 0.0  ;;  %v2331_v55 = vmul.f32 %v2224_v62, %v2224_v62 }
 0x2bb   : > { %v2281_v60 = vadd.f32 %v2280_v57, %v2279_v61 }
 0x2bc   : > { %v2385_v25 = vsel %vm2234_vm9, %v2331_v55, 0.0  ;;  %v2181_v4 = vpop.f32.mrf.mxu0  ;;  %v1758_v41 = vpop.f32.mrf.mxu1 }
 0x2bd   : > { %v2386_v16 = vadd.f32 %v2385_v25, %v2384_v42  ;;  %v2043_v8 = vpop.f32.mrf.mxu3  ;;  %v1799_v5 = vadd.f32 %v1758_v41, %v3668_v37 }
 0x2be   : > { %v2087_v33 = vadd.f32 %v2043_v8, %v1929_v47 }
 0x2c0   : > { %v2225_v44 = vadd.f32 %v2181_v4, %v2087_v33  ;;  %v1887_v59 = vpop.f32.mrf.mxu2 }
 0x2c1   : > { %v1930_v3 = vadd.f32 %v1887_v59, %v1798_v30 }
 0x2c2   : > { %v2282_v15 = vsel %vm2234_vm9, %v2225_v44, 0.0  ;;  %v2332_v24 = vmul.f32 %v2225_v44, %v2225_v44 }
 0x2c3   : > { %v2283_v29 = vadd.f32 %v2282_v15, %v2281_v60 }
 0x2c4   : > { %v2387_v58 = vsel %vm2234_vm9, %v2332_v24, 0.0  ;;  %v2183_v20 = vpop.f32.mrf.mxu0  ;;  %v1760_v40 = vpop.f32.mrf.mxu1 }
 0x2c5   : > { %v2388_v10 = vadd.f32 %v2387_v58, %v2386_v16  ;;  %v2045_v2 = vpop.f32.mrf.mxu3  ;;  %v1800_v32 = vadd.f32 %v1760_v40, %v3673_v7 }
 0x2c6   : > { %v2088_v6 = vadd.f32 %v2045_v2, %v1930_v3 }
 0x2c8   : > { %v2226_v14 = vadd.f32 %v2183_v20, %v2088_v6  ;;  %v1890_v21 = vpop.f32.mrf.mxu2 }
 0x2c9   : > { %v1931_v12 = vadd.f32 %v1890_v21, %v1799_v5 }
 0x2ca   : > { %v2284_v35 = vsel %vm2234_vm9, %v2226_v14, 0.0  ;;  %v2333_v56 = vmul.f32 %v2226_v14, %v2226_v14 }
 0x2cb   : > { %v2285_v45 = vadd.f32 %v2284_v35, %v2283_v29 }
 0x2cc   : > { %v2389_v39 = vsel %vm2234_vm9, %v2333_v56, 0.0  ;;  %v2186_v1 = vpop.f32.mrf.mxu0  ;;  %v1763_v36 = vpop.f32.mrf.mxu1 }
 0x2cd   : > { %v2390_v28 = vadd.f32 %v2389_v39, %v2388_v10  ;;  %v2048_v0 = vpop.f32.mrf.mxu3  ;;  %v1801_v61 = vadd.f32 %v1763_v36, %v3682_v18 }
 0x2ce   : > { %v2089_v9 = vadd.f32 %v2048_v0, %v1931_v12 }
 0x2d0   : > { %v2227_v22 = vadd.f32 %v2186_v1, %v2089_v9  ;;  %v1892_v49 = vpop.f32.mrf.mxu2 }
 0x2d1   : > { %v1932_v17 = vadd.f32 %v1892_v49, %v1800_v32 }
 0x2d2   : > { %v2286_v51 = vsel %vm2234_vm9, %v2227_v22, 0.0  ;;  %v2334_v37 = vmul.f32 %v2227_v22, %v2227_v22 }
 0x2d3   : > { %v2287_v13 = vadd.f32 %v2286_v51, %v2285_v45 }
 0x2d4   : > { %v2391_v54 = vsel %vm2234_vm9, %v2334_v37, 0.0  ;;  %v2188_v53 = vpop.f32.mrf.mxu0  ;;  %v1765_v26 = vpop.f32.mrf.mxu1 }
 0x2d5   : > { %v2392_v11 = vadd.f32 %v2391_v54, %v2390_v28  ;;  %v2050_v38 = vpop.f32.mrf.mxu3  ;;  %v1802_v47 = vadd.f32 %v1765_v26, %v3687_v31 }
 0x2d6   : > { %v2090_v50 = vadd.f32 %v2050_v38, %v1932_v17 }
 0x2d8   : > { %v2228_v34 = vadd.f32 %v2188_v53, %v2090_v50  ;;  %v1895_v48 = vpop.f32.mrf.mxu2 }
 0x2d9   : > { %v1933_v52 = vadd.f32 %v1895_v48, %v1801_v61  ;;  %v2233_v48 = vld [vmem:[%s3899_s2] sm:$0x1] }
 0x2da   : > { %v2288_v42 = vsel %vm2234_vm9, %v2228_v34, 0.0  ;;  %v2335_v7 = vmul.f32 %v2228_v34, %v2228_v34 }
 0x2db   : > { %v2289_v23 = vadd.f32 %v2288_v42, %v2287_v13 }
 0x2dc   : > { %v2393_v43 = vsel %vm2234_vm9, %v2335_v7, 0.0  ;;  %v2191_v62 = vpop.f32.mrf.mxu0  ;;  %v1768_v16 = vpop.f32.mrf.mxu1  ;;  %v2307_v7 = vld [vmem:[%s3900_s3] sm:$0x1] }
 0x2dd   : > { %v2394_v19 = vadd.f32 %v2393_v43, %v2392_v11  ;;  %v2053_v27 = vpop.f32.mrf.mxu3  ;;  %v1803_v24 = vadd.f32 %v1768_v16, %v3697_v63 }
 0x2de   : > { %v2091_v57 = vadd.f32 %v2053_v27, %v1933_v52 }
 0x2e0   : > { %v2229_v55 = vadd.f32 %v2191_v62, %v2091_v57  ;;  %v1897_v60 = vpop.f32.mrf.mxu2 }
 0x2e1   : > { %v1934_v4 = vadd.f32 %v1897_v60, %v1802_v47 }
 0x2e2   : > { %v2290_v25 = vsel %vm2234_vm9, %v2229_v55, 0.0  ;;  %v2336_v18 = vmul.f32 %v2229_v55, %v2229_v55 }
 0x2e3   : > { %v2291_v8 = vadd.f32 %v2290_v25, %v2289_v23 }
 0x2e4   : > { %v2395_v41 = vsel %vm2234_vm9, %v2336_v18, 0.0  ;;  %v2193_v33 = vpop.f32.mrf.mxu0  ;;  %v1770_v2 = vpop.f32.mrf.mxu1 }
 0x2e5   : > { %v2396_v44 = vadd.f32 %v2395_v41, %v2394_v19  ;;  %v2055_v30 = vpop.f32.mrf.mxu3  ;;  %v1804_v35 = vadd.f32 %v1770_v2, %v3702_v46 }
 0x2e6   : > { %v2092_v59 = vadd.f32 %v2055_v30, %v1934_v4 }
 0x2e8   : > { %v2230_v15 = vadd.f32 %v2193_v33, %v2092_v59  ;;  %v1900_v3 = vpop.f32.mrf.mxu2 }
 0x2e9   : > { %v1935_v58 = vadd.f32 %v1900_v3, %v1803_v24 }
 0x2ea   : > { %v2292_v29 = vsel %vm2234_vm9, %v2230_v15, 0.0  ;;  %v2337_v31 = vmul.f32 %v2230_v15, %v2230_v15 }
 0x2eb   : > { %v2293_v20 = vadd.f32 %v2292_v29, %v2291_v8 }
 0x2ec   : > { %v2397_v10 = vsel %vm2234_vm9, %v2337_v31, 0.0  ;;  %v2196_v6 = vpop.f32.mrf.mxu0 }
 0x2ed   : > { %v2398_v40 = vadd.f32 %v2397_v10, %v2396_v44  ;;  %v2058_v14 = vpop.f32.mrf.mxu3 }
 0x2ee   : > { %v2093_v5 = vadd.f32 %v2058_v14, %v1935_v58 }
 0x2f0   : > { %v2231_v21 = vadd.f32 %v2196_v6, %v2093_v5  ;;  %v1902_v56 = vpop.f32.mrf.mxu2 }
 0x2f1   : > { %v1936_v45 = vadd.f32 %v1902_v56, %v1804_v35 }
 0x2f2   : > { %v2294_v12 = vsel %vm2234_vm9, %v2231_v21, 0.0  ;;  %v2338_v63 = vmul.f32 %v2231_v21, %v2231_v21 }
 0x2f3   : > { %v2295_v39 = vadd.f32 %v2294_v12, %v2293_v20 }
 0x2f4   : > { %v2399_v1 = vsel %vm2234_vm9, %v2338_v63, 0.0  ;;  %v2198_v36 = vpop.f32.mrf.mxu0 }
 0x2f5   : > { %v2400_v28 = vadd.f32 %v2399_v1, %v2398_v40  ;;  %v2060_v0 = vpop.f32.mrf.mxu3 }
 0x2f6   : > { %v2094_v9 = vadd.f32 %v2060_v0, %v1936_v45 }
 0x2f8   : > { %v2232_v22 = vadd.f32 %v2198_v36, %v2094_v9 }
 0x2fa   : > { %v2296_v32 = vsel %vm2234_vm9, %v2232_v22, 0.0  ;;  %v2339_v49 = vmul.f32 %v2232_v22, %v2232_v22 }
 0x2fb   : > { %v2297_v51 = vadd.f32 %v2296_v32, %v2295_v39 }
 0x2fc   : > { %v2401_v37 = vsel %vm2234_vm9, %v2339_v49, 0.0 }
 0x2fd   : > { %v2298_v46 = vrot.slane %v2297_v51, 4  ;;  %v2402_v17 = vadd.f32 %v2401_v37, %v2400_v28 }
 0x2ff   : > { %v2299_v13 = vadd.f32 %v2298_v46, %v2297_v51  ;;  %v2403_v54 = vrot.slane %v2402_v17, 4 }
 0x301   : > { %v2300_v53 = vrot.slane %v2299_v13, 2  ;;  %v2404_v11 = vadd.f32 %v2403_v54, %v2402_v17 }
 0x303   : > { %v2301_v38 = vadd.f32 %v2300_v53, %v2299_v13  ;;  %v2405_v50 = vrot.slane %v2404_v11, 2 }
 0x305   : > { %v2302_v34 = vrot.slane %v2301_v38, 1  ;;  %v2406_v61 = vadd.f32 %v2405_v50, %v2404_v11 }
 0x307   : > { %v2303_v26 = vadd.f32 %v2302_v34, %v2301_v38  ;;  %v2407_v42 = vrot.slane %v2406_v61, 1 }
 0x309   : > { %v2304_v52 = vadd.f32 %v2303_v26, %v2233_v48  ;;  %v2408_v23 = vadd.f32 %v2407_v42, %v2406_v61 }
 0x30b   : > { %2306 = vst.msk [vmem:[%s3899_s2] sm:$0x1] %vm2305_vm10, %v2304_v52  ;;  %v2409_v43 = vadd.f32 %v2408_v23, %v2307_v7 }
 0x30d   : > { %2410 = vst.msk [vmem:[%s3900_s3] sm:$0x1] %vm2305_vm10, %v2409_v43 }
 0x30e PF: > { %s14_s12 = sadd.s32 1, %s2733_s12  }
 0x30f   : > { %p11_p5 = scmp.ge.s32.totalorder %s14_s12, 4  }
 0x311   :  { %13 = sbr.rel (!%p11_p5) target bundleno = 1 (0x1), region = 66 }

</bundles_post_ra>
